<compile_context>
chip_gen: v6e
topology: v6e:2x2x1
jax: 0.10.0
libtpu: 0.0.40
codegen_flags: <defaults>
</compile_context>

<pallas_src>
import numpy as np
import jax
import jax.numpy as jnp
from jax.experimental import pallas as pl
from jax.experimental.pallas import tpu as pltpu


# ----------------------------------------------------------------------------
# Pallas kernels
# ----------------------------------------------------------------------------
def _mm_bias_kernel(p_ref, w_ref, b_ref, o_ref):
    """One M-tile of out = patches @ weights + bias.

    Taps are folded into the contraction dim (K <= 1152 for this network), so a
    single MXU matmul covers the whole receptive field — no K grid axis and no
    accumulator scratch needed. bf16 operands, f32 accumulation.
    """
    o_ref[...] = (
        jnp.dot(p_ref[...], w_ref[...], preferred_element_type=jnp.float32)
        + b_ref[...]
    ).astype(o_ref.dtype)


def _affine_relu_kernel(x_ref, s_ref, t_ref, o_ref):
    """relu(x * scale + shift) — BatchNorm affine + ReLU."""
    o_ref[...] = jnp.maximum(x_ref[...] * s_ref[...] + t_ref[...], 0.0)


def _affine_add_relu_kernel(y_ref, x_ref, s_ref, t_ref, o_ref):
    """relu(x + BN(y)) — fused norm2-affine + residual add + ReLU (identity path)."""
    o_ref[...] = jnp.maximum(x_ref[...] + y_ref[...] * s_ref[...] + t_ref[...], 0.0)


def _affine2_add_relu_kernel(y_ref, x_ref, sy_ref, ty_ref, sx_ref, tx_ref, o_ref):
    """relu(BN(x_down) + BN(y)) — fused norm3 + norm2 + residual add + ReLU."""
    o_ref[...] = jnp.maximum(
        x_ref[...] * sx_ref[...] + tx_ref[...]
        + y_ref[...] * sy_ref[...] + ty_ref[...], 0.0)


# ----------------------------------------------------------------------------
# Tiling helpers / pallas_call wrappers
# ----------------------------------------------------------------------------
_CONV_TILE_M = 512      # conv M-tile (review: 512-1024; 512 is safe on v5e/v7x VMEM)
_EW_TILE_CAP = 1024     # elementwise row-tile cap


def _row_tile(M, cap=_EW_TILE_CAP):
    """Largest row tile <= cap that divides M and is a multiple of 8."""
    if M <= cap:
        return M
    t = cap - (cap % 8)
    while t >= 8:
        if M % t == 0:
            return t
        t -= 8
    return M  # fallback: single whole-array block


def _ew_call(kernel, tiled, consts):
    """Row-tiled elementwise pallas_call.

    tiled:  list of (M, C) f32 arrays, blocked over rows (pipelined DMA).
    consts: list of (1, C) f32 arrays (per-channel scale/shift), VMEM-resident.
    """
    M, C = tiled[0].shape
    tm = _row_tile(M)
    in_specs = ([pl.BlockSpec((tm, C), lambda i: (i, 0)) for _ in tiled]
                + [pl.BlockSpec((1, C), lambda i: (0, 0)) for _ in consts])
    return pl.pallas_call(
        kernel,
        out_shape=jax.ShapeDtypeStruct((M, C), jnp.float32),
        grid_spec=pltpu.PrefetchScalarGridSpec(
            num_scalar_prefetch=0,
            grid=(M // tm,),
            in_specs=in_specs,
            out_specs=pl.BlockSpec((tm, C), lambda i: (i, 0)),
        ),
        compiler_params=pltpu.CompilerParams(dimension_semantics=("parallel",)),
    )(*tiled, *consts)


def _matmul_bias(P, Wm, b):
    """out[M, Cout] = P[M, K] @ Wm[K, Cout] + b, tiled over M only."""
    M, K = P.shape
    Cout = Wm.shape[1]
    if M <= _CONV_TILE_M:
        Mpad = -(-M // 8) * 8
        tm = Mpad
    else:
        tm = _CONV_TILE_M
        Mpad = -(-M // tm) * tm
    if Mpad != M:
        P = jnp.pad(P, ((0, Mpad - M), (0, 0)))

    out = pl.pallas_call(
        _mm_bias_kernel,
        out_shape=jax.ShapeDtypeStruct((Mpad, Cout), jnp.float32),
        grid_spec=pltpu.PrefetchScalarGridSpec(
            num_scalar_prefetch=0,
            grid=(Mpad // tm,),
            in_specs=[
                pl.BlockSpec((tm, K), lambda i: (i, 0)),
                pl.BlockSpec((K, Cout), lambda i: (0, 0)),   # full weights, VMEM resident
                pl.BlockSpec((1, Cout), lambda i: (0, 0)),
            ],
            out_specs=pl.BlockSpec((tm, Cout), lambda i: (i, 0)),
        ),
        compiler_params=pltpu.CompilerParams(dimension_semantics=("parallel",)),
    )(P.astype(jnp.bfloat16), Wm.astype(jnp.bfloat16),
      b.reshape(1, Cout).astype(jnp.float32))

    return out[:M] if Mpad != M else out


def conv2d(x, w, b, stride=1, padding=0):
    """x: (N,H,W,Cin) f32; w: (KH,KW,Cin,Cout); b: (Cout,). Returns NHWC f32."""
    N, H, W, Cin = x.shape
    KH, KW, _, Cout = w.shape
    Ho = (H + 2 * padding - KH) // stride + 1
    Wo = (W + 2 * padding - KW) // stride + 1
    M = N * Ho * Wo

    xb = x.astype(jnp.bfloat16)            # bf16 MXU operands, f32 accumulation

    if KH == 1 and KW == 1 and padding == 0:
        # 1x1 conv (downsample / output head): plain (M,Cin) @ (Cin,Cout).
        if stride != 1:
            xb = xb[:, ::stride, ::stride, :]
        P = xb.reshape(M, Cin)
        Wm = w.reshape(Cin, Cout)
    else:
        # im2col with taps folded into K: patches (M, KH*KW*Cin).
        # TODO(synk): generate tap windows inside the kernel (halo DMA from an
        # ANY-space ref) to avoid materializing the KH*KW-inflated patch matrix
        # in HBM; kept XLA-side here for lowering robustness.
        xp = jnp.pad(xb, ((0, 0), (padding, padding), (padding, padding), (0, 0)))
        taps = []
        for kh in range(KH):
            for kw in range(KW):
                taps.append(
                    xp[:,
                       kh:kh + stride * (Ho - 1) + 1:stride,
                       kw:kw + stride * (Wo - 1) + 1:stride,
                       :])
        P = jnp.concatenate(taps, axis=-1).reshape(M, KH * KW * Cin)
        Wm = w.reshape(KH * KW * Cin, Cout)

    out = _matmul_bias(P, Wm, b)
    return out.reshape(N, Ho, Wo, Cout)


# ----------------------------------------------------------------------------
# BatchNorm (training-mode batch statistics, gamma=1, beta=0)
# ----------------------------------------------------------------------------
def bn_scale_shift(x, eps=1e-5):
    """Single-pass moments -> per-channel (scale, shift) for y = x*scale + shift."""
    C = x.shape[-1]
    xf = x.reshape(-1, C).astype(jnp.float32)
    n = xf.shape[0]
    s = jnp.sum(xf, axis=0)
    ss = jnp.sum(xf * xf, axis=0)
    mean = s / n
    var = jnp.maximum(ss / n - mean * mean, 0.0)   # biased variance (PyTorch norm path)
    scale = jax.lax.rsqrt(var + eps)
    shift = -mean * scale
    return scale.reshape(1, C), shift.reshape(1, C)


def bn_relu(x):
    N, H, W, C = x.shape
    scale, shift = bn_scale_shift(x)
    y = _ew_call(_affine_relu_kernel, [x.reshape(-1, C)], [scale, shift])
    return y.reshape(N, H, W, C)


# ----------------------------------------------------------------------------
# Parameters (deterministic, kaiming_normal fan_out / relu as in __init__)
# ----------------------------------------------------------------------------
def _conv_param(key, kh, kw, cin, cout):
    k1, k2 = jax.random.split(key)
    fan_out = cout * kh * kw
    w = jax.random.normal(k1, (kh, kw, cin, cout), jnp.float32) * np.sqrt(2.0 / fan_out)
    bound = 1.0 / np.sqrt(cin * kh * kw)
    b = jax.random.uniform(k2, (cout,), jnp.float32, -bound, bound)
    return w, b


def init_params(key):
    keys = iter(jax.random.split(key, 32))
    params = {}
    params['conv1'] = _conv_param(next(keys), 7, 7, 3, 64)

    def block(cin, cout, stride):
        p = {
            'conv1': _conv_param(next(keys), 3, 3, cin, cout),
            'conv2': _conv_param(next(keys), 3, 3, cout, cout),
        }
        if not (stride == 1 and cin == cout):
            p['down'] = _conv_param(next(keys), 1, 1, cin, cout)
        return p

    params['l1b1'] = block(64, 64, 1)
    params['l1b2'] = block(64, 64, 1)
    params['l2b1'] = block(64, 96, 2)
    params['l2b2'] = block(96, 96, 1)
    params['l3b1'] = block(96, 128, 2)
    params['l3b2'] = block(128, 128, 1)
    params['conv2'] = _conv_param(next(keys), 1, 1, 128, 128)
    return params


# ----------------------------------------------------------------------------
# Forward
# ----------------------------------------------------------------------------
def residual_block(x, p, stride):
    w1, b1 = p['conv1']
    w2, b2 = p['conv2']
    y = conv2d(x, w1, b1, stride=stride, padding=1)
    y = bn_relu(y)                                   # norm1 + relu
    y = conv2d(y, w2, b2, stride=1, padding=1)
    sy, ty = bn_scale_shift(y)                       # norm2 stats (single pass)
    N, H, W, C = y.shape
    yf = y.reshape(-1, C)
    if 'down' in p:
        wd, bd = p['down']
        xd = conv2d(x, wd, bd, stride=stride, padding=0)
        sx, tx = bn_scale_shift(xd)                  # norm3 stats
        out = _ew_call(_affine2_add_relu_kernel,
                       [yf, xd.reshape(-1, C)], [sy, ty, sx, tx])
    else:
        out = _ew_call(_affine_add_relu_kernel,
                       [yf, x.reshape(-1, C)], [sy, ty])
    return out.reshape(N, H, W, C)


def basic_encoder(x_nchw, params):
    # NCHW (PyTorch convention) -> NHWC for the kernels.
    # TODO(synk): list/tuple input (dual_inp concat+split) is trivial glue and
    # is omitted; only the single-tensor path is implemented.
    x = jnp.transpose(x_nchw, (0, 2, 3, 1)).astype(jnp.float32)

    w, b = params['conv1']
    x = conv2d(x, w, b, stride=2, padding=3)         # downsample=3 -> stride 2
    x = bn_relu(x)                                   # norm1 + relu1

    for name, stride in [('l1b1', 1), ('l1b2', 1),
                         ('l2b1', 2), ('l2b2', 1),
                         ('l3b1', 2), ('l3b2', 1)]:
        x = residual_block(x, params[name], stride)

    w, b = params['conv2']
    x = conv2d(x, w, b, stride=1, padding=0)         # output head, no norm/relu

    return jnp.transpose(x, (0, 3, 1, 2))            # back to NCHW


if __name__ == "__main__":
    key = jax.random.PRNGKey(0)
    kx, kp = jax.random.split(key)
    x = jax.random.normal(kx, (2, 3, 16, 16), jnp.float32)   # N=2, C=3, H=W=16
    params = init_params(kp)
    out = jax.jit(basic_encoder)(x, params)
    out = jax.block_until_ready(out)
    assert out.shape == (2, 128, 2, 2), out.shape
    assert bool(jnp.all(jnp.isfinite(out)))
    print("KERNEL_OK")
</pallas_src>

<mosaic_0001>
module attributes {stable_mosaic.version = 11 : i64} {
  func.func @_mm_bias_kernel(%arg0: i32, %arg1: memref<128x147xbf16, #tpu.memory_space<vmem>>, %arg2: memref<147x64xbf16, #tpu.memory_space<vmem>>, %arg3: memref<1x64xf32, #tpu.memory_space<vmem>>, %arg4: memref<128x64xf32, #tpu.memory_space<vmem>>) attributes {dimension_semantics = [#tpu.dimension_semantics<parallel>], iteration_bounds = array<i64: 1>, scalar_prefetch = 0 : i64, scratch_operands = 0 : i64, tpu.core_type = #tpu.core_type<tc>, window_params = [{transform_indices = @transform_0, window_bounds = array<i64: 128, 147>}, {pipeline_mode = #tpu.pipeline_mode<synchronous>, transform_indices = @transform_1, window_bounds = array<i64: 147, 64>}, {pipeline_mode = #tpu.pipeline_mode<synchronous>, transform_indices = @transform_2, window_bounds = array<i64: 1, 64>}, {transform_indices = @transform_3, window_bounds = array<i64: 128, 64>}]} {
    %c0 = arith.constant 0 : index
    %c0_0 = arith.constant 0 : index
    %0 = vector.load %arg1[%c0, %c0_0] : memref<128x147xbf16, #tpu.memory_space<vmem>>, vector<128x147xbf16>
    %c0_1 = arith.constant 0 : index
    %c0_2 = arith.constant 0 : index
    %1 = vector.load %arg2[%c0_1, %c0_2] : memref<147x64xbf16, #tpu.memory_space<vmem>>, vector<147x64xbf16>
    %cst = arith.constant dense<0.000000e+00> : vector<128x64xf32>
    %2 = tpu.matmul %0, %1, %cst {dimension_numbers = #tpu.dot_dimension_numbers<[1], [0], [0], [1], [0, 0, 1, 1], [], []>} : vector<128x147xbf16>, vector<147x64xbf16>, vector<128x64xf32> -> vector<128x64xf32>
    %c0_3 = arith.constant 0 : index
    %c0_4 = arith.constant 0 : index
    %3 = vector.load %arg3[%c0_3, %c0_4] : memref<1x64xf32, #tpu.memory_space<vmem>>, vector<1x64xf32>
    %4 = vector.broadcast %3 : vector<1x64xf32> to vector<128x64xf32>
    %5 = arith.addf %2, %4 : vector<128x64xf32>
    %c0_5 = arith.constant 0 : index
    %c0_6 = arith.constant 0 : index
    %6 = vector.load %arg4[%c0_5, %c0_6] : memref<128x64xf32, #tpu.memory_space<vmem>>, vector<128x64xf32>
    tpu.vector_store %arg4[%c0_5, %c0_6], %5 {strides = array<i32>} : memref<128x64xf32, #tpu.memory_space<vmem>>, vector<128x64xf32>,
    return
  }
  func.func @transform_0(%arg0: i32) -> (i32, i32) {
    %c0_i32 = arith.constant 0 : i32
    %c0_i32_0 = arith.constant 0 : i32
    return %arg0, %c0_i32 : i32, i32
  }
  func.func @transform_1(%arg0: i32) -> (i32, i32) {
    %c0_i32 = arith.constant 0 : i32
    %c0_i32_0 = arith.constant 0 : i32
    %c0_i32_1 = arith.constant 0 : i32
    return %c0_i32, %c0_i32_0 : i32, i32
  }
  func.func @transform_2(%arg0: i32) -> (i32, i32) {
    %c0_i32 = arith.constant 0 : i32
    %c0_i32_0 = arith.constant 0 : i32
    %c0_i32_1 = arith.constant 0 : i32
    return %c0_i32, %c0_i32_0 : i32, i32
  }
  func.func @transform_3(%arg0: i32) -> (i32, i32) {
    %c0_i32 = arith.constant 0 : i32
    %c0_i32_0 = arith.constant 0 : i32
    return %arg0, %c0_i32 : i32, i32
  }
}

module attributes {stable_mosaic.version = 11 : i64} {
  func.func @_affine_relu_kernel(%arg0: i32, %arg1: memref<128x64xf32, #tpu.memory_space<vmem>>, %arg2: memref<1x64xf32, #tpu.memory_space<vmem>>, %arg3: memref<1x64xf32, #tpu.memory_space<vmem>>, %arg4: memref<128x64xf32, #tpu.memory_space<vmem>>) attributes {dimension_semantics = [#tpu.dimension_semantics<parallel>], iteration_bounds = array<i64: 1>, scalar_prefetch = 0 : i64, scratch_operands = 0 : i64, tpu.core_type = #tpu.core_type<tc>, window_params = [{transform_indices = @transform_0, window_bounds = array<i64: 128, 64>}, {pipeline_mode = #tpu.pipeline_mode<synchronous>, transform_indices = @transform_1, window_bounds = array<i64: 1, 64>}, {pipeline_mode = #tpu.pipeline_mode<synchronous>, transform_indices = @transform_2, window_bounds = array<i64: 1, 64>}, {transform_indices = @transform_3, window_bounds = array<i64: 128, 64>}]} {
    %c0 = arith.constant 0 : index
    %c0_0 = arith.constant 0 : index
    %0 = vector.load %arg1[%c0, %c0_0] : memref<128x64xf32, #tpu.memory_space<vmem>>, vector<128x64xf32>
    %c0_1 = arith.constant 0 : index
    %c0_2 = arith.constant 0 : index
    %1 = vector.load %arg2[%c0_1, %c0_2] : memref<1x64xf32, #tpu.memory_space<vmem>>, vector<1x64xf32>
    %2 = vector.broadcast %1 : vector<1x64xf32> to vector<128x64xf32>
    %3 = arith.mulf %0, %2 : vector<128x64xf32>
    %c0_3 = arith.constant 0 : index
    %c0_4 = arith.constant 0 : index
    %4 = vector.load %arg3[%c0_3, %c0_4] : memref<1x64xf32, #tpu.memory_space<vmem>>, vector<1x64xf32>
    %5 = vector.broadcast %4 : vector<1x64xf32> to vector<128x64xf32>
    %6 = arith.addf %3, %5 : vector<128x64xf32>
    %cst = arith.constant 0.000000e+00 : f32
    %7 = vector.broadcast %cst : f32 to vector<128x64xf32>
    %8 = arith.maximumf %6, %7 : vector<128x64xf32>
    %c0_5 = arith.constant 0 : index
    %c0_6 = arith.constant 0 : index
    %9 = vector.load %arg4[%c0_5, %c0_6] : memref<128x64xf32, #tpu.memory_space<vmem>>, vector<128x64xf32>
    tpu.vector_store %arg4[%c0_5, %c0_6], %8 {strides = array<i32>} : memref<128x64xf32, #tpu.memory_space<vmem>>, vector<128x64xf32>,
    return
  }
  func.func @transform_0(%arg0: i32) -> (i32, i32) {
    %c0_i32 = arith.constant 0 : i32
    %c0_i32_0 = arith.constant 0 : i32
    return %arg0, %c0_i32 : i32, i32
  }
  func.func @transform_1(%arg0: i32) -> (i32, i32) {
    %c0_i32 = arith.constant 0 : i32
    %c0_i32_0 = arith.constant 0 : i32
    %c0_i32_1 = arith.constant 0 : i32
    return %c0_i32, %c0_i32_0 : i32, i32
  }
  func.func @transform_2(%arg0: i32) -> (i32, i32) {
    %c0_i32 = arith.constant 0 : i32
    %c0_i32_0 = arith.constant 0 : i32
    %c0_i32_1 = arith.constant 0 : i32
    return %c0_i32, %c0_i32_0 : i32, i32
  }
  func.func @transform_3(%arg0: i32) -> (i32, i32) {
    %c0_i32 = arith.constant 0 : i32
    %c0_i32_0 = arith.constant 0 : i32
    return %arg0, %c0_i32 : i32, i32
  }
}

module attributes {stable_mosaic.version = 11 : i64} {
  func.func @_mm_bias_kernel(%arg0: i32, %arg1: memref<128x576xbf16, #tpu.memory_space<vmem>>, %arg2: memref<576x64xbf16, #tpu.memory_space<vmem>>, %arg3: memref<1x64xf32, #tpu.memory_space<vmem>>, %arg4: memref<128x64xf32, #tpu.memory_space<vmem>>) attributes {dimension_semantics = [#tpu.dimension_semantics<parallel>], iteration_bounds = array<i64: 1>, scalar_prefetch = 0 : i64, scratch_operands = 0 : i64, tpu.core_type = #tpu.core_type<tc>, window_params = [{transform_indices = @transform_0, window_bounds = array<i64: 128, 576>}, {pipeline_mode = #tpu.pipeline_mode<synchronous>, transform_indices = @transform_1, window_bounds = array<i64: 576, 64>}, {pipeline_mode = #tpu.pipeline_mode<synchronous>, transform_indices = @transform_2, window_bounds = array<i64: 1, 64>}, {transform_indices = @transform_3, window_bounds = array<i64: 128, 64>}]} {
    %c0 = arith.constant 0 : index
    %c0_0 = arith.constant 0 : index
    %0 = vector.load %arg1[%c0, %c0_0] : memref<128x576xbf16, #tpu.memory_space<vmem>>, vector<128x576xbf16>
    %c0_1 = arith.constant 0 : index
    %c0_2 = arith.constant 0 : index
    %1 = vector.load %arg2[%c0_1, %c0_2] : memref<576x64xbf16, #tpu.memory_space<vmem>>, vector<576x64xbf16>
    %cst = arith.constant dense<0.000000e+00> : vector<128x64xf32>
    %2 = tpu.matmul %0, %1, %cst {dimension_numbers = #tpu.dot_dimension_numbers<[1], [0], [0], [1], [0, 0, 1, 1], [], []>} : vector<128x576xbf16>, vector<576x64xbf16>, vector<128x64xf32> -> vector<128x64xf32>
    %c0_3 = arith.constant 0 : index
    %c0_4 = arith.constant 0 : index
    %3 = vector.load %arg3[%c0_3, %c0_4] : memref<1x64xf32, #tpu.memory_space<vmem>>, vector<1x64xf32>
    %4 = vector.broadcast %3 : vector<1x64xf32> to vector<128x64xf32>
    %5 = arith.addf %2, %4 : vector<128x64xf32>
    %c0_5 = arith.constant 0 : index
    %c0_6 = arith.constant 0 : index
    %6 = vector.load %arg4[%c0_5, %c0_6] : memref<128x64xf32, #tpu.memory_space<vmem>>, vector<128x64xf32>
    tpu.vector_store %arg4[%c0_5, %c0_6], %5 {strides = array<i32>} : memref<128x64xf32, #tpu.memory_space<vmem>>, vector<128x64xf32>,
    return
  }
  func.func @transform_0(%arg0: i32) -> (i32, i32) {
    %c0_i32 = arith.constant 0 : i32
    %c0_i32_0 = arith.constant 0 : i32
    return %arg0, %c0_i32 : i32, i32
  }
  func.func @transform_1(%arg0: i32) -> (i32, i32) {
    %c0_i32 = arith.constant 0 : i32
    %c0_i32_0 = arith.constant 0 : i32
    %c0_i32_1 = arith.constant 0 : i32
    return %c0_i32, %c0_i32_0 : i32, i32
  }
  func.func @transform_2(%arg0: i32) -> (i32, i32) {
    %c0_i32 = arith.constant 0 : i32
    %c0_i32_0 = arith.constant 0 : i32
    %c0_i32_1 = arith.constant 0 : i32
    return %c0_i32, %c0_i32_0 : i32, i32
  }
  func.func @transform_3(%arg0: i32) -> (i32, i32) {
    %c0_i32 = arith.constant 0 : i32
    %c0_i32_0 = arith.constant 0 : i32
    return %arg0, %c0_i32 : i32, i32
  }
}

module attributes {stable_mosaic.version = 11 : i64} {
  func.func @_affine_add_relu_kernel(%arg0: i32, %arg1: memref<128x64xf32, #tpu.memory_space<vmem>>, %arg2: memref<128x64xf32, #tpu.memory_space<vmem>>, %arg3: memref<1x64xf32, #tpu.memory_space<vmem>>, %arg4: memref<1x64xf32, #tpu.memory_space<vmem>>, %arg5: memref<128x64xf32, #tpu.memory_space<vmem>>) attributes {dimension_semantics = [#tpu.dimension_semantics<parallel>], iteration_bounds = array<i64: 1>, scalar_prefetch = 0 : i64, scratch_operands = 0 : i64, tpu.core_type = #tpu.core_type<tc>, window_params = [{transform_indices = @transform_0, window_bounds = array<i64: 128, 64>}, {transform_indices = @transform_1, window_bounds = array<i64: 128, 64>}, {pipeline_mode = #tpu.pipeline_mode<synchronous>, transform_indices = @transform_2, window_bounds = array<i64: 1, 64>}, {pipeline_mode = #tpu.pipeline_mode<synchronous>, transform_indices = @transform_3, window_bounds = array<i64: 1, 64>}, {transform_indices = @transform_4, window_bounds = array<i64: 128, 64>}]} {
    %c0 = arith.constant 0 : index
    %c0_0 = arith.constant 0 : index
    %0 = vector.load %arg2[%c0, %c0_0] : memref<128x64xf32, #tpu.memory_space<vmem>>, vector<128x64xf32>
    %c0_1 = arith.constant 0 : index
    %c0_2 = arith.constant 0 : index
    %1 = vector.load %arg1[%c0_1, %c0_2] : memref<128x64xf32, #tpu.memory_space<vmem>>, vector<128x64xf32>
    %c0_3 = arith.constant 0 : index
    %c0_4 = arith.constant 0 : index
    %2 = vector.load %arg3[%c0_3, %c0_4] : memref<1x64xf32, #tpu.memory_space<vmem>>, vector<1x64xf32>
    %3 = vector.broadcast %2 : vector<1x64xf32> to vector<128x64xf32>
    %4 = arith.mulf %1, %3 : vector<128x64xf32>
    %5 = arith.addf %0, %4 : vector<128x64xf32>
    %c0_5 = arith.constant 0 : index
    %c0_6 = arith.constant 0 : index
    %6 = vector.load %arg4[%c0_5, %c0_6] : memref<1x64xf32, #tpu.memory_space<vmem>>, vector<1x64xf32>
    %7 = vector.broadcast %6 : vector<1x64xf32> to vector<128x64xf32>
    %8 = arith.addf %5, %7 : vector<128x64xf32>
    %cst = arith.constant 0.000000e+00 : f32
    %9 = vector.broadcast %cst : f32 to vector<128x64xf32>
    %10 = arith.maximumf %8, %9 : vector<128x64xf32>
    %c0_7 = arith.constant 0 : index
    %c0_8 = arith.constant 0 : index
    %11 = vector.load %arg5[%c0_7, %c0_8] : memref<128x64xf32, #tpu.memory_space<vmem>>, vector<128x64xf32>
    tpu.vector_store %arg5[%c0_7, %c0_8], %10 {strides = array<i32>} : memref<128x64xf32, #tpu.memory_space<vmem>>, vector<128x64xf32>,
    return
  }
  func.func @transform_0(%arg0: i32) -> (i32, i32) {
    %c0_i32 = arith.constant 0 : i32
    %c0_i32_0 = arith.constant 0 : i32
    return %arg0, %c0_i32 : i32, i32
  }
  func.func @transform_1(%arg0: i32) -> (i32, i32) {
    %c0_i32 = arith.constant 0 : i32
    %c0_i32_0 = arith.constant 0 : i32
    return %arg0, %c0_i32 : i32, i32
  }
  func.func @transform_2(%arg0: i32) -> (i32, i32) {
    %c0_i32 = arith.constant 0 : i32
    %c0_i32_0 = arith.constant 0 : i32
    %c0_i32_1 = arith.constant 0 : i32
    return %c0_i32, %c0_i32_0 : i32, i32
  }
  func.func @transform_3(%arg0: i32) -> (i32, i32) {
    %c0_i32 = arith.constant 0 : i32
    %c0_i32_0 = arith.constant 0 : i32
    %c0_i32_1 = arith.constant 0 : i32
    return %c0_i32, %c0_i32_0 : i32, i32
  }
  func.func @transform_4(%arg0: i32) -> (i32, i32) {
    %c0_i32 = arith.constant 0 : i32
    %c0_i32_0 = arith.constant 0 : i32
    return %arg0, %c0_i32 : i32, i32
  }
}

module attributes {stable_mosaic.version = 11 : i64} {
  func.func @_mm_bias_kernel(%arg0: i32, %arg1: memref<32x576xbf16, #tpu.memory_space<vmem>>, %arg2: memref<576x96xbf16, #tpu.memory_space<vmem>>, %arg3: memref<1x96xf32, #tpu.memory_space<vmem>>, %arg4: memref<32x96xf32, #tpu.memory_space<vmem>>) attributes {dimension_semantics = [#tpu.dimension_semantics<parallel>], iteration_bounds = array<i64: 1>, scalar_prefetch = 0 : i64, scratch_operands = 0 : i64, tpu.core_type = #tpu.core_type<tc>, window_params = [{transform_indices = @transform_0, window_bounds = array<i64: 32, 576>}, {pipeline_mode = #tpu.pipeline_mode<synchronous>, transform_indices = @transform_1, window_bounds = array<i64: 576, 96>}, {pipeline_mode = #tpu.pipeline_mode<synchronous>, transform_indices = @transform_2, window_bounds = array<i64: 1, 96>}, {transform_indices = @transform_3, window_bounds = array<i64: 32, 96>}]} {
    %c0 = arith.constant 0 : index
    %c0_0 = arith.constant 0 : index
    %0 = vector.load %arg1[%c0, %c0_0] : memref<32x576xbf16, #tpu.memory_space<vmem>>, vector<32x576xbf16>
    %c0_1 = arith.constant 0 : index
    %c0_2 = arith.constant 0 : index
    %1 = vector.load %arg2[%c0_1, %c0_2] : memref<576x96xbf16, #tpu.memory_space<vmem>>, vector<576x96xbf16>
    %cst = arith.constant dense<0.000000e+00> : vector<32x96xf32>
    %2 = tpu.matmul %0, %1, %cst {dimension_numbers = #tpu.dot_dimension_numbers<[1], [0], [0], [1], [0, 0, 1, 1], [], []>} : vector<32x576xbf16>, vector<576x96xbf16>, vector<32x96xf32> -> vector<32x96xf32>
    %c0_3 = arith.constant 0 : index
    %c0_4 = arith.constant 0 : index
    %3 = vector.load %arg3[%c0_3, %c0_4] : memref<1x96xf32, #tpu.memory_space<vmem>>, vector<1x96xf32>
    %4 = vector.broadcast %3 : vector<1x96xf32> to vector<32x96xf32>
    %5 = arith.addf %2, %4 : vector<32x96xf32>
    %c0_5 = arith.constant 0 : index
    %c0_6 = arith.constant 0 : index
    %6 = vector.load %arg4[%c0_5, %c0_6] : memref<32x96xf32, #tpu.memory_space<vmem>>, vector<32x96xf32>
    tpu.vector_store %arg4[%c0_5, %c0_6], %5 {strides = array<i32>} : memref<32x96xf32, #tpu.memory_space<vmem>>, vector<32x96xf32>,
    return
  }
  func.func @transform_0(%arg0: i32) -> (i32, i32) {
    %c0_i32 = arith.constant 0 : i32
    %c0_i32_0 = arith.constant 0 : i32
    return %arg0, %c0_i32 : i32, i32
  }
  func.func @transform_1(%arg0: i32) -> (i32, i32) {
    %c0_i32 = arith.constant 0 : i32
    %c0_i32_0 = arith.constant 0 : i32
    %c0_i32_1 = arith.constant 0 : i32
    return %c0_i32, %c0_i32_0 : i32, i32
  }
  func.func @transform_2(%arg0: i32) -> (i32, i32) {
    %c0_i32 = arith.constant 0 : i32
    %c0_i32_0 = arith.constant 0 : i32
    %c0_i32_1 = arith.constant 0 : i32
    return %c0_i32, %c0_i32_0 : i32, i32
  }
  func.func @transform_3(%arg0: i32) -> (i32, i32) {
    %c0_i32 = arith.constant 0 : i32
    %c0_i32_0 = arith.constant 0 : i32
    return %arg0, %c0_i32 : i32, i32
  }
}

module attributes {stable_mosaic.version = 11 : i64} {
  func.func @_affine_relu_kernel(%arg0: i32, %arg1: memref<32x96xf32, #tpu.memory_space<vmem>>, %arg2: memref<1x96xf32, #tpu.memory_space<vmem>>, %arg3: memref<1x96xf32, #tpu.memory_space<vmem>>, %arg4: memref<32x96xf32, #tpu.memory_space<vmem>>) attributes {dimension_semantics = [#tpu.dimension_semantics<parallel>], iteration_bounds = array<i64: 1>, scalar_prefetch = 0 : i64, scratch_operands = 0 : i64, tpu.core_type = #tpu.core_type<tc>, window_params = [{transform_indices = @transform_0, window_bounds = array<i64: 32, 96>}, {pipeline_mode = #tpu.pipeline_mode<synchronous>, transform_indices = @transform_1, window_bounds = array<i64: 1, 96>}, {pipeline_mode = #tpu.pipeline_mode<synchronous>, transform_indices = @transform_2, window_bounds = array<i64: 1, 96>}, {transform_indices = @transform_3, window_bounds = array<i64: 32, 96>}]} {
    %c0 = arith.constant 0 : index
    %c0_0 = arith.constant 0 : index
    %0 = vector.load %arg1[%c0, %c0_0] : memref<32x96xf32, #tpu.memory_space<vmem>>, vector<32x96xf32>
    %c0_1 = arith.constant 0 : index
    %c0_2 = arith.constant 0 : index
    %1 = vector.load %arg2[%c0_1, %c0_2] : memref<1x96xf32, #tpu.memory_space<vmem>>, vector<1x96xf32>
    %2 = vector.broadcast %1 : vector<1x96xf32> to vector<32x96xf32>
    %3 = arith.mulf %0, %2 : vector<32x96xf32>
    %c0_3 = arith.constant 0 : index
    %c0_4 = arith.constant 0 : index
    %4 = vector.load %arg3[%c0_3, %c0_4] : memref<1x96xf32, #tpu.memory_space<vmem>>, vector<1x96xf32>
    %5 = vector.broadcast %4 : vector<1x96xf32> to vector<32x96xf32>
    %6 = arith.addf %3, %5 : vector<32x96xf32>
    %cst = arith.constant 0.000000e+00 : f32
    %7 = vector.broadcast %cst : f32 to vector<32x96xf32>
    %8 = arith.maximumf %6, %7 : vector<32x96xf32>
    %c0_5 = arith.constant 0 : index
    %c0_6 = arith.constant 0 : index
    %9 = vector.load %arg4[%c0_5, %c0_6] : memref<32x96xf32, #tpu.memory_space<vmem>>, vector<32x96xf32>
    tpu.vector_store %arg4[%c0_5, %c0_6], %8 {strides = array<i32>} : memref<32x96xf32, #tpu.memory_space<vmem>>, vector<32x96xf32>,
    return
  }
  func.func @transform_0(%arg0: i32) -> (i32, i32) {
    %c0_i32 = arith.constant 0 : i32
    %c0_i32_0 = arith.constant 0 : i32
    return %arg0, %c0_i32 : i32, i32
  }
  func.func @transform_1(%arg0: i32) -> (i32, i32) {
    %c0_i32 = arith.constant 0 : i32
    %c0_i32_0 = arith.constant 0 : i32
    %c0_i32_1 = arith.constant 0 : i32
    return %c0_i32, %c0_i32_0 : i32, i32
  }
  func.func @transform_2(%arg0: i32) -> (i32, i32) {
    %c0_i32 = arith.constant 0 : i32
    %c0_i32_0 = arith.constant 0 : i32
    %c0_i32_1 = arith.constant 0 : i32
    return %c0_i32, %c0_i32_0 : i32, i32
  }
  func.func @transform_3(%arg0: i32) -> (i32, i32) {
    %c0_i32 = arith.constant 0 : i32
    %c0_i32_0 = arith.constant 0 : i32
    return %arg0, %c0_i32 : i32, i32
  }
}

module attributes {stable_mosaic.version = 11 : i64} {
  func.func @_mm_bias_kernel(%arg0: i32, %arg1: memref<32x864xbf16, #tpu.memory_space<vmem>>, %arg2: memref<864x96xbf16, #tpu.memory_space<vmem>>, %arg3: memref<1x96xf32, #tpu.memory_space<vmem>>, %arg4: memref<32x96xf32, #tpu.memory_space<vmem>>) attributes {dimension_semantics = [#tpu.dimension_semantics<parallel>], iteration_bounds = array<i64: 1>, scalar_prefetch = 0 : i64, scratch_operands = 0 : i64, tpu.core_type = #tpu.core_type<tc>, window_params = [{transform_indices = @transform_0, window_bounds = array<i64: 32, 864>}, {pipeline_mode = #tpu.pipeline_mode<synchronous>, transform_indices = @transform_1, window_bounds = array<i64: 864, 96>}, {pipeline_mode = #tpu.pipeline_mode<synchronous>, transform_indices = @transform_2, window_bounds = array<i64: 1, 96>}, {transform_indices = @transform_3, window_bounds = array<i64: 32, 96>}]} {
    %c0 = arith.constant 0 : index
    %c0_0 = arith.constant 0 : index
    %0 = vector.load %arg1[%c0, %c0_0] : memref<32x864xbf16, #tpu.memory_space<vmem>>, vector<32x864xbf16>
    %c0_1 = arith.constant 0 : index
    %c0_2 = arith.constant 0 : index
    %1 = vector.load %arg2[%c0_1, %c0_2] : memref<864x96xbf16, #tpu.memory_space<vmem>>, vector<864x96xbf16>
    %cst = arith.constant dense<0.000000e+00> : vector<32x96xf32>
    %2 = tpu.matmul %0, %1, %cst {dimension_numbers = #tpu.dot_dimension_numbers<[1], [0], [0], [1], [0, 0, 1, 1], [], []>} : vector<32x864xbf16>, vector<864x96xbf16>, vector<32x96xf32> -> vector<32x96xf32>
    %c0_3 = arith.constant 0 : index
    %c0_4 = arith.constant 0 : index
    %3 = vector.load %arg3[%c0_3, %c0_4] : memref<1x96xf32, #tpu.memory_space<vmem>>, vector<1x96xf32>
    %4 = vector.broadcast %3 : vector<1x96xf32> to vector<32x96xf32>
    %5 = arith.addf %2, %4 : vector<32x96xf32>
    %c0_5 = arith.constant 0 : index
    %c0_6 = arith.constant 0 : index
    %6 = vector.load %arg4[%c0_5, %c0_6] : memref<32x96xf32, #tpu.memory_space<vmem>>, vector<32x96xf32>
    tpu.vector_store %arg4[%c0_5, %c0_6], %5 {strides = array<i32>} : memref<32x96xf32, #tpu.memory_space<vmem>>, vector<32x96xf32>,
    return
  }
  func.func @transform_0(%arg0: i32) -> (i32, i32) {
    %c0_i32 = arith.constant 0 : i32
    %c0_i32_0 = arith.constant 0 : i32
    return %arg0, %c0_i32 : i32, i32
  }
  func.func @transform_1(%arg0: i32) -> (i32, i32) {
    %c0_i32 = arith.constant 0 : i32
    %c0_i32_0 = arith.constant 0 : i32
    %c0_i32_1 = arith.constant 0 : i32
    return %c0_i32, %c0_i32_0 : i32, i32
  }
  func.func @transform_2(%arg0: i32) -> (i32, i32) {
    %c0_i32 = arith.constant 0 : i32
    %c0_i32_0 = arith.constant 0 : i32
    %c0_i32_1 = arith.constant 0 : i32
    return %c0_i32, %c0_i32_0 : i32, i32
  }
  func.func @transform_3(%arg0: i32) -> (i32, i32) {
    %c0_i32 = arith.constant 0 : i32
    %c0_i32_0 = arith.constant 0 : i32
    return %arg0, %c0_i32 : i32, i32
  }
}

module attributes {stable_mosaic.version = 11 : i64} {
  func.func @_mm_bias_kernel(%arg0: i32, %arg1: memref<32x64xbf16, #tpu.memory_space<vmem>>, %arg2: memref<64x96xbf16, #tpu.memory_space<vmem>>, %arg3: memref<1x96xf32, #tpu.memory_space<vmem>>, %arg4: memref<32x96xf32, #tpu.memory_space<vmem>>) attributes {dimension_semantics = [#tpu.dimension_semantics<parallel>], iteration_bounds = array<i64: 1>, scalar_prefetch = 0 : i64, scratch_operands = 0 : i64, tpu.core_type = #tpu.core_type<tc>, window_params = [{transform_indices = @transform_0, window_bounds = array<i64: 32, 64>}, {pipeline_mode = #tpu.pipeline_mode<synchronous>, transform_indices = @transform_1, window_bounds = array<i64: 64, 96>}, {pipeline_mode = #tpu.pipeline_mode<synchronous>, transform_indices = @transform_2, window_bounds = array<i64: 1, 96>}, {transform_indices = @transform_3, window_bounds = array<i64: 32, 96>}]} {
    %c0 = arith.constant 0 : index
    %c0_0 = arith.constant 0 : index
    %0 = vector.load %arg1[%c0, %c0_0] : memref<32x64xbf16, #tpu.memory_space<vmem>>, vector<32x64xbf16>
    %c0_1 = arith.constant 0 : index
    %c0_2 = arith.constant 0 : index
    %1 = vector.load %arg2[%c0_1, %c0_2] : memref<64x96xbf16, #tpu.memory_space<vmem>>, vector<64x96xbf16>
    %cst = arith.constant dense<0.000000e+00> : vector<32x96xf32>
    %2 = tpu.matmul %0, %1, %cst {dimension_numbers = #tpu.dot_dimension_numbers<[1], [0], [0], [1], [0, 0, 1, 1], [], []>} : vector<32x64xbf16>, vector<64x96xbf16>, vector<32x96xf32> -> vector<32x96xf32>
    %c0_3 = arith.constant 0 : index
    %c0_4 = arith.constant 0 : index
    %3 = vector.load %arg3[%c0_3, %c0_4] : memref<1x96xf32, #tpu.memory_space<vmem>>, vector<1x96xf32>
    %4 = vector.broadcast %3 : vector<1x96xf32> to vector<32x96xf32>
    %5 = arith.addf %2, %4 : vector<32x96xf32>
    %c0_5 = arith.constant 0 : index
    %c0_6 = arith.constant 0 : index
    %6 = vector.load %arg4[%c0_5, %c0_6] : memref<32x96xf32, #tpu.memory_space<vmem>>, vector<32x96xf32>
    tpu.vector_store %arg4[%c0_5, %c0_6], %5 {strides = array<i32>} : memref<32x96xf32, #tpu.memory_space<vmem>>, vector<32x96xf32>,
    return
  }
  func.func @transform_0(%arg0: i32) -> (i32, i32) {
    %c0_i32 = arith.constant 0 : i32
    %c0_i32_0 = arith.constant 0 : i32
    return %arg0, %c0_i32 : i32, i32
  }
  func.func @transform_1(%arg0: i32) -> (i32, i32) {
    %c0_i32 = arith.constant 0 : i32
    %c0_i32_0 = arith.constant 0 : i32
    %c0_i32_1 = arith.constant 0 : i32
    return %c0_i32, %c0_i32_0 : i32, i32
  }
  func.func @transform_2(%arg0: i32) -> (i32, i32) {
    %c0_i32 = arith.constant 0 : i32
    %c0_i32_0 = arith.constant 0 : i32
    %c0_i32_1 = arith.constant 0 : i32
    return %c0_i32, %c0_i32_0 : i32, i32
  }
  func.func @transform_3(%arg0: i32) -> (i32, i32) {
    %c0_i32 = arith.constant 0 : i32
    %c0_i32_0 = arith.constant 0 : i32
    return %arg0, %c0_i32 : i32, i32
  }
}

module attributes {stable_mosaic.version = 11 : i64} {
  func.func @_affine2_add_relu_kernel(%arg0: i32, %arg1: memref<32x96xf32, #tpu.memory_space<vmem>>, %arg2: memref<32x96xf32, #tpu.memory_space<vmem>>, %arg3: memref<1x96xf32, #tpu.memory_space<vmem>>, %arg4: memref<1x96xf32, #tpu.memory_space<vmem>>, %arg5: memref<1x96xf32, #tpu.memory_space<vmem>>, %arg6: memref<1x96xf32, #tpu.memory_space<vmem>>, %arg7: memref<32x96xf32, #tpu.memory_space<vmem>>) attributes {dimension_semantics = [#tpu.dimension_semantics<parallel>], iteration_bounds = array<i64: 1>, scalar_prefetch = 0 : i64, scratch_operands = 0 : i64, tpu.core_type = #tpu.core_type<tc>, window_params = [{transform_indices = @transform_0, window_bounds = array<i64: 32, 96>}, {transform_indices = @transform_1, window_bounds = array<i64: 32, 96>}, {pipeline_mode = #tpu.pipeline_mode<synchronous>, transform_indices = @transform_2, window_bounds = array<i64: 1, 96>}, {pipeline_mode = #tpu.pipeline_mode<synchronous>, transform_indices = @transform_3, window_bounds = array<i64: 1, 96>}, {pipeline_mode = #tpu.pipeline_mode<synchronous>, transform_indices = @transform_4, window_bounds = array<i64: 1, 96>}, {pipeline_mode = #tpu.pipeline_mode<synchronous>, transform_indices = @transform_5, window_bounds = array<i64: 1, 96>}, {transform_indices = @transform_6, window_bounds = array<i64: 32, 96>}]} {
    %c0 = arith.constant 0 : index
    %c0_0 = arith.constant 0 : index
    %0 = vector.load %arg2[%c0, %c0_0] : memref<32x96xf32, #tpu.memory_space<vmem>>, vector<32x96xf32>
    %c0_1 = arith.constant 0 : index
    %c0_2 = arith.constant 0 : index
    %1 = vector.load %arg5[%c0_1, %c0_2] : memref<1x96xf32, #tpu.memory_space<vmem>>, vector<1x96xf32>
    %2 = vector.broadcast %1 : vector<1x96xf32> to vector<32x96xf32>
    %3 = arith.mulf %0, %2 : vector<32x96xf32>
    %c0_3 = arith.constant 0 : index
    %c0_4 = arith.constant 0 : index
    %4 = vector.load %arg6[%c0_3, %c0_4] : memref<1x96xf32, #tpu.memory_space<vmem>>, vector<1x96xf32>
    %5 = vector.broadcast %4 : vector<1x96xf32> to vector<32x96xf32>
    %6 = arith.addf %3, %5 : vector<32x96xf32>
    %c0_5 = arith.constant 0 : index
    %c0_6 = arith.constant 0 : index
    %7 = vector.load %arg1[%c0_5, %c0_6] : memref<32x96xf32, #tpu.memory_space<vmem>>, vector<32x96xf32>
    %c0_7 = arith.constant 0 : index
    %c0_8 = arith.constant 0 : index
    %8 = vector.load %arg3[%c0_7, %c0_8] : memref<1x96xf32, #tpu.memory_space<vmem>>, vector<1x96xf32>
    %9 = vector.broadcast %8 : vector<1x96xf32> to vector<32x96xf32>
    %10 = arith.mulf %7, %9 : vector<32x96xf32>
    %11 = arith.addf %6, %10 : vector<32x96xf32>
    %c0_9 = arith.constant 0 : index
    %c0_10 = arith.constant 0 : index
    %12 = vector.load %arg4[%c0_9, %c0_10] : memref<1x96xf32, #tpu.memory_space<vmem>>, vector<1x96xf32>
    %13 = vector.broadcast %12 : vector<1x96xf32> to vector<32x96xf32>
    %14 = arith.addf %11, %13 : vector<32x96xf32>
    %cst = arith.constant 0.000000e+00 : f32
    %15 = vector.broadcast %cst : f32 to vector<32x96xf32>
    %16 = arith.maximumf %14, %15 : vector<32x96xf32>
    %c0_11 = arith.constant 0 : index
    %c0_12 = arith.constant 0 : index
    %17 = vector.load %arg7[%c0_11, %c0_12] : memref<32x96xf32, #tpu.memory_space<vmem>>, vector<32x96xf32>
    tpu.vector_store %arg7[%c0_11, %c0_12], %16 {strides = array<i32>} : memref<32x96xf32, #tpu.memory_space<vmem>>, vector<32x96xf32>,
    return
  }
  func.func @transform_0(%arg0: i32) -> (i32, i32) {
    %c0_i32 = arith.constant 0 : i32
    %c0_i32_0 = arith.constant 0 : i32
    return %arg0, %c0_i32 : i32, i32
  }
  func.func @transform_1(%arg0: i32) -> (i32, i32) {
    %c0_i32 = arith.constant 0 : i32
    %c0_i32_0 = arith.constant 0 : i32
    return %arg0, %c0_i32 : i32, i32
  }
  func.func @transform_2(%arg0: i32) -> (i32, i32) {
    %c0_i32 = arith.constant 0 : i32
    %c0_i32_0 = arith.constant 0 : i32
    %c0_i32_1 = arith.constant 0 : i32
    return %c0_i32, %c0_i32_0 : i32, i32
  }
  func.func @transform_3(%arg0: i32) -> (i32, i32) {
    %c0_i32 = arith.constant 0 : i32
    %c0_i32_0 = arith.constant 0 : i32
    %c0_i32_1 = arith.constant 0 : i32
    return %c0_i32, %c0_i32_0 : i32, i32
  }
  func.func @transform_4(%arg0: i32) -> (i32, i32) {
    %c0_i32 = arith.constant 0 : i32
    %c0_i32_0 = arith.constant 0 : i32
    %c0_i32_1 = arith.constant 0 : i32
    return %c0_i32, %c0_i32_0 : i32, i32
  }
  func.func @transform_5(%arg0: i32) -> (i32, i32) {
    %c0_i32 = arith.constant 0 : i32
    %c0_i32_0 = arith.constant 0 : i32
    %c0_i32_1 = arith.constant 0 : i32
    return %c0_i32, %c0_i32_0 : i32, i32
  }
  func.func @transform_6(%arg0: i32) -> (i32, i32) {
    %c0_i32 = arith.constant 0 : i32
    %c0_i32_0 = arith.constant 0 : i32
    return %arg0, %c0_i32 : i32, i32
  }
}

module attributes {stable_mosaic.version = 11 : i64} {
  func.func @_affine_add_relu_kernel(%arg0: i32, %arg1: memref<32x96xf32, #tpu.memory_space<vmem>>, %arg2: memref<32x96xf32, #tpu.memory_space<vmem>>, %arg3: memref<1x96xf32, #tpu.memory_space<vmem>>, %arg4: memref<1x96xf32, #tpu.memory_space<vmem>>, %arg5: memref<32x96xf32, #tpu.memory_space<vmem>>) attributes {dimension_semantics = [#tpu.dimension_semantics<parallel>], iteration_bounds = array<i64: 1>, scalar_prefetch = 0 : i64, scratch_operands = 0 : i64, tpu.core_type = #tpu.core_type<tc>, window_params = [{transform_indices = @transform_0, window_bounds = array<i64: 32, 96>}, {transform_indices = @transform_1, window_bounds = array<i64: 32, 96>}, {pipeline_mode = #tpu.pipeline_mode<synchronous>, transform_indices = @transform_2, window_bounds = array<i64: 1, 96>}, {pipeline_mode = #tpu.pipeline_mode<synchronous>, transform_indices = @transform_3, window_bounds = array<i64: 1, 96>}, {transform_indices = @transform_4, window_bounds = array<i64: 32, 96>}]} {
    %c0 = arith.constant 0 : index
    %c0_0 = arith.constant 0 : index
    %0 = vector.load %arg2[%c0, %c0_0] : memref<32x96xf32, #tpu.memory_space<vmem>>, vector<32x96xf32>
    %c0_1 = arith.constant 0 : index
    %c0_2 = arith.constant 0 : index
    %1 = vector.load %arg1[%c0_1, %c0_2] : memref<32x96xf32, #tpu.memory_space<vmem>>, vector<32x96xf32>
    %c0_3 = arith.constant 0 : index
    %c0_4 = arith.constant 0 : index
    %2 = vector.load %arg3[%c0_3, %c0_4] : memref<1x96xf32, #tpu.memory_space<vmem>>, vector<1x96xf32>
    %3 = vector.broadcast %2 : vector<1x96xf32> to vector<32x96xf32>
    %4 = arith.mulf %1, %3 : vector<32x96xf32>
    %5 = arith.addf %0, %4 : vector<32x96xf32>
    %c0_5 = arith.constant 0 : index
    %c0_6 = arith.constant 0 : index
    %6 = vector.load %arg4[%c0_5, %c0_6] : memref<1x96xf32, #tpu.memory_space<vmem>>, vector<1x96xf32>
    %7 = vector.broadcast %6 : vector<1x96xf32> to vector<32x96xf32>
    %8 = arith.addf %5, %7 : vector<32x96xf32>
    %cst = arith.constant 0.000000e+00 : f32
    %9 = vector.broadcast %cst : f32 to vector<32x96xf32>
    %10 = arith.maximumf %8, %9 : vector<32x96xf32>
    %c0_7 = arith.constant 0 : index
    %c0_8 = arith.constant 0 : index
    %11 = vector.load %arg5[%c0_7, %c0_8] : memref<32x96xf32, #tpu.memory_space<vmem>>, vector<32x96xf32>
    tpu.vector_store %arg5[%c0_7, %c0_8], %10 {strides = array<i32>} : memref<32x96xf32, #tpu.memory_space<vmem>>, vector<32x96xf32>,
    return
  }
  func.func @transform_0(%arg0: i32) -> (i32, i32) {
    %c0_i32 = arith.constant 0 : i32
    %c0_i32_0 = arith.constant 0 : i32
    return %arg0, %c0_i32 : i32, i32
  }
  func.func @transform_1(%arg0: i32) -> (i32, i32) {
    %c0_i32 = arith.constant 0 : i32
    %c0_i32_0 = arith.constant 0 : i32
    return %arg0, %c0_i32 : i32, i32
  }
  func.func @transform_2(%arg0: i32) -> (i32, i32) {
    %c0_i32 = arith.constant 0 : i32
    %c0_i32_0 = arith.constant 0 : i32
    %c0_i32_1 = arith.constant 0 : i32
    return %c0_i32, %c0_i32_0 : i32, i32
  }
  func.func @transform_3(%arg0: i32) -> (i32, i32) {
    %c0_i32 = arith.constant 0 : i32
    %c0_i32_0 = arith.constant 0 : i32
    %c0_i32_1 = arith.constant 0 : i32
    return %c0_i32, %c0_i32_0 : i32, i32
  }
  func.func @transform_4(%arg0: i32) -> (i32, i32) {
    %c0_i32 = arith.constant 0 : i32
    %c0_i32_0 = arith.constant 0 : i32
    return %arg0, %c0_i32 : i32, i32
  }
}

module attributes {stable_mosaic.version = 11 : i64} {
  func.func @_mm_bias_kernel(%arg0: i32, %arg1: memref<8x96xbf16, #tpu.memory_space<vmem>>, %arg2: memref<96x128xbf16, #tpu.memory_space<vmem>>, %arg3: memref<1x128xf32, #tpu.memory_space<vmem>>, %arg4: memref<8x128xf32, #tpu.memory_space<vmem>>) attributes {dimension_semantics = [#tpu.dimension_semantics<parallel>], iteration_bounds = array<i64: 1>, scalar_prefetch = 0 : i64, scratch_operands = 0 : i64, tpu.core_type = #tpu.core_type<tc>, window_params = [{transform_indices = @transform_0, window_bounds = array<i64: 8, 96>}, {pipeline_mode = #tpu.pipeline_mode<synchronous>, transform_indices = @transform_1, window_bounds = array<i64: 96, 128>}, {pipeline_mode = #tpu.pipeline_mode<synchronous>, transform_indices = @transform_2, window_bounds = array<i64: 1, 128>}, {transform_indices = @transform_3, window_bounds = array<i64: 8, 128>}]} {
    %c0 = arith.constant 0 : index
    %c0_0 = arith.constant 0 : index
    %0 = vector.load %arg1[%c0, %c0_0] : memref<8x96xbf16, #tpu.memory_space<vmem>>, vector<8x96xbf16>
    %c0_1 = arith.constant 0 : index
    %c0_2 = arith.constant 0 : index
    %1 = vector.load %arg2[%c0_1, %c0_2] : memref<96x128xbf16, #tpu.memory_space<vmem>>, vector<96x128xbf16>
    %cst = arith.constant dense<0.000000e+00> : vector<8x128xf32>
    %2 = tpu.matmul %0, %1, %cst {dimension_numbers = #tpu.dot_dimension_numbers<[1], [0], [0], [1], [0, 0, 1, 1], [], []>} : vector<8x96xbf16>, vector<96x128xbf16>, vector<8x128xf32> -> vector<8x128xf32>
    %c0_3 = arith.constant 0 : index
    %c0_4 = arith.constant 0 : index
    %3 = vector.load %arg3[%c0_3, %c0_4] : memref<1x128xf32, #tpu.memory_space<vmem>>, vector<1x128xf32>
    %4 = vector.broadcast %3 : vector<1x128xf32> to vector<8x128xf32>
    %5 = arith.addf %2, %4 : vector<8x128xf32>
    %c0_5 = arith.constant 0 : index
    %c0_6 = arith.constant 0 : index
    %6 = vector.load %arg4[%c0_5, %c0_6] : memref<8x128xf32, #tpu.memory_space<vmem>>, vector<8x128xf32>
    tpu.vector_store %arg4[%c0_5, %c0_6], %5 {strides = array<i32>} : memref<8x128xf32, #tpu.memory_space<vmem>>, vector<8x128xf32>,
    return
  }
  func.func @transform_0(%arg0: i32) -> (i32, i32) {
    %c0_i32 = arith.constant 0 : i32
    %c0_i32_0 = arith.constant 0 : i32
    return %arg0, %c0_i32 : i32, i32
  }
  func.func @transform_1(%arg0: i32) -> (i32, i32) {
    %c0_i32 = arith.constant 0 : i32
    %c0_i32_0 = arith.constant 0 : i32
    %c0_i32_1 = arith.constant 0 : i32
    return %c0_i32, %c0_i32_0 : i32, i32
  }
  func.func @transform_2(%arg0: i32) -> (i32, i32) {
    %c0_i32 = arith.constant 0 : i32
    %c0_i32_0 = arith.constant 0 : i32
    %c0_i32_1 = arith.constant 0 : i32
    return %c0_i32, %c0_i32_0 : i32, i32
  }
  func.func @transform_3(%arg0: i32) -> (i32, i32) {
    %c0_i32 = arith.constant 0 : i32
    %c0_i32_0 = arith.constant 0 : i32
    return %arg0, %c0_i32 : i32, i32
  }
}

module attributes {stable_mosaic.version = 11 : i64} {
  func.func @_affine_relu_kernel(%arg0: i32, %arg1: memref<8x128xf32, #tpu.memory_space<vmem>>, %arg2: memref<1x128xf32, #tpu.memory_space<vmem>>, %arg3: memref<1x128xf32, #tpu.memory_space<vmem>>, %arg4: memref<8x128xf32, #tpu.memory_space<vmem>>) attributes {dimension_semantics = [#tpu.dimension_semantics<parallel>], iteration_bounds = array<i64: 1>, scalar_prefetch = 0 : i64, scratch_operands = 0 : i64, tpu.core_type = #tpu.core_type<tc>, window_params = [{transform_indices = @transform_0, window_bounds = array<i64: 8, 128>}, {pipeline_mode = #tpu.pipeline_mode<synchronous>, transform_indices = @transform_1, window_bounds = array<i64: 1, 128>}, {pipeline_mode = #tpu.pipeline_mode<synchronous>, transform_indices = @transform_2, window_bounds = array<i64: 1, 128>}, {transform_indices = @transform_3, window_bounds = array<i64: 8, 128>}]} {
    %c0 = arith.constant 0 : index
    %c0_0 = arith.constant 0 : index
    %0 = vector.load %arg1[%c0, %c0_0] : memref<8x128xf32, #tpu.memory_space<vmem>>, vector<8x128xf32>
    %c0_1 = arith.constant 0 : index
    %c0_2 = arith.constant 0 : index
    %1 = vector.load %arg2[%c0_1, %c0_2] : memref<1x128xf32, #tpu.memory_space<vmem>>, vector<1x128xf32>
    %2 = vector.broadcast %1 : vector<1x128xf32> to vector<8x128xf32>
    %3 = arith.mulf %0, %2 : vector<8x128xf32>
    %c0_3 = arith.constant 0 : index
    %c0_4 = arith.constant 0 : index
    %4 = vector.load %arg3[%c0_3, %c0_4] : memref<1x128xf32, #tpu.memory_space<vmem>>, vector<1x128xf32>
    %5 = vector.broadcast %4 : vector<1x128xf32> to vector<8x128xf32>
    %6 = arith.addf %3, %5 : vector<8x128xf32>
    %cst = arith.constant 0.000000e+00 : f32
    %7 = vector.broadcast %cst : f32 to vector<8x128xf32>
    %8 = arith.maximumf %6, %7 : vector<8x128xf32>
    %c0_5 = arith.constant 0 : index
    %c0_6 = arith.constant 0 : index
    %9 = vector.load %arg4[%c0_5, %c0_6] : memref<8x128xf32, #tpu.memory_space<vmem>>, vector<8x128xf32>
    tpu.vector_store %arg4[%c0_5, %c0_6], %8 {strides = array<i32>} : memref<8x128xf32, #tpu.memory_space<vmem>>, vector<8x128xf32>,
    return
  }
  func.func @transform_0(%arg0: i32) -> (i32, i32) {
    %c0_i32 = arith.constant 0 : i32
    %c0_i32_0 = arith.constant 0 : i32
    return %arg0, %c0_i32 : i32, i32
  }
  func.func @transform_1(%arg0: i32) -> (i32, i32) {
    %c0_i32 = arith.constant 0 : i32
    %c0_i32_0 = arith.constant 0 : i32
    %c0_i32_1 = arith.constant 0 : i32
    return %c0_i32, %c0_i32_0 : i32, i32
  }
  func.func @transform_2(%arg0: i32) -> (i32, i32) {
    %c0_i32 = arith.constant 0 : i32
    %c0_i32_0 = arith.constant 0 : i32
    %c0_i32_1 = arith.constant 0 : i32
    return %c0_i32, %c0_i32_0 : i32, i32
  }
  func.func @transform_3(%arg0: i32) -> (i32, i32) {
    %c0_i32 = arith.constant 0 : i32
    %c0_i32_0 = arith.constant 0 : i32
    return %arg0, %c0_i32 : i32, i32
  }
}

module attributes {stable_mosaic.version = 11 : i64} {
  func.func @_mm_bias_kernel(%arg0: i32, %arg1: memref<8x864xbf16, #tpu.memory_space<vmem>>, %arg2: memref<864x128xbf16, #tpu.memory_space<vmem>>, %arg3: memref<1x128xf32, #tpu.memory_space<vmem>>, %arg4: memref<8x128xf32, #tpu.memory_space<vmem>>) attributes {dimension_semantics = [#tpu.dimension_semantics<parallel>], iteration_bounds = array<i64: 1>, scalar_prefetch = 0 : i64, scratch_operands = 0 : i64, tpu.core_type = #tpu.core_type<tc>, window_params = [{transform_indices = @transform_0, window_bounds = array<i64: 8, 864>}, {pipeline_mode = #tpu.pipeline_mode<synchronous>, transform_indices = @transform_1, window_bounds = array<i64: 864, 128>}, {pipeline_mode = #tpu.pipeline_mode<synchronous>, transform_indices = @transform_2, window_bounds = array<i64: 1, 128>}, {transform_indices = @transform_3, window_bounds = array<i64: 8, 128>}]} {
    %c0 = arith.constant 0 : index
    %c0_0 = arith.constant 0 : index
    %0 = vector.load %arg1[%c0, %c0_0] : memref<8x864xbf16, #tpu.memory_space<vmem>>, vector<8x864xbf16>
    %c0_1 = arith.constant 0 : index
    %c0_2 = arith.constant 0 : index
    %1 = vector.load %arg2[%c0_1, %c0_2] : memref<864x128xbf16, #tpu.memory_space<vmem>>, vector<864x128xbf16>
    %cst = arith.constant dense<0.000000e+00> : vector<8x128xf32>
    %2 = tpu.matmul %0, %1, %cst {dimension_numbers = #tpu.dot_dimension_numbers<[1], [0], [0], [1], [0, 0, 1, 1], [], []>} : vector<8x864xbf16>, vector<864x128xbf16>, vector<8x128xf32> -> vector<8x128xf32>
    %c0_3 = arith.constant 0 : index
    %c0_4 = arith.constant 0 : index
    %3 = vector.load %arg3[%c0_3, %c0_4] : memref<1x128xf32, #tpu.memory_space<vmem>>, vector<1x128xf32>
    %4 = vector.broadcast %3 : vector<1x128xf32> to vector<8x128xf32>
    %5 = arith.addf %2, %4 : vector<8x128xf32>
    %c0_5 = arith.constant 0 : index
    %c0_6 = arith.constant 0 : index
    %6 = vector.load %arg4[%c0_5, %c0_6] : memref<8x128xf32, #tpu.memory_space<vmem>>, vector<8x128xf32>
    tpu.vector_store %arg4[%c0_5, %c0_6], %5 {strides = array<i32>} : memref<8x128xf32, #tpu.memory_space<vmem>>, vector<8x128xf32>,
    return
  }
  func.func @transform_0(%arg0: i32) -> (i32, i32) {
    %c0_i32 = arith.constant 0 : i32
    %c0_i32_0 = arith.constant 0 : i32
    return %arg0, %c0_i32 : i32, i32
  }
  func.func @transform_1(%arg0: i32) -> (i32, i32) {
    %c0_i32 = arith.constant 0 : i32
    %c0_i32_0 = arith.constant 0 : i32
    %c0_i32_1 = arith.constant 0 : i32
    return %c0_i32, %c0_i32_0 : i32, i32
  }
  func.func @transform_2(%arg0: i32) -> (i32, i32) {
    %c0_i32 = arith.constant 0 : i32
    %c0_i32_0 = arith.constant 0 : i32
    %c0_i32_1 = arith.constant 0 : i32
    return %c0_i32, %c0_i32_0 : i32, i32
  }
  func.func @transform_3(%arg0: i32) -> (i32, i32) {
    %c0_i32 = arith.constant 0 : i32
    %c0_i32_0 = arith.constant 0 : i32
    return %arg0, %c0_i32 : i32, i32
  }
}

module attributes {stable_mosaic.version = 11 : i64} {
  func.func @_mm_bias_kernel(%arg0: i32, %arg1: memref<8x1152xbf16, #tpu.memory_space<vmem>>, %arg2: memref<1152x128xbf16, #tpu.memory_space<vmem>>, %arg3: memref<1x128xf32, #tpu.memory_space<vmem>>, %arg4: memref<8x128xf32, #tpu.memory_space<vmem>>) attributes {dimension_semantics = [#tpu.dimension_semantics<parallel>], iteration_bounds = array<i64: 1>, scalar_prefetch = 0 : i64, scratch_operands = 0 : i64, tpu.core_type = #tpu.core_type<tc>, window_params = [{transform_indices = @transform_0, window_bounds = array<i64: 8, 1152>}, {pipeline_mode = #tpu.pipeline_mode<synchronous>, transform_indices = @transform_1, window_bounds = array<i64: 1152, 128>}, {pipeline_mode = #tpu.pipeline_mode<synchronous>, transform_indices = @transform_2, window_bounds = array<i64: 1, 128>}, {transform_indices = @transform_3, window_bounds = array<i64: 8, 128>}]} {
    %c0 = arith.constant 0 : index
    %c0_0 = arith.constant 0 : index
    %0 = vector.load %arg1[%c0, %c0_0] : memref<8x1152xbf16, #tpu.memory_space<vmem>>, vector<8x1152xbf16>
    %c0_1 = arith.constant 0 : index
    %c0_2 = arith.constant 0 : index
    %1 = vector.load %arg2[%c0_1, %c0_2] : memref<1152x128xbf16, #tpu.memory_space<vmem>>, vector<1152x128xbf16>
    %cst = arith.constant dense<0.000000e+00> : vector<8x128xf32>
    %2 = tpu.matmul %0, %1, %cst {dimension_numbers = #tpu.dot_dimension_numbers<[1], [0], [0], [1], [0, 0, 1, 1], [], []>} : vector<8x1152xbf16>, vector<1152x128xbf16>, vector<8x128xf32> -> vector<8x128xf32>
    %c0_3 = arith.constant 0 : index
    %c0_4 = arith.constant 0 : index
    %3 = vector.load %arg3[%c0_3, %c0_4] : memref<1x128xf32, #tpu.memory_space<vmem>>, vector<1x128xf32>
    %4 = vector.broadcast %3 : vector<1x128xf32> to vector<8x128xf32>
    %5 = arith.addf %2, %4 : vector<8x128xf32>
    %c0_5 = arith.constant 0 : index
    %c0_6 = arith.constant 0 : index
    %6 = vector.load %arg4[%c0_5, %c0_6] : memref<8x128xf32, #tpu.memory_space<vmem>>, vector<8x128xf32>
    tpu.vector_store %arg4[%c0_5, %c0_6], %5 {strides = array<i32>} : memref<8x128xf32, #tpu.memory_space<vmem>>, vector<8x128xf32>,
    return
  }
  func.func @transform_0(%arg0: i32) -> (i32, i32) {
    %c0_i32 = arith.constant 0 : i32
    %c0_i32_0 = arith.constant 0 : i32
    return %arg0, %c0_i32 : i32, i32
  }
  func.func @transform_1(%arg0: i32) -> (i32, i32) {
    %c0_i32 = arith.constant 0 : i32
    %c0_i32_0 = arith.constant 0 : i32
    %c0_i32_1 = arith.constant 0 : i32
    return %c0_i32, %c0_i32_0 : i32, i32
  }
  func.func @transform_2(%arg0: i32) -> (i32, i32) {
    %c0_i32 = arith.constant 0 : i32
    %c0_i32_0 = arith.constant 0 : i32
    %c0_i32_1 = arith.constant 0 : i32
    return %c0_i32, %c0_i32_0 : i32, i32
  }
  func.func @transform_3(%arg0: i32) -> (i32, i32) {
    %c0_i32 = arith.constant 0 : i32
    %c0_i32_0 = arith.constant 0 : i32
    return %arg0, %c0_i32 : i32, i32
  }
}

module attributes {stable_mosaic.version = 11 : i64} {
  func.func @_affine2_add_relu_kernel(%arg0: i32, %arg1: memref<8x128xf32, #tpu.memory_space<vmem>>, %arg2: memref<8x128xf32, #tpu.memory_space<vmem>>, %arg3: memref<1x128xf32, #tpu.memory_space<vmem>>, %arg4: memref<1x128xf32, #tpu.memory_space<vmem>>, %arg5: memref<1x128xf32, #tpu.memory_space<vmem>>, %arg6: memref<1x128xf32, #tpu.memory_space<vmem>>, %arg7: memref<8x128xf32, #tpu.memory_space<vmem>>) attributes {dimension_semantics = [#tpu.dimension_semantics<parallel>], iteration_bounds = array<i64: 1>, scalar_prefetch = 0 : i64, scratch_operands = 0 : i64, tpu.core_type = #tpu.core_type<tc>, window_params = [{transform_indices = @transform_0, window_bounds = array<i64: 8, 128>}, {transform_indices = @transform_1, window_bounds = array<i64: 8, 128>}, {pipeline_mode = #tpu.pipeline_mode<synchronous>, transform_indices = @transform_2, window_bounds = array<i64: 1, 128>}, {pipeline_mode = #tpu.pipeline_mode<synchronous>, transform_indices = @transform_3, window_bounds = array<i64: 1, 128>}, {pipeline_mode = #tpu.pipeline_mode<synchronous>, transform_indices = @transform_4, window_bounds = array<i64: 1, 128>}, {pipeline_mode = #tpu.pipeline_mode<synchronous>, transform_indices = @transform_5, window_bounds = array<i64: 1, 128>}, {transform_indices = @transform_6, window_bounds = array<i64: 8, 128>}]} {
    %c0 = arith.constant 0 : index
    %c0_0 = arith.constant 0 : index
    %0 = vector.load %arg2[%c0, %c0_0] : memref<8x128xf32, #tpu.memory_space<vmem>>, vector<8x128xf32>
    %c0_1 = arith.constant 0 : index
    %c0_2 = arith.constant 0 : index
    %1 = vector.load %arg5[%c0_1, %c0_2] : memref<1x128xf32, #tpu.memory_space<vmem>>, vector<1x128xf32>
    %2 = vector.broadcast %1 : vector<1x128xf32> to vector<8x128xf32>
    %3 = arith.mulf %0, %2 : vector<8x128xf32>
    %c0_3 = arith.constant 0 : index
    %c0_4 = arith.constant 0 : index
    %4 = vector.load %arg6[%c0_3, %c0_4] : memref<1x128xf32, #tpu.memory_space<vmem>>, vector<1x128xf32>
    %5 = vector.broadcast %4 : vector<1x128xf32> to vector<8x128xf32>
    %6 = arith.addf %3, %5 : vector<8x128xf32>
    %c0_5 = arith.constant 0 : index
    %c0_6 = arith.constant 0 : index
    %7 = vector.load %arg1[%c0_5, %c0_6] : memref<8x128xf32, #tpu.memory_space<vmem>>, vector<8x128xf32>
    %c0_7 = arith.constant 0 : index
    %c0_8 = arith.constant 0 : index
    %8 = vector.load %arg3[%c0_7, %c0_8] : memref<1x128xf32, #tpu.memory_space<vmem>>, vector<1x128xf32>
    %9 = vector.broadcast %8 : vector<1x128xf32> to vector<8x128xf32>
    %10 = arith.mulf %7, %9 : vector<8x128xf32>
    %11 = arith.addf %6, %10 : vector<8x128xf32>
    %c0_9 = arith.constant 0 : index
    %c0_10 = arith.constant 0 : index
    %12 = vector.load %arg4[%c0_9, %c0_10] : memref<1x128xf32, #tpu.memory_space<vmem>>, vector<1x128xf32>
    %13 = vector.broadcast %12 : vector<1x128xf32> to vector<8x128xf32>
    %14 = arith.addf %11, %13 : vector<8x128xf32>
    %cst = arith.constant 0.000000e+00 : f32
    %15 = vector.broadcast %cst : f32 to vector<8x128xf32>
    %16 = arith.maximumf %14, %15 : vector<8x128xf32>
    %c0_11 = arith.constant 0 : index
    %c0_12 = arith.constant 0 : index
    %17 = vector.load %arg7[%c0_11, %c0_12] : memref<8x128xf32, #tpu.memory_space<vmem>>, vector<8x128xf32>
    tpu.vector_store %arg7[%c0_11, %c0_12], %16 {strides = array<i32>} : memref<8x128xf32, #tpu.memory_space<vmem>>, vector<8x128xf32>,
    return
  }
  func.func @transform_0(%arg0: i32) -> (i32, i32) {
    %c0_i32 = arith.constant 0 : i32
    %c0_i32_0 = arith.constant 0 : i32
    return %arg0, %c0_i32 : i32, i32
  }
  func.func @transform_1(%arg0: i32) -> (i32, i32) {
    %c0_i32 = arith.constant 0 : i32
    %c0_i32_0 = arith.constant 0 : i32
    return %arg0, %c0_i32 : i32, i32
  }
  func.func @transform_2(%arg0: i32) -> (i32, i32) {
    %c0_i32 = arith.constant 0 : i32
    %c0_i32_0 = arith.constant 0 : i32
    %c0_i32_1 = arith.constant 0 : i32
    return %c0_i32, %c0_i32_0 : i32, i32
  }
  func.func @transform_3(%arg0: i32) -> (i32, i32) {
    %c0_i32 = arith.constant 0 : i32
    %c0_i32_0 = arith.constant 0 : i32
    %c0_i32_1 = arith.constant 0 : i32
    return %c0_i32, %c0_i32_0 : i32, i32
  }
  func.func @transform_4(%arg0: i32) -> (i32, i32) {
    %c0_i32 = arith.constant 0 : i32
    %c0_i32_0 = arith.constant 0 : i32
    %c0_i32_1 = arith.constant 0 : i32
    return %c0_i32, %c0_i32_0 : i32, i32
  }
  func.func @transform_5(%arg0: i32) -> (i32, i32) {
    %c0_i32 = arith.constant 0 : i32
    %c0_i32_0 = arith.constant 0 : i32
    %c0_i32_1 = arith.constant 0 : i32
    return %c0_i32, %c0_i32_0 : i32, i32
  }
  func.func @transform_6(%arg0: i32) -> (i32, i32) {
    %c0_i32 = arith.constant 0 : i32
    %c0_i32_0 = arith.constant 0 : i32
    return %arg0, %c0_i32 : i32, i32
  }
}

module attributes {stable_mosaic.version = 11 : i64} {
  func.func @_affine_add_relu_kernel(%arg0: i32, %arg1: memref<8x128xf32, #tpu.memory_space<vmem>>, %arg2: memref<8x128xf32, #tpu.memory_space<vmem>>, %arg3: memref<1x128xf32, #tpu.memory_space<vmem>>, %arg4: memref<1x128xf32, #tpu.memory_space<vmem>>, %arg5: memref<8x128xf32, #tpu.memory_space<vmem>>) attributes {dimension_semantics = [#tpu.dimension_semantics<parallel>], iteration_bounds = array<i64: 1>, scalar_prefetch = 0 : i64, scratch_operands = 0 : i64, tpu.core_type = #tpu.core_type<tc>, window_params = [{transform_indices = @transform_0, window_bounds = array<i64: 8, 128>}, {transform_indices = @transform_1, window_bounds = array<i64: 8, 128>}, {pipeline_mode = #tpu.pipeline_mode<synchronous>, transform_indices = @transform_2, window_bounds = array<i64: 1, 128>}, {pipeline_mode = #tpu.pipeline_mode<synchronous>, transform_indices = @transform_3, window_bounds = array<i64: 1, 128>}, {transform_indices = @transform_4, window_bounds = array<i64: 8, 128>}]} {
    %c0 = arith.constant 0 : index
    %c0_0 = arith.constant 0 : index
    %0 = vector.load %arg2[%c0, %c0_0] : memref<8x128xf32, #tpu.memory_space<vmem>>, vector<8x128xf32>
    %c0_1 = arith.constant 0 : index
    %c0_2 = arith.constant 0 : index
    %1 = vector.load %arg1[%c0_1, %c0_2] : memref<8x128xf32, #tpu.memory_space<vmem>>, vector<8x128xf32>
    %c0_3 = arith.constant 0 : index
    %c0_4 = arith.constant 0 : index
    %2 = vector.load %arg3[%c0_3, %c0_4] : memref<1x128xf32, #tpu.memory_space<vmem>>, vector<1x128xf32>
    %3 = vector.broadcast %2 : vector<1x128xf32> to vector<8x128xf32>
    %4 = arith.mulf %1, %3 : vector<8x128xf32>
    %5 = arith.addf %0, %4 : vector<8x128xf32>
    %c0_5 = arith.constant 0 : index
    %c0_6 = arith.constant 0 : index
    %6 = vector.load %arg4[%c0_5, %c0_6] : memref<1x128xf32, #tpu.memory_space<vmem>>, vector<1x128xf32>
    %7 = vector.broadcast %6 : vector<1x128xf32> to vector<8x128xf32>
    %8 = arith.addf %5, %7 : vector<8x128xf32>
    %cst = arith.constant 0.000000e+00 : f32
    %9 = vector.broadcast %cst : f32 to vector<8x128xf32>
    %10 = arith.maximumf %8, %9 : vector<8x128xf32>
    %c0_7 = arith.constant 0 : index
    %c0_8 = arith.constant 0 : index
    %11 = vector.load %arg5[%c0_7, %c0_8] : memref<8x128xf32, #tpu.memory_space<vmem>>, vector<8x128xf32>
    tpu.vector_store %arg5[%c0_7, %c0_8], %10 {strides = array<i32>} : memref<8x128xf32, #tpu.memory_space<vmem>>, vector<8x128xf32>,
    return
  }
  func.func @transform_0(%arg0: i32) -> (i32, i32) {
    %c0_i32 = arith.constant 0 : i32
    %c0_i32_0 = arith.constant 0 : i32
    return %arg0, %c0_i32 : i32, i32
  }
  func.func @transform_1(%arg0: i32) -> (i32, i32) {
    %c0_i32 = arith.constant 0 : i32
    %c0_i32_0 = arith.constant 0 : i32
    return %arg0, %c0_i32 : i32, i32
  }
  func.func @transform_2(%arg0: i32) -> (i32, i32) {
    %c0_i32 = arith.constant 0 : i32
    %c0_i32_0 = arith.constant 0 : i32
    %c0_i32_1 = arith.constant 0 : i32
    return %c0_i32, %c0_i32_0 : i32, i32
  }
  func.func @transform_3(%arg0: i32) -> (i32, i32) {
    %c0_i32 = arith.constant 0 : i32
    %c0_i32_0 = arith.constant 0 : i32
    %c0_i32_1 = arith.constant 0 : i32
    return %c0_i32, %c0_i32_0 : i32, i32
  }
  func.func @transform_4(%arg0: i32) -> (i32, i32) {
    %c0_i32 = arith.constant 0 : i32
    %c0_i32_0 = arith.constant 0 : i32
    return %arg0, %c0_i32 : i32, i32
  }
}

module attributes {stable_mosaic.version = 11 : i64} {
  func.func @_mm_bias_kernel(%arg0: i32, %arg1: memref<8x128xbf16, #tpu.memory_space<vmem>>, %arg2: memref<128x128xbf16, #tpu.memory_space<vmem>>, %arg3: memref<1x128xf32, #tpu.memory_space<vmem>>, %arg4: memref<8x128xf32, #tpu.memory_space<vmem>>) attributes {dimension_semantics = [#tpu.dimension_semantics<parallel>], iteration_bounds = array<i64: 1>, scalar_prefetch = 0 : i64, scratch_operands = 0 : i64, tpu.core_type = #tpu.core_type<tc>, window_params = [{transform_indices = @transform_0, window_bounds = array<i64: 8, 128>}, {pipeline_mode = #tpu.pipeline_mode<synchronous>, transform_indices = @transform_1, window_bounds = array<i64: 128, 128>}, {pipeline_mode = #tpu.pipeline_mode<synchronous>, transform_indices = @transform_2, window_bounds = array<i64: 1, 128>}, {transform_indices = @transform_3, window_bounds = array<i64: 8, 128>}]} {
    %c0 = arith.constant 0 : index
    %c0_0 = arith.constant 0 : index
    %0 = vector.load %arg1[%c0, %c0_0] : memref<8x128xbf16, #tpu.memory_space<vmem>>, vector<8x128xbf16>
    %c0_1 = arith.constant 0 : index
    %c0_2 = arith.constant 0 : index
    %1 = vector.load %arg2[%c0_1, %c0_2] : memref<128x128xbf16, #tpu.memory_space<vmem>>, vector<128x128xbf16>
    %cst = arith.constant dense<0.000000e+00> : vector<8x128xf32>
    %2 = tpu.matmul %0, %1, %cst {dimension_numbers = #tpu.dot_dimension_numbers<[1], [0], [0], [1], [0, 0, 1, 1], [], []>} : vector<8x128xbf16>, vector<128x128xbf16>, vector<8x128xf32> -> vector<8x128xf32>
    %c0_3 = arith.constant 0 : index
    %c0_4 = arith.constant 0 : index
    %3 = vector.load %arg3[%c0_3, %c0_4] : memref<1x128xf32, #tpu.memory_space<vmem>>, vector<1x128xf32>
    %4 = vector.broadcast %3 : vector<1x128xf32> to vector<8x128xf32>
    %5 = arith.addf %2, %4 : vector<8x128xf32>
    %c0_5 = arith.constant 0 : index
    %c0_6 = arith.constant 0 : index
    %6 = vector.load %arg4[%c0_5, %c0_6] : memref<8x128xf32, #tpu.memory_space<vmem>>, vector<8x128xf32>
    tpu.vector_store %arg4[%c0_5, %c0_6], %5 {strides = array<i32>} : memref<8x128xf32, #tpu.memory_space<vmem>>, vector<8x128xf32>,
    return
  }
  func.func @transform_0(%arg0: i32) -> (i32, i32) {
    %c0_i32 = arith.constant 0 : i32
    %c0_i32_0 = arith.constant 0 : i32
    return %arg0, %c0_i32 : i32, i32
  }
  func.func @transform_1(%arg0: i32) -> (i32, i32) {
    %c0_i32 = arith.constant 0 : i32
    %c0_i32_0 = arith.constant 0 : i32
    %c0_i32_1 = arith.constant 0 : i32
    return %c0_i32, %c0_i32_0 : i32, i32
  }
  func.func @transform_2(%arg0: i32) -> (i32, i32) {
    %c0_i32 = arith.constant 0 : i32
    %c0_i32_0 = arith.constant 0 : i32
    %c0_i32_1 = arith.constant 0 : i32
    return %c0_i32, %c0_i32_0 : i32, i32
  }
  func.func @transform_3(%arg0: i32) -> (i32, i32) {
    %c0_i32 = arith.constant 0 : i32
    %c0_i32_0 = arith.constant 0 : i32
    return %arg0, %c0_i32 : i32, i32
  }
}

</mosaic_0001>

<bundles_post_ra>
// kernel: basic_encoder.30
= control target key start
LH: loop header
LB: loop body
LE: loop exit
PB: predicated region body
PF: predicated region fallthrough
CT: control target
= control target key end

     0   :  { %vm92_vm0 = vcmask 523264   ;;  %s271_s0 = inlined_call_operand.vmem [shape: f32[128,64], index: 0, kind: input, shape index: {}]   ;;  %s272_s1 = inlined_call_operand.vmem [shape: f32[1,64], index: 1, kind: input, shape index: {}]   ;;  %s273_s2 = inlined_call_operand.vmem [shape: f32[1,64], index: 2, kind: input, shape index: {}]   ;;  %s274_s3 = inlined_call_operand.vmem [shape: f32[128,64], index: 3, kind: output, shape index: {}]  }
   0x1   :  { %v14_v0 = vld [vmem:[%s271_s0] sm:$0xff]  ;;  %v15_v4 = vld [vmem:[%s271_s0 + $0x8] sm:$0xff]  ;;  %v16_v5 = vld [vmem:[%s271_s0 + $0x10] sm:$0xff] }
   0x2   :  { %v113_v1 = vld [vmem:[%s272_s1] ss:$0 sm:$0xff]  ;;  %v17_v6 = vld [vmem:[%s271_s0 + $0x18] sm:$0xff]  ;;  %v19_v11 = vld [vmem:[%s271_s0 + $0x28] sm:$0xff] }
   0x3   :  { %v144_v2 = vld [vmem:[%s273_s2] ss:$0 sm:$0xff]  ;;  %v37_v3 = vmul.f32 %v113_v1, %v14_v0  ;;  %v38_v7 = vmul.f32 %v113_v1, %v15_v4  ;;  %v39_v8 = vmul.f32 %v113_v1, %v16_v5  ;;  %v40_v9 = vmul.f32 %v113_v1, %v17_v6  ;;  %v20_v12 = vld [vmem:[%s271_s0 + $0x30] sm:$0xff]  ;;  %v21_v17 = vld [vmem:[%s271_s0 + $0x38] sm:$0xff] }
   0x4   :  { %v18_v10 = vld [vmem:[%s271_s0 + $0x20] sm:$0xff]  ;;  %v42_v15 = vmul.f32 %v113_v1, %v19_v11  ;;  %v43_v16 = vmul.f32 %v113_v1, %v20_v12  ;;  %v44_v21 = vmul.f32 %v113_v1, %v21_v17  ;;  %v23_v27 = vld [vmem:[%s271_s0 + $0x48] sm:$0xff]  ;;  %v24_v28 = vld [vmem:[%s271_s0 + $0x50] sm:$0xff] }
   0x5   :  { %v60_v13 = vadd.f32 %v144_v2, %v37_v3  ;;  %v41_v14 = vmul.f32 %v113_v1, %v18_v10  ;;  %v61_v18 = vadd.f32 %v144_v2, %v38_v7  ;;  %v62_v19 = vadd.f32 %v144_v2, %v39_v8  ;;  %v22_v22 = vld [vmem:[%s271_s0 + $0x40] sm:$0xff]  ;;  %v25_v29 = vld [vmem:[%s271_s0 + $0x58] sm:$0xff]  ;;  %v27_v35 = vld [vmem:[%s271_s0 + $0x68] sm:$0xff] }
   0x6   :  { %v63_v20 = vadd.f32 %v144_v2, %v40_v9  ;;  %v65_v25 = vadd.f32 %v144_v2, %v42_v15  ;;  %v66_v26 = vadd.f32 %v144_v2, %v43_v16  ;;  %v67_v33 = vadd.f32 %v144_v2, %v44_v21  ;;  %v26_v34 = vld [vmem:[%s271_s0 + $0x60] sm:$0xff]  ;;  %v28_v36 = vld [vmem:[%s271_s0 + $0x70] sm:$0xff]  ;;  %v29_v41 = vld [vmem:[%s271_s0 + $0x78] sm:$0xff] }
   0x7   :  { %v76_v23 = vmax.f32 %v60_v13, 0.0  ;;  %v64_v24 = vadd.f32 %v144_v2, %v41_v14  ;;  %v77_v30 = vmax.f32 %v61_v18, 0.0  ;;  %v78_v31 = vmax.f32 %v62_v19, 0.0 }
   0x8   :  { %v79_v32 = vmax.f32 %v63_v20, 0.0  ;;  %v81_v38 = vmax.f32 %v65_v25, 0.0  ;;  %v82_v39 = vmax.f32 %v66_v26, 0.0  ;;  %v45_v40 = vmul.f32 %v113_v1, %v22_v22 }
   0x9   :  { %93 = vst.msk [vmem:[%s274_s3] sm:$0xff] %vm92_vm0, %v76_v23  ;;  %v80_v37 = vmax.f32 %v64_v24, 0.0  ;;  %94 = vst.msk [vmem:[%s274_s3 + $0x8] sm:$0xff] %vm92_vm0, %v77_v30  ;;  %v83_v42 = vmax.f32 %v67_v33, 0.0  ;;  %v46_v43 = vmul.f32 %v113_v1, %v23_v27  ;;  %v47_v44 = vmul.f32 %v113_v1, %v24_v28 }
   0xa   :  { %95 = vst.msk [vmem:[%s274_s3 + $0x10] sm:$0xff] %vm92_vm0, %v78_v31  ;;  %96 = vst.msk [vmem:[%s274_s3 + $0x18] sm:$0xff] %vm92_vm0, %v79_v32  ;;  %v48_v45 = vmul.f32 %v113_v1, %v25_v29  ;;  %v68_v46 = vadd.f32 %v144_v2, %v45_v40  ;;  %v49_v47 = vmul.f32 %v113_v1, %v26_v34 }
   0xb   :  { %97 = vst.msk [vmem:[%s274_s3 + $0x20] sm:$0xff] %vm92_vm0, %v80_v37  ;;  %98 = vst.msk [vmem:[%s274_s3 + $0x28] sm:$0xff] %vm92_vm0, %v81_v38  ;;  %v50_v48 = vmul.f32 %v113_v1, %v27_v35  ;;  %v51_v49 = vmul.f32 %v113_v1, %v28_v36  ;;  %v69_v50 = vadd.f32 %v144_v2, %v46_v43 }
   0xc   :  { %99 = vst.msk [vmem:[%s274_s3 + $0x30] sm:$0xff] %vm92_vm0, %v82_v39  ;;  %100 = vst.msk [vmem:[%s274_s3 + $0x38] sm:$0xff] %vm92_vm0, %v83_v42  ;;  %v70_v51 = vadd.f32 %v144_v2, %v47_v44  ;;  %v71_v52 = vadd.f32 %v144_v2, %v48_v45  ;;  %v52_v53 = vmul.f32 %v113_v1, %v29_v41  ;;  %v84_v54 = vmax.f32 %v68_v46, 0.0 }
   0xd   :  { %v72_v55 = vadd.f32 %v144_v2, %v49_v47  ;;  %v73_v56 = vadd.f32 %v144_v2, %v50_v48  ;;  %v74_v57 = vadd.f32 %v144_v2, %v51_v49  ;;  %v85_v58 = vmax.f32 %v69_v50, 0.0 }
   0xe   :  { %v86_v59 = vmax.f32 %v70_v51, 0.0  ;;  %v87_v60 = vmax.f32 %v71_v52, 0.0  ;;  %v75_v61 = vadd.f32 %v144_v2, %v52_v53  ;;  %101 = vst.msk [vmem:[%s274_s3 + $0x40] sm:$0xff] %vm92_vm0, %v84_v54 }
   0xf   :  { %v88_v62 = vmax.f32 %v72_v55, 0.0  ;;  %v89_v63 = vmax.f32 %v73_v56, 0.0  ;;  %v90_v0 = vmax.f32 %v74_v57, 0.0  ;;  %102 = vst.msk [vmem:[%s274_s3 + $0x48] sm:$0xff] %vm92_vm0, %v85_v58 }
  0x10   :  { %103 = vst.msk [vmem:[%s274_s3 + $0x50] sm:$0xff] %vm92_vm0, %v86_v59  ;;  %104 = vst.msk [vmem:[%s274_s3 + $0x58] sm:$0xff] %vm92_vm0, %v87_v60  ;;  %v91_v1 = vmax.f32 %v75_v61, 0.0 }
  0x11   :  { %105 = vst.msk [vmem:[%s274_s3 + $0x60] sm:$0xff] %vm92_vm0, %v88_v62  ;;  %106 = vst.msk [vmem:[%s274_s3 + $0x68] sm:$0xff] %vm92_vm0, %v89_v63 }
  0x12   :  { %107 = vst.msk [vmem:[%s274_s3 + $0x70] sm:$0xff] %vm92_vm0, %v90_v0  ;;  %108 = vst.msk [vmem:[%s274_s3 + $0x78] sm:$0xff] %vm92_vm0, %v91_v1 }

// kernel: basic_encoder.29
= control target key start
LH: loop header
LB: loop body
LE: loop exit
PB: predicated region body
PF: predicated region fallthrough
CT: control target
= control target key end

     0   :  { %v427_v0 = vmov 0   ;;  %vm186_vm0 = vcmask 154624   ;;  %vm211_vm1 = vcmask 1040384   ;;  %vm212_vm2 = vcmask 1041408   ;;  %s602_s1 = inlined_call_operand.vmem [shape: bf16[147,64], index: 1, kind: input, shape index: {}]   ;;  %s603_s0 = inlined_call_operand.vmem [shape: bf16[128,147], index: 0, kind: input, shape index: {}]   ;;  %s604_s2 = inlined_call_operand.vmem [shape: f32[1,64], index: 2, kind: input, shape index: {}]   ;;  %s605_s3 = inlined_call_operand.vmem [shape: f32[128,64], index: 3, kind: output, shape index: {}]  }
   0x1   :  { %218 = vmatprep.subr.bf16.mxu0 %v427_v0  ;;  %371 = vmatprep.subr.bf16.mxu1 %v427_v0  ;;  %v393_v1 = vld [vmem:[%s602_s1 + $0x38] sm:$0xff]   ;;  %v394_v2 = vld [vmem:[%s602_s1 + $0x30] sm:$0xff]   ;;  %v395_v3 = vld [vmem:[%s602_s1 + $0x28] sm:$0xff]   ;;  %v428_v10 = vmov 65535   ;;  %vm315_vm3 = vcmask 523264  }
   0x2   :  { %219 = vmatpush1.bf16.msra.mxu0 %v393_v1  ;;  %381 = vmatpush1.bf16.msra.mxu1 %v393_v1  ;;  %v396_v4 = vld [vmem:[%s602_s1 + $0x20] sm:$0xff]   ;;  %v397_v7 = vld [vmem:[%s602_s1 + $0x18] sm:$0xff]   ;;  %v398_v8 = vld [vmem:[%s602_s1 + $0x10] sm:$0xff]   ;;  %v213_v11 = vsel %vm211_vm1, 4294967295, %v428_v10 }
   0x3   :  { %220 = vmatprep.subr.bf16.mxu0 %v427_v0  ;;  %372 = vmatprep.subr.bf16.mxu1 %v427_v0  ;;  %v405_v5 = vld [vmem:[%s603_s0 + $0x4] ss:$8 sps:$4 sm:$0xff]   ;;  %v401_v13 = vld [vmem:[%s602_s1 + $0x48] ss:$0 sps:$4 sm:$0x33]   ;;  %v214_v14 = vsel %vm212_vm2, %v213_v11, 0 }
   0x4   :  { %363 = vmatprep.mubr.msk.bf16.mxu0 %vm186_vm0, %v405_v5  ;;  %v408_v6 = vld [vmem:[%s603_s0 + $0x44] ss:$8 sps:$4 sm:$0xff]   ;;  %v216_v15 = vand.u32 %v401_v13, %v214_v14  ;;  %v403_v17 = vld [vmem:[%s603_s0] ss:$8 sps:$4 sm:$0xff]   ;;  %v409_v19 = vld [vmem:[%s603_s0 + $0x14] ss:$8 sps:$4 sm:$0xff]  }
   0x5   :  { %367 = vmatprep.mubr.msk.bf16.mxu1 %vm186_vm0, %v408_v6  ;;  %v399_v9 = vld [vmem:[%s602_s1 + $0x8] sm:$0xff]   ;;  %v400_v12 = vld [vmem:[%s602_s1] sm:$0xff]   ;;  %v411_v20 = vld [vmem:[%s603_s0 + $0x54] ss:$8 sps:$4 sm:$0xff]  }
   0x6   :  { %221 = vmatpush1.bf16.msra.mxu0 %v394_v2  ;;  %382 = vmatpush1.bf16.msra.mxu1 %v394_v2  ;;  %v402_v16 = vld [vmem:[%s602_s1 + $0x40] sm:$0xff]   ;;  %v413_v21 = vld [vmem:[%s603_s0 + $0x10] ss:$8 sps:$4 sm:$0xff]   ;;  %v421_v27 = vld [vmem:[%s603_s0 + $0x34] ss:$8 sps:$4 sm:$0xff]  }
   0x7   :  { %222 = vmatprep.subr.bf16.mxu0 %v427_v0  ;;  %373 = vmatprep.subr.bf16.mxu1 %v427_v0  ;;  %v406_v18 = vld [vmem:[%s603_s0 + $0x40] ss:$8 sps:$4 sm:$0xff]   ;;  %v414_v22 = vld [vmem:[%s603_s0 + $0x50] ss:$8 sps:$4 sm:$0xff]   ;;  %v415_v23 = vld [vmem:[%s603_s0 + $0x24] ss:$8 sps:$4 sm:$0xff]  }
   0x8   :  { %v417_v24 = vld [vmem:[%s603_s0 + $0x64] ss:$8 sps:$4 sm:$0xff]   ;;  %v419_v25 = vld [vmem:[%s603_s0 + $0x20] ss:$8 sps:$4 sm:$0xff]   ;;  %v423_v28 = vld [vmem:[%s603_s0 + $0x74] ss:$8 sps:$4 sm:$0xff]  }
   0x9   :  { %v420_v26 = vld [vmem:[%s603_s0 + $0x60] ss:$8 sps:$4 sm:$0xff]   ;;  %v425_v29 = vld [vmem:[%s603_s0 + $0x30] ss:$8 sps:$4 sm:$0xff]  }
   0xa   :  { %223 = vmatpush1.bf16.msra.mxu0 %v395_v3  ;;  %383 = vmatpush1.bf16.msra.mxu1 %v395_v3  ;;  %v426_v30 = vld [vmem:[%s603_s0 + $0x70] ss:$8 sps:$4 sm:$0xff]   ;;  %v336_v31 = vld [vmem:[%s604_s2] ss:$0 sm:$0xff] }
   0xb   :  { %224 = vmatprep.subr.bf16.mxu0 %v427_v0  ;;  %374 = vmatprep.subr.bf16.mxu1 %v427_v0 }
   0xe   :  { %225 = vmatpush1.bf16.msra.mxu0 %v396_v4  ;;  %384 = vmatpush1.bf16.msra.mxu1 %v396_v4 }
   0xf   :  { %226 = vmatprep.subr.bf16.mxu0 %v427_v0  ;;  %375 = vmatprep.subr.bf16.mxu1 %v427_v0 }
  0x12   :  { %227 = vmatpush1.bf16.msra.mxu0 %v397_v7  ;;  %385 = vmatpush1.bf16.msra.mxu1 %v397_v7 }
  0x13   :  { %228 = vmatprep.subr.bf16.mxu0 %v427_v0  ;;  %376 = vmatprep.subr.bf16.mxu1 %v427_v0 }
  0x16   :  { %229 = vmatpush1.bf16.msra.mxu0 %v398_v8  ;;  %386 = vmatpush1.bf16.msra.mxu1 %v398_v8 }
  0x17   :  { %230 = vmatprep.subr.bf16.mxu0 %v427_v0  ;;  %377 = vmatprep.subr.bf16.mxu1 %v427_v0 }
  0x1a   :  { %231 = vmatpush1.bf16.msra.mxu0 %v399_v9  ;;  %387 = vmatpush1.bf16.msra.mxu1 %v399_v9 }
  0x1b   :  { %232 = vmatprep.subr.bf16.mxu0 %v427_v0  ;;  %378 = vmatprep.subr.bf16.mxu1 %v427_v0 }
  0x1e   :  { %233 = vmatpush1.bf16.msra.mxu0 %v400_v12  ;;  %388 = vmatpush1.bf16.msra.mxu1 %v400_v12 }
  0x1f   :  { %246 = vmatprep.subr.bf16.mxu0 %v427_v0  ;;  %379 = vmatprep.subr.bf16.mxu1 %v427_v0 }
  0x22   :  { %247 = vmatpush2.bf16.msra.mxu0 %v216_v15  ;;  %389 = vmatpush2.bf16.msra.mxu1 %v216_v15 }
  0x23   :  { %248 = vmatprep.subr.bf16.mxu0 %v427_v0  ;;  %380 = vmatprep.subr.bf16.mxu1 %v427_v0 }
  0x26   :  { %249 = vmatpush2.bf16.msra.mxu0 %v402_v16  ;;  %390 = vmatpush2.bf16.msra.mxu1 %v402_v16 }
  0x29   :  { %251 = vmatmul.mubr.bf16.vlgmr.msra.gmra.mxu0 %v403_v17  ;;  %283 = vmatmul.mubr.bf16.vlgmr.msra.gmra.mxu1 %v406_v18 }
  0x2a   :  { %364 = vmatprep.mubr.msk.bf16.mxu0 %vm186_vm0, %v409_v19  ;;  %368 = vmatprep.mubr.msk.bf16.mxu1 %vm186_vm0, %v411_v20 }
  0x31   :  { %259 = vmatmul.mubr.bf16.gmra.mxu0 %v413_v21  ;;  %291 = vmatmul.mubr.bf16.gmra.mxu1 %v414_v22 }
  0x32   :  { %365 = vmatprep.mubr.msk.bf16.mxu0 %vm186_vm0, %v415_v23  ;;  %369 = vmatprep.mubr.msk.bf16.mxu1 %vm186_vm0, %v417_v24 }
  0x39   :  { %267 = vmatmul.mubr.bf16.gmra.mxu0 %v419_v25  ;;  %299 = vmatmul.mubr.bf16.gmra.mxu1 %v420_v26 }
  0x3a   :  { %366 = vmatprep.mubr.msk.bf16.mxu0 %vm186_vm0, %v421_v27  ;;  %370 = vmatprep.mubr.msk.bf16.mxu1 %vm186_vm0, %v423_v28 }
  0x41   :  { %275 = vmatmul.mubr.bf16.gmra.mxu0 %v425_v29  ;;  %307 = vmatmul.mubr.bf16.gmra.mxu1 %v426_v30 }
  0xe9   :  { %v252_v32 = vpop.f32.mrf.mxu0  ;;  %v284_v33 = vpop.f32.mrf.mxu1 }
  0xea   :  { %v253_v34 = vadd.f32 %v336_v31, %v252_v32  ;;  %v285_v35 = vadd.f32 %v336_v31, %v284_v33 }
  0xeb   :  { %v254_v36 = vpop.f32.mrf.mxu0  ;;  %v286_v37 = vpop.f32.mrf.mxu1 }
  0xec   :  { %316 = vst.msk [vmem:[%s605_s3] sm:$0xff] %vm315_vm3, %v253_v34  ;;  %324 = vst.msk [vmem:[%s605_s3 + $0x40] sm:$0xff] %vm315_vm3, %v285_v35 }
  0xed   :  { %v255_v38 = vpop.f32.mrf.mxu0  ;;  %v287_v39 = vpop.f32.mrf.mxu1 }
  0xee   :  { %v256_v40 = vadd.f32 %v336_v31, %v255_v38  ;;  %v288_v41 = vadd.f32 %v336_v31, %v287_v39 }
  0xef   :  { %v257_v42 = vpop.f32.mrf.mxu0  ;;  %v289_v43 = vpop.f32.mrf.mxu1 }
  0xf0   :  { %317 = vst.msk [vmem:[%s605_s3 + $0x8] sm:$0xff] %vm315_vm3, %v256_v40  ;;  %325 = vst.msk [vmem:[%s605_s3 + $0x48] sm:$0xff] %vm315_vm3, %v288_v41 }
  0xf1   :  { %v260_v44 = vpop.f32.mrf.mxu0  ;;  %v292_v45 = vpop.f32.mrf.mxu1 }
  0xf2   :  { %v261_v46 = vadd.f32 %v336_v31, %v260_v44  ;;  %v293_v47 = vadd.f32 %v336_v31, %v292_v45 }
  0xf3   :  { %v262_v48 = vpop.f32.mrf.mxu0  ;;  %v294_v49 = vpop.f32.mrf.mxu1 }
  0xf4   :  { %318 = vst.msk [vmem:[%s605_s3 + $0x10] sm:$0xff] %vm315_vm3, %v261_v46  ;;  %326 = vst.msk [vmem:[%s605_s3 + $0x50] sm:$0xff] %vm315_vm3, %v293_v47 }
  0xf5   :  { %v263_v50 = vpop.f32.mrf.mxu0  ;;  %v295_v51 = vpop.f32.mrf.mxu1 }
  0xf6   :  { %v264_v52 = vadd.f32 %v336_v31, %v263_v50  ;;  %v296_v53 = vadd.f32 %v336_v31, %v295_v51 }
  0xf7   :  { %v265_v54 = vpop.f32.mrf.mxu0  ;;  %v297_v55 = vpop.f32.mrf.mxu1 }
  0xf8   :  { %319 = vst.msk [vmem:[%s605_s3 + $0x18] sm:$0xff] %vm315_vm3, %v264_v52  ;;  %327 = vst.msk [vmem:[%s605_s3 + $0x58] sm:$0xff] %vm315_vm3, %v296_v53 }
  0xf9   :  { %v268_v56 = vpop.f32.mrf.mxu0  ;;  %v300_v57 = vpop.f32.mrf.mxu1 }
  0xfa   :  { %v269_v58 = vadd.f32 %v336_v31, %v268_v56  ;;  %v301_v59 = vadd.f32 %v336_v31, %v300_v57 }
  0xfb   :  { %v270_v60 = vpop.f32.mrf.mxu0  ;;  %v302_v61 = vpop.f32.mrf.mxu1 }
  0xfc   :  { %320 = vst.msk [vmem:[%s605_s3 + $0x20] sm:$0xff] %vm315_vm3, %v269_v58  ;;  %328 = vst.msk [vmem:[%s605_s3 + $0x60] sm:$0xff] %vm315_vm3, %v301_v59 }
  0xfd   :  { %v271_v62 = vpop.f32.mrf.mxu0  ;;  %v303_v63 = vpop.f32.mrf.mxu1 }
  0xfe   :  { %v272_v0 = vadd.f32 %v336_v31, %v271_v62  ;;  %v304_v1 = vadd.f32 %v336_v31, %v303_v63 }
  0xff   :  { %v273_v2 = vpop.f32.mrf.mxu0  ;;  %v305_v3 = vpop.f32.mrf.mxu1 }
 0x100   :  { %321 = vst.msk [vmem:[%s605_s3 + $0x28] sm:$0xff] %vm315_vm3, %v272_v0  ;;  %329 = vst.msk [vmem:[%s605_s3 + $0x68] sm:$0xff] %vm315_vm3, %v304_v1 }
 0x101   :  { %v276_v4 = vpop.f32.mrf.mxu0  ;;  %v308_v5 = vpop.f32.mrf.mxu1 }
 0x102   :  { %v277_v6 = vadd.f32 %v336_v31, %v276_v4  ;;  %v309_v7 = vadd.f32 %v336_v31, %v308_v5 }
 0x103   :  { %v278_v8 = vpop.f32.mrf.mxu0  ;;  %v310_v9 = vpop.f32.mrf.mxu1 }
 0x104   :  { %322 = vst.msk [vmem:[%s605_s3 + $0x30] sm:$0xff] %vm315_vm3, %v277_v6  ;;  %330 = vst.msk [vmem:[%s605_s3 + $0x70] sm:$0xff] %vm315_vm3, %v309_v7 }
 0x105   :  { %v279_v10 = vpop.f32.mrf.mxu0  ;;  %v311_v11 = vpop.f32.mrf.mxu1 }
 0x106   :  { %v280_v12 = vadd.f32 %v336_v31, %v279_v10  ;;  %v312_v13 = vadd.f32 %v336_v31, %v311_v11 }
 0x107   :  { %v281_v14 = vpop.f32.mrf.mxu0  ;;  %v313_v15 = vpop.f32.mrf.mxu1 }
 0x108   :  { %323 = vst.msk [vmem:[%s605_s3 + $0x38] sm:$0xff] %vm315_vm3, %v280_v12  ;;  %331 = vst.msk [vmem:[%s605_s3 + $0x78] sm:$0xff] %vm315_vm3, %v312_v13 }

// kernel: basic_encoder.34
= control target key start
LH: loop header
LB: loop body
LE: loop exit
PB: predicated region body
PF: predicated region fallthrough
CT: control target
= control target key end

     0   :  { %vm127_vm0 = vcmask 523264   ;;  %s377_s0 = inlined_call_operand.vmem [shape: f32[128,64], index: 0, kind: input, shape index: {}]   ;;  %s378_s1 = inlined_call_operand.vmem [shape: f32[128,64], index: 1, kind: input, shape index: {}]   ;;  %s379_s2 = inlined_call_operand.vmem [shape: f32[1,64], index: 2, kind: input, shape index: {}]   ;;  %s380_s3 = inlined_call_operand.vmem [shape: f32[1,64], index: 3, kind: input, shape index: {}]   ;;  %s381_s4 = inlined_call_operand.vmem [shape: f32[128,64], index: 4, kind: output, shape index: {}]  }
   0x1   :  { %v17_v0 = vld [vmem:[%s378_s1] sm:$0xff]  ;;  %v18_v5 = vld [vmem:[%s378_s1 + $0x8] sm:$0xff]  ;;  %v19_v8 = vld [vmem:[%s378_s1 + $0x10] sm:$0xff] }
   0x2   :  { %v33_v1 = vld [vmem:[%s377_s0] sm:$0xff]  ;;  %v34_v6 = vld [vmem:[%s377_s0 + $0x8] sm:$0xff]  ;;  %v35_v9 = vld [vmem:[%s377_s0 + $0x10] sm:$0xff] }
   0x3   :  { %v184_v2 = vld [vmem:[%s379_s2] ss:$0 sm:$0xff]  ;;  %v20_v10 = vld [vmem:[%s378_s1 + $0x18] sm:$0xff]  ;;  %v22_v19 = vld [vmem:[%s378_s1 + $0x28] sm:$0xff] }
   0x4   :  { %v56_v3 = vmul.f32 %v184_v2, %v33_v1  ;;  %v190_v4 = vld [vmem:[%s380_s3] ss:$0 sm:$0xff]  ;;  %v57_v7 = vmul.f32 %v184_v2, %v34_v6  ;;  %v58_v12 = vmul.f32 %v184_v2, %v35_v9  ;;  %v36_v13 = vld [vmem:[%s377_s0 + $0x18] sm:$0xff]  ;;  %v38_v20 = vld [vmem:[%s377_s0 + $0x28] sm:$0xff] }
   0x5   :  { %v21_v14 = vld [vmem:[%s378_s1 + $0x20] sm:$0xff]  ;;  %v59_v17 = vmul.f32 %v184_v2, %v36_v13  ;;  %v61_v23 = vmul.f32 %v184_v2, %v38_v20  ;;  %v23_v24 = vld [vmem:[%s378_s1 + $0x30] sm:$0xff]  ;;  %v40_v26 = vld [vmem:[%s377_s0 + $0x38] sm:$0xff] }
   0x6   :  { %v72_v11 = vadd.f32 %v56_v3, %v17_v0  ;;  %v37_v15 = vld [vmem:[%s377_s0 + $0x20] sm:$0xff]  ;;  %v73_v16 = vadd.f32 %v57_v7, %v18_v5  ;;  %v74_v22 = vadd.f32 %v58_v12, %v19_v8  ;;  %v39_v25 = vld [vmem:[%s377_s0 + $0x30] sm:$0xff]  ;;  %v24_v31 = vld [vmem:[%s378_s1 + $0x38] sm:$0xff]  ;;  %v63_v36 = vmul.f32 %v184_v2, %v40_v26 }
   0x7   :  { %v60_v18 = vmul.f32 %v184_v2, %v37_v15  ;;  %v75_v28 = vadd.f32 %v59_v17, %v20_v10  ;;  %v62_v30 = vmul.f32 %v184_v2, %v39_v25  ;;  %v41_v32 = vld [vmem:[%s377_s0 + $0x40] sm:$0xff]  ;;  %v77_v35 = vadd.f32 %v61_v23, %v22_v19  ;;  %v42_v37 = vld [vmem:[%s377_s0 + $0x48] sm:$0xff]  ;;  %v43_v43 = vld [vmem:[%s377_s0 + $0x50] sm:$0xff] }
   0x8   :  { %v95_v21 = vadd.f32 %v190_v4, %v72_v11  ;;  %v96_v27 = vadd.f32 %v190_v4, %v73_v16  ;;  %v97_v34 = vadd.f32 %v190_v4, %v74_v22  ;;  %v25_v42 = vld [vmem:[%s378_s1 + $0x40] sm:$0xff]  ;;  %v79_v46 = vadd.f32 %v63_v36, %v24_v31  ;;  %v26_v48 = vld [vmem:[%s378_s1 + $0x48] sm:$0xff]  ;;  %v44_v49 = vld [vmem:[%s377_s0 + $0x58] sm:$0xff] }
   0x9   :  { %v76_v29 = vadd.f32 %v60_v18, %v21_v14  ;;  %v98_v39 = vadd.f32 %v190_v4, %v75_v28  ;;  %v78_v41 = vadd.f32 %v62_v30, %v23_v24  ;;  %v100_v45 = vadd.f32 %v190_v4, %v77_v35  ;;  %v45_v50 = vld [vmem:[%s377_s0 + $0x60] sm:$0xff]  ;;  %v27_v55 = vld [vmem:[%s378_s1 + $0x50] sm:$0xff]  ;;  %v46_v56 = vld [vmem:[%s377_s0 + $0x68] sm:$0xff] }
   0xa   :  { %v111_v33 = vmax.f32 %v95_v21, 0.0  ;;  %v112_v38 = vmax.f32 %v96_v27, 0.0  ;;  %v113_v44 = vmax.f32 %v97_v34, 0.0  ;;  %v64_v47 = vmul.f32 %v184_v2, %v41_v32  ;;  %v28_v61 = vld [vmem:[%s378_s1 + $0x58] sm:$0xff]  ;;  %v29_v62 = vld [vmem:[%s378_s1 + $0x60] sm:$0xff]  ;;  %v47_v63 = vld [vmem:[%s377_s0 + $0x70] sm:$0xff] }
   0xb   :  { %v99_v40 = vadd.f32 %v190_v4, %v76_v29  ;;  %v114_v51 = vmax.f32 %v98_v39, 0.0  ;;  %v101_v53 = vadd.f32 %v190_v4, %v78_v41  ;;  %v65_v54 = vmul.f32 %v184_v2, %v42_v37  ;;  %v30_v6 = vld [vmem:[%s378_s1 + $0x68] sm:$0xff]  ;;  %v48_v7 = vld [vmem:[%s377_s0 + $0x78] sm:$0xff]  ;;  %v31_v12 = vld [vmem:[%s378_s1 + $0x70] sm:$0xff] }
   0xc   :  { %128 = vst.msk [vmem:[%s381_s4] sm:$0xff] %vm127_vm0, %v111_v33  ;;  %129 = vst.msk [vmem:[%s381_s4 + $0x8] sm:$0xff] %vm127_vm0, %v112_v38  ;;  %v116_v57 = vmax.f32 %v100_v45, 0.0  ;;  %v102_v58 = vadd.f32 %v190_v4, %v79_v46  ;;  %v80_v59 = vadd.f32 %v64_v47, %v25_v42  ;;  %v66_v60 = vmul.f32 %v184_v2, %v43_v43  ;;  %v32_v17 = vld [vmem:[%s378_s1 + $0x78] sm:$0xff] }
   0xd   :  { %v115_v52 = vmax.f32 %v99_v40, 0.0  ;;  %130 = vst.msk [vmem:[%s381_s4 + $0x10] sm:$0xff] %vm127_vm0, %v113_v44  ;;  %131 = vst.msk [vmem:[%s381_s4 + $0x18] sm:$0xff] %vm127_vm0, %v114_v51  ;;  %v117_v0 = vmax.f32 %v101_v53, 0.0  ;;  %v81_v1 = vadd.f32 %v65_v54, %v26_v48  ;;  %v67_v3 = vmul.f32 %v184_v2, %v44_v49 }
   0xe   :  { %v68_v5 = vmul.f32 %v184_v2, %v45_v50  ;;  %133 = vst.msk [vmem:[%s381_s4 + $0x28] sm:$0xff] %vm127_vm0, %v116_v57  ;;  %v118_v8 = vmax.f32 %v102_v58, 0.0  ;;  %v103_v9 = vadd.f32 %v190_v4, %v80_v59  ;;  %v82_v10 = vadd.f32 %v66_v60, %v27_v55 }
   0xf   :  { %132 = vst.msk [vmem:[%s381_s4 + $0x20] sm:$0xff] %vm127_vm0, %v115_v52  ;;  %v69_v11 = vmul.f32 %v184_v2, %v46_v56  ;;  %134 = vst.msk [vmem:[%s381_s4 + $0x30] sm:$0xff] %vm127_vm0, %v117_v0  ;;  %v104_v13 = vadd.f32 %v190_v4, %v81_v1  ;;  %v83_v14 = vadd.f32 %v67_v3, %v28_v61 }
  0x10   :  { %v84_v15 = vadd.f32 %v68_v5, %v29_v62  ;;  %v70_v16 = vmul.f32 %v184_v2, %v47_v63  ;;  %135 = vst.msk [vmem:[%s381_s4 + $0x38] sm:$0xff] %vm127_vm0, %v118_v8  ;;  %v119_v18 = vmax.f32 %v103_v9, 0.0  ;;  %v105_v19 = vadd.f32 %v190_v4, %v82_v10 }
  0x11   :  { %v85_v20 = vadd.f32 %v69_v11, %v30_v6  ;;  %v71_v21 = vmul.f32 %v184_v2, %v48_v7  ;;  %v120_v22 = vmax.f32 %v104_v13, 0.0  ;;  %v106_v23 = vadd.f32 %v190_v4, %v83_v14 }
  0x12   :  { %v107_v24 = vadd.f32 %v190_v4, %v84_v15  ;;  %v86_v25 = vadd.f32 %v70_v16, %v31_v12  ;;  %136 = vst.msk [vmem:[%s381_s4 + $0x40] sm:$0xff] %vm127_vm0, %v119_v18  ;;  %v121_v26 = vmax.f32 %v105_v19, 0.0 }
  0x13   :  { %v108_v27 = vadd.f32 %v190_v4, %v85_v20  ;;  %v87_v28 = vadd.f32 %v71_v21, %v32_v17  ;;  %137 = vst.msk [vmem:[%s381_s4 + $0x48] sm:$0xff] %vm127_vm0, %v120_v22  ;;  %v122_v2 = vmax.f32 %v106_v23, 0.0 }
  0x14   :  { %v123_v29 = vmax.f32 %v107_v24, 0.0  ;;  %v109_v30 = vadd.f32 %v190_v4, %v86_v25  ;;  %138 = vst.msk [vmem:[%s381_s4 + $0x50] sm:$0xff] %vm127_vm0, %v121_v26 }
  0x15   :  { %v124_v31 = vmax.f32 %v108_v27, 0.0  ;;  %v110_v32 = vadd.f32 %v190_v4, %v87_v28  ;;  %139 = vst.msk [vmem:[%s381_s4 + $0x58] sm:$0xff] %vm127_vm0, %v122_v2 }
  0x16   :  { %140 = vst.msk [vmem:[%s381_s4 + $0x60] sm:$0xff] %vm127_vm0, %v123_v29  ;;  %v125_v33 = vmax.f32 %v109_v30, 0.0 }
  0x17   :  { %141 = vst.msk [vmem:[%s381_s4 + $0x68] sm:$0xff] %vm127_vm0, %v124_v31  ;;  %v126_v34 = vmax.f32 %v110_v32, 0.0 }
  0x18   :  { %142 = vst.msk [vmem:[%s381_s4 + $0x70] sm:$0xff] %vm127_vm0, %v125_v33 }
  0x19   :  { %143 = vst.msk [vmem:[%s381_s4 + $0x78] sm:$0xff] %vm127_vm0, %v126_v34 }

// kernel: basic_encoder.31
= control target key start
LH: loop header
LB: loop body
LE: loop exit
PB: predicated region body
PF: predicated region fallthrough
CT: control target
= control target key end

     0   :  { %vm558_vm0 = vcmask 523264   ;;  %s1671_s1 = inlined_call_operand.vmem [shape: bf16[576,64], index: 1, kind: input, shape index: {}]   ;;  %s1672_s0 = inlined_call_operand.vmem [shape: bf16[128,576], index: 0, kind: input, shape index: {}]   ;;  %s1673_s2 = inlined_call_operand.vmem [shape: f32[1,64], index: 2, kind: input, shape index: {}]   ;;  %s1674_s3 = inlined_call_operand.vmem [shape: f32[128,64], index: 3, kind: output, shape index: {}]  }
   0x1   :  { %v1151_v0 = vld [vmem:[%s1671_s1 + $0x78] sm:$0xff]   ;;  %v1155_v4 = vld [vmem:[%s1671_s1 + $0x70] sm:$0xff]   ;;  %v1159_v8 = vld [vmem:[%s1671_s1 + $0x68] sm:$0xff]  }
   0x2   :  { %v1152_v1 = vld [vmem:[%s1671_s1 + $0xf8] sm:$0xff]   ;;  %979 = vmatprep.subr.bf16.mxu0 %v1151_v0  ;;  %v1156_v5 = vld [vmem:[%s1671_s1 + $0xf0] sm:$0xff]   ;;  %v1160_v9 = vld [vmem:[%s1671_s1 + $0xe8] sm:$0xff]  }
   0x3   :  { %v1153_v2 = vld [vmem:[%s1671_s1 + $0x38] sm:$0xff]   ;;  %1043 = vmatprep.subr.bf16.mxu1 %v1152_v1  ;;  %v1157_v6 = vld [vmem:[%s1671_s1 + $0x30] sm:$0xff]   ;;  %v1161_v10 = vld [vmem:[%s1671_s1 + $0x28] sm:$0xff]  }
   0x4   :  { %v1154_v3 = vld [vmem:[%s1671_s1 + $0xb8] sm:$0xff]   ;;  %980 = vmatpush3.bf16.msra.mxu0 %v1153_v2  ;;  %v1158_v7 = vld [vmem:[%s1671_s1 + $0xb0] sm:$0xff]   ;;  %v1162_v11 = vld [vmem:[%s1671_s1 + $0xa8] sm:$0xff]  }
   0x5   :  { %1044 = vmatpush3.bf16.msra.mxu1 %v1154_v3  ;;  %981 = vmatprep.subr.bf16.mxu0 %v1155_v4  ;;  %v1163_v12 = vld [vmem:[%s1671_s1 + $0x60] sm:$0xff]   ;;  %v1167_v16 = vld [vmem:[%s1671_s1 + $0x58] sm:$0xff]   ;;  %v1171_v20 = vld [vmem:[%s1671_s1 + $0x50] sm:$0xff]  }
   0x6   :  { %1045 = vmatprep.subr.bf16.mxu1 %v1156_v5  ;;  %v1164_v13 = vld [vmem:[%s1671_s1 + $0xe0] sm:$0xff]   ;;  %v1168_v17 = vld [vmem:[%s1671_s1 + $0xd8] sm:$0xff]   ;;  %v1172_v21 = vld [vmem:[%s1671_s1 + $0xd0] sm:$0xff]  }
   0x7   :  { %v1165_v14 = vld [vmem:[%s1671_s1 + $0x20] sm:$0xff]   ;;  %v1169_v18 = vld [vmem:[%s1671_s1 + $0x18] sm:$0xff]   ;;  %v1173_v22 = vld [vmem:[%s1671_s1 + $0x10] sm:$0xff]  }
   0x8   :  { %982 = vmatpush3.bf16.msra.mxu0 %v1157_v6  ;;  %v1166_v15 = vld [vmem:[%s1671_s1 + $0xa0] sm:$0xff]   ;;  %v1170_v19 = vld [vmem:[%s1671_s1 + $0x98] sm:$0xff]   ;;  %v1174_v23 = vld [vmem:[%s1671_s1 + $0x90] sm:$0xff]  }
   0x9   :  { %1046 = vmatpush3.bf16.msra.mxu1 %v1158_v7  ;;  %983 = vmatprep.subr.bf16.mxu0 %v1159_v8  ;;  %v1175_v24 = vld [vmem:[%s1671_s1 + $0x48] sm:$0xff]   ;;  %v1179_v28 = vld [vmem:[%s1671_s1 + $0x40] sm:$0xff]   ;;  %v1189_v36 = vld [vmem:[%s1671_s1 + $0x118] sm:$0xff]  }
   0xa   :  { %1047 = vmatprep.subr.bf16.mxu1 %v1160_v9  ;;  %v1176_v25 = vld [vmem:[%s1671_s1 + $0xc8] sm:$0xff]   ;;  %v1180_v29 = vld [vmem:[%s1671_s1 + $0xc0] sm:$0xff]   ;;  %v1202_v42 = vld [vmem:[%s1671_s1 + $0x110] sm:$0xff]  }
   0xb   :  { %v1177_v26 = vld [vmem:[%s1671_s1 + $0x8] sm:$0xff]   ;;  %v1181_v30 = vld [vmem:[%s1671_s1] sm:$0xff]   ;;  %v1198_v43 = vld [vmem:[%s1672_s0 + $0x5c] ss:$20 sps:$4 sm:$0xff]  }
   0xc   :  { %984 = vmatpush3.bf16.msra.mxu0 %v1161_v10  ;;  %v1178_v27 = vld [vmem:[%s1671_s1 + $0x88] sm:$0xff]   ;;  %v1182_v31 = vld [vmem:[%s1671_s1 + $0x80] sm:$0xff]   ;;  %v1203_v47 = vld [vmem:[%s1672_s0 + $0x7c] ss:$20 sps:$4 sm:$0xff]  }
   0xd   :  { %1048 = vmatpush3.bf16.msra.mxu1 %v1162_v11  ;;  %985 = vmatprep.subr.bf16.mxu0 %v1163_v12  ;;  %v1183_v32 = vld [vmem:[%s1672_s0] ss:$20 sps:$4 sm:$0xff]   ;;  %v1185_v33 = vld [vmem:[%s1672_s0 + $0x4] ss:$20 sps:$4 sm:$0xff]   ;;  %v1186_v34 = vld [vmem:[%s1672_s0 + $0x8] ss:$20 sps:$4 sm:$0xff]  }
   0xe   :  { %1049 = vmatprep.subr.bf16.mxu1 %v1164_v13  ;;  %v1188_v35 = vld [vmem:[%s1672_s0 + $0xc] ss:$20 sps:$4 sm:$0xff]   ;;  %615 = vmatprep.mubr.bf16.mxu0 %v1185_v33  ;;  %v1192_v38 = vld [vmem:[%s1672_s0 + $0x34] ss:$20 sps:$4 sm:$0xff]   ;;  %v1195_v40 = vld [vmem:[%s1672_s0 + $0x30] ss:$20 sps:$4 sm:$0xff]  }
   0xf   :  { %712 = vmatprep.mubr.bf16.mxu1 %v1188_v35  ;;  %v1190_v37 = vld [vmem:[%s1672_s0 + $0x2c] ss:$20 sps:$4 sm:$0xff]   ;;  %v1194_v39 = vld [vmem:[%s1672_s0 + $0x28] ss:$20 sps:$4 sm:$0xff]   ;;  %v1200_v44 = vld [vmem:[%s1672_s0 + $0x50] ss:$20 sps:$4 sm:$0xff]  }
  0x10   :  { %986 = vmatpush3.bf16.msra.mxu0 %v1165_v14  ;;  %v1196_v41 = vld [vmem:[%s1672_s0 + $0x54] ss:$20 sps:$4 sm:$0xff]   ;;  %v1201_v45 = vld [vmem:[%s1672_s0 + $0x58] ss:$20 sps:$4 sm:$0xff]   ;;  %v1228_v49 = vld [vmem:[%s1671_s1 + $0x100] sm:$0xff]  }
  0x11   :  { %1050 = vmatpush3.bf16.msra.mxu1 %v1166_v15  ;;  %987 = vmatprep.subr.bf16.mxu0 %v1167_v16  ;;  %v1215_v46 = vld [vmem:[%s1671_s1 + $0x108] sm:$0xff]   ;;  %v1205_v48 = vld [vmem:[%s1672_s0 + $0x84] ss:$20 sps:$4 sm:$0xff]   ;;  %v1208_v51 = vld [vmem:[%s1672_s0 + $0x80] ss:$20 sps:$4 sm:$0xff]  }
  0x12   :  { %1051 = vmatprep.subr.bf16.mxu1 %v1168_v17  ;;  %v1207_v50 = vld [vmem:[%s1672_s0 + $0x78] ss:$20 sps:$4 sm:$0xff]   ;;  %v1213_v54 = vld [vmem:[%s1672_s0 + $0xa0] ss:$20 sps:$4 sm:$0xff]   ;;  %v1214_v55 = vld [vmem:[%s1672_s0 + $0xa8] ss:$20 sps:$4 sm:$0xff]  }
  0x13   :  { %v1209_v52 = vld [vmem:[%s1672_s0 + $0xa4] ss:$20 sps:$4 sm:$0xff]   ;;  %v1211_v53 = vld [vmem:[%s1672_s0 + $0xac] ss:$20 sps:$4 sm:$0xff]   ;;  %v1218_v57 = vld [vmem:[%s1672_s0 + $0xd4] ss:$20 sps:$4 sm:$0xff]  }
  0x14   :  { %988 = vmatpush3.bf16.msra.mxu0 %v1169_v18  ;;  %v1216_v56 = vld [vmem:[%s1672_s0 + $0xcc] ss:$20 sps:$4 sm:$0xff]   ;;  %v1220_v58 = vld [vmem:[%s1672_s0 + $0xc8] ss:$20 sps:$4 sm:$0xff]   ;;  %v1221_v59 = vld [vmem:[%s1672_s0 + $0xd0] ss:$20 sps:$4 sm:$0xff]  }
  0x15   :  { %1052 = vmatpush3.bf16.msra.mxu1 %v1170_v19  ;;  %989 = vmatprep.subr.bf16.mxu0 %v1171_v20  ;;  %v1222_v60 = vld [vmem:[%s1672_s0 + $0xf4] ss:$20 sps:$4 sm:$0xff]   ;;  %v1224_v61 = vld [vmem:[%s1672_s0 + $0xfc] ss:$20 sps:$4 sm:$0xff]   ;;  %v1227_v63 = vld [vmem:[%s1672_s0 + $0xf8] ss:$20 sps:$4 sm:$0xff]  }
  0x16   :  { %1053 = vmatprep.subr.bf16.mxu1 %v1172_v21  ;;  %v1226_v62 = vld [vmem:[%s1672_s0 + $0xf0] ss:$20 sps:$4 sm:$0xff]   ;;  %v1233_v2 = vld [vmem:[%s1672_s0 + $0x118] ss:$20 sps:$4 sm:$0xff]   ;;  %v1234_v3 = vld [vmem:[%s1672_s0 + $0x120] ss:$20 sps:$4 sm:$0xff]  }
  0x17   :  { %v1229_v0 = vld [vmem:[%s1672_s0 + $0x11c] ss:$20 sps:$4 sm:$0xff]   ;;  %v1231_v1 = vld [vmem:[%s1672_s0 + $0x124] ss:$20 sps:$4 sm:$0xff]   ;;  %v1239_v8 = vld [vmem:[%s1672_s0 + $0x60] ss:$20 sps:$4 sm:$0xff]  }
  0x18   :  { %990 = vmatpush3.bf16.msra.mxu0 %v1173_v22  ;;  %v1235_v4 = vld [vmem:[%s1672_s0 + $0x10] ss:$20 sps:$4 sm:$0xff]   ;;  %v1237_v6 = vld [vmem:[%s1672_s0 + $0x38] ss:$20 sps:$4 sm:$0xff]   ;;  %v1240_v9 = vld [vmem:[%s1672_s0 + $0x100] ss:$20 sps:$4 sm:$0xff]  }
  0x19   :  { %1054 = vmatpush3.bf16.msra.mxu1 %v1174_v23  ;;  %991 = vmatprep.subr.bf16.mxu0 %v1175_v24  ;;  %v1236_v5 = vld [vmem:[%s1672_s0 + $0xb0] ss:$20 sps:$4 sm:$0xff]   ;;  %v1238_v7 = vld [vmem:[%s1672_s0 + $0xd8] ss:$20 sps:$4 sm:$0xff]   ;;  %v1241_v10 = vld [vmem:[%s1672_s0 + $0x88] ss:$20 sps:$4 sm:$0xff]  }
  0x1a   :  { %1055 = vmatprep.subr.bf16.mxu1 %v1176_v25  ;;  %v1242_v11 = vld [vmem:[%s1672_s0 + $0x128] ss:$20 sps:$4 sm:$0xff]  }
  0x1c   :  { %992 = vmatpush3.bf16.msra.mxu0 %v1177_v26 }
  0x1d   :  { %1056 = vmatpush3.bf16.msra.mxu1 %v1178_v27  ;;  %993 = vmatprep.subr.bf16.mxu0 %v1179_v28 }
  0x1e   :  { %1057 = vmatprep.subr.bf16.mxu1 %v1180_v29 }
  0x20   :  { %994 = vmatpush3.bf16.msra.mxu0 %v1181_v30 }
  0x21   :  { %1058 = vmatpush3.bf16.msra.mxu1 %v1182_v31  ;;  %1119 = vmatprep.subr.bf16.mxu0 %v1189_v36 }
  0x22   :  { %1143 = vmatprep.subr.bf16.mxu1 %v1189_v36 }
  0x23   :  { %616 = vmatmul.mubr.bf16.vlgmr.msra.gmra.mxu0 %v1183_v32 }
  0x24   :  { %713 = vmatmul.mubr.bf16.vlgmr.msra.gmra.mxu1 %v1186_v34  ;;  %1120 = vmatpush3.bf16.msra.mxu0 %v1189_v36 }
  0x25   :  { %1147 = vmatpush3.bf16.msra.mxu1 %v1189_v36  ;;  %623 = vmatprep.mubr.bf16.mxu0 %v1190_v37 }
  0x26   :  { %720 = vmatprep.mubr.bf16.mxu1 %v1192_v38  ;;  %1121 = vmatprep.subr.bf16.mxu0 %v1202_v42 }
  0x27   :  { %1144 = vmatprep.subr.bf16.mxu1 %v1202_v42 }
  0x28   :  { %1122 = vmatpush3.bf16.msra.mxu0 %v1202_v42 }
  0x29   :  { %1148 = vmatpush3.bf16.msra.mxu1 %v1202_v42  ;;  %1123 = vmatprep.subr.bf16.mxu0 %v1215_v46 }
  0x2a   :  { %1145 = vmatprep.subr.bf16.mxu1 %v1215_v46 }
  0x2b   :  { %624 = vmatmul.mubr.bf16.gmra.mxu0 %v1194_v39 }
  0x2c   :  { %721 = vmatmul.mubr.bf16.gmra.mxu1 %v1195_v40  ;;  %631 = vmatprep.mubr.bf16.mxu0 %v1196_v41 }
  0x2d   :  { %728 = vmatprep.mubr.bf16.mxu1 %v1198_v43  ;;  %1124 = vmatpush3.bf16.msra.mxu0 %v1215_v46 }
  0x2e   :  { %1149 = vmatpush3.bf16.msra.mxu1 %v1215_v46  ;;  %1125 = vmatprep.subr.bf16.mxu0 %v1228_v49 }
  0x2f   :  { %1146 = vmatprep.subr.bf16.mxu1 %v1228_v49 }
  0x31   :  { %1126 = vmatpush3.bf16.msra.mxu0 %v1228_v49 }
  0x32   :  { %1150 = vmatpush3.bf16.msra.mxu1 %v1228_v49 }
  0x33   :  { %632 = vmatmul.mubr.bf16.gmra.mxu0 %v1200_v44 }
  0x34   :  { %729 = vmatmul.mubr.bf16.gmra.mxu1 %v1201_v45  ;;  %639 = vmatprep.mubr.bf16.mxu0 %v1203_v47 }
  0x35   :  { %736 = vmatprep.mubr.bf16.mxu1 %v1205_v48 }
  0x3b   :  { %640 = vmatmul.mubr.bf16.gmra.mxu0 %v1207_v50 }
  0x3c   :  { %737 = vmatmul.mubr.bf16.gmra.mxu1 %v1208_v51  ;;  %647 = vmatprep.mubr.bf16.mxu0 %v1209_v52 }
  0x3d   :  { %744 = vmatprep.mubr.bf16.mxu1 %v1211_v53 }
  0x43   :  { %648 = vmatmul.mubr.bf16.gmra.mxu0 %v1213_v54 }
  0x44   :  { %745 = vmatmul.mubr.bf16.gmra.mxu1 %v1214_v55  ;;  %655 = vmatprep.mubr.bf16.mxu0 %v1216_v56 }
  0x45   :  { %752 = vmatprep.mubr.bf16.mxu1 %v1218_v57 }
  0x4b   :  { %656 = vmatmul.mubr.bf16.gmra.mxu0 %v1220_v58 }
  0x4c   :  { %753 = vmatmul.mubr.bf16.gmra.mxu1 %v1221_v59  ;;  %663 = vmatprep.mubr.bf16.mxu0 %v1222_v60 }
  0x4d   :  { %760 = vmatprep.mubr.bf16.mxu1 %v1224_v61 }
  0x53   :  { %664 = vmatmul.mubr.bf16.gmra.mxu0 %v1226_v62 }
  0x54   :  { %761 = vmatmul.mubr.bf16.gmra.mxu1 %v1227_v63  ;;  %671 = vmatprep.mubr.bf16.mxu0 %v1229_v0 }
  0x55   :  { %768 = vmatprep.mubr.bf16.mxu1 %v1231_v1 }
  0x5b   :  { %672 = vmatmul.mubr.bf16.gmra.mxu0 %v1233_v2 }
  0x5c   :  { %769 = vmatmul.mubr.bf16.gmra.mxu1 %v1234_v3  ;;  %1127 = vmatprep.mubr.msk.bf16.mxu0 %vm558_vm0, %v1235_v4  ;;  %v1556_v4 = vld [vmem:[%s1673_s2] ss:$0 sm:$0xff] }
  0x5d   :  { %1135 = vmatprep.mubr.msk.bf16.mxu1 %vm558_vm0, %v1236_v5 }
  0x63   :  { %1128 = vmatmul.mubr.msk.bf16.vlgmr.msra.gmra.mxu0 %vm558_vm0, %v1237_v6 }
  0x64   :  { %1136 = vmatmul.mubr.msk.bf16.vlgmr.msra.gmra.mxu1 %vm558_vm0, %v1238_v7  ;;  %1131 = vmatprep.mubr.msk.bf16.mxu0 %vm558_vm0, %v1239_v8 }
  0x65   :  { %1139 = vmatprep.mubr.msk.bf16.mxu1 %vm558_vm0, %v1240_v9 }
  0x6b   :  { %1132 = vmatmul.mubr.msk.bf16.gmra.mxu0 %vm558_vm0, %v1241_v10 }
  0x6c   :  { %1140 = vmatmul.mubr.msk.bf16.gmra.mxu1 %vm558_vm0, %v1242_v11 }
  0xe3   :  { %v995_v12 = vpop.f32.mrf.mxu0 }
  0xe4   :  { %v1499_v13 = vpop.f32.mrf.mxu1 }
  0xe5   :  { %v996_v14 = vpop.f32.mrf.mxu0 }
  0xe6   :  { %v1501_v15 = vpop.f32.mrf.mxu1  ;;  %v997_v2 = vadd.f32 %v996_v14, %v995_v12 }
  0xe7   :  { %v998_v16 = vpop.f32.mrf.mxu0 }
  0xe8   :  { %v1503_v17 = vpop.f32.mrf.mxu1 }
  0xe9   :  { %v999_v18 = vpop.f32.mrf.mxu0 }
  0xea   :  { %v1505_v19 = vpop.f32.mrf.mxu1  ;;  %v1000_v5 = vadd.f32 %v999_v18, %v998_v16 }
  0xeb   :  { %v1001_v20 = vpop.f32.mrf.mxu0  ;;  %v1064_v16 = vadd.f32 %v1505_v19, %v1503_v17 }
  0xec   :  { %v1507_v21 = vpop.f32.mrf.mxu1  ;;  %v621_v12 = vadd.f32 %v1000_v5, %v1556_v4 }
  0xed   :  { %v1002_v22 = vpop.f32.mrf.mxu0 }
  0xee   :  { %v1509_v23 = vpop.f32.mrf.mxu1  ;;  %v1003_v6 = vadd.f32 %v1002_v22, %v1001_v20  ;;  %v718_v5 = vadd.f32 %v1064_v16, %v621_v12 }
  0xef   :  { %v1004_v24 = vpop.f32.mrf.mxu0 }
  0xf0   :  { %v1511_v25 = vpop.f32.mrf.mxu1  ;;  %v626_v14 = vadd.f32 %v1003_v6, %v1556_v4 }
  0xf1   :  { %v1005_v26 = vpop.f32.mrf.mxu0 }
  0xf2   :  { %v1513_v27 = vpop.f32.mrf.mxu1  ;;  %v1006_v10 = vadd.f32 %v1005_v26, %v1004_v24  ;;  %v1067_v24 = vadd.f32 %v1509_v23, %v1507_v21 }
  0xf3   :  { %v1007_v28 = vpop.f32.mrf.mxu0  ;;  %v1070_v17 = vadd.f32 %v1513_v27, %v1511_v25 }
  0xf4   :  { %v1515_v29 = vpop.f32.mrf.mxu1  ;;  %v629_v26 = vadd.f32 %v1006_v10, %v1556_v4 }
  0xf5   :  { %v1008_v30 = vpop.f32.mrf.mxu0 }
  0xf6   :  { %v1517_v31 = vpop.f32.mrf.mxu1 }
  0xf7   :  { %v1519_v32 = vpop.f32.mrf.mxu0 }
  0xf8   :  { %v1521_v33 = vpop.f32.mrf.mxu1 }
  0xf9   :  { %1675 = vst [vmem:[#allocation2_spill] sm:$0xff] %v1521_v33  ;;  %v1523_v34 = vpop.f32.mrf.mxu0 }
  0xfa   :  { %v1525_v35 = vpop.f32.mrf.mxu1 }
  0xfb   :  { %1676 = vst [vmem:[#allocation3_spill] sm:$0xff] %v1525_v35  ;;  %v1013_v36 = vpop.f32.mrf.mxu0  ;;  %v618_v35 = vadd.f32 %v997_v2, %v1556_v4 }
  0xfc   :  { %v1527_v37 = vpop.f32.mrf.mxu1 }
  0xfd   :  { %v1014_v38 = vpop.f32.mrf.mxu0 }
  0xfe   :  { %v1529_v39 = vpop.f32.mrf.mxu1  ;;  %v1015_v19 = vadd.f32 %v1014_v38, %v1013_v36 }
  0xff   :  { %v1531_v40 = vpop.f32.mrf.mxu0 }
 0x100   :  { %v1533_v41 = vpop.f32.mrf.mxu1  ;;  %v642_v38 = vadd.f32 %v1015_v19, %v1556_v4  ;;  %v1682_v19 = vld [vmem:[#allocation2_spill] sm:$0xff] }
 0x101   :  { %1677 = vst [vmem:[#allocation4_spill] sm:$0xff] %v1533_v41  ;;  %v1535_v42 = vpop.f32.mrf.mxu0  ;;  %v1061_v41 = vadd.f32 %v1501_v15, %v1499_v13 }
 0x102   :  { %v1537_v43 = vpop.f32.mrf.mxu1 }
 0x103   :  { %1678 = vst [vmem:[#allocation5_spill] sm:$0xff] %v1537_v43  ;;  %v1019_v44 = vpop.f32.mrf.mxu0  ;;  %v715_v15 = vadd.f32 %v1061_v41, %v618_v35  ;;  %v726_v35 = vadd.f32 %v1070_v17, %v629_v26 }
 0x104   :  { %v1083_v45 = vpop.f32.mrf.mxu1 }
 0x105   :  { %v1020_v46 = vpop.f32.mrf.mxu0 }
 0x106   :  { %v1084_v47 = vpop.f32.mrf.mxu1  ;;  %v1021_v33 = vadd.f32 %v1020_v46, %v1019_v44  ;;  %v1009_v44 = vadd.f32 %v1008_v30, %v1007_v28 }
 0x107   :  { %v1022_v48 = vpop.f32.mrf.mxu0  ;;  %v1085_v6 = vadd.f32 %v1084_v47, %v1083_v45  ;;  %v1018_v45 = vadd.f32 %v1535_v42, %v1531_v40 }
 0x108   :  { %v1539_v49 = vpop.f32.mrf.mxu1 }
 0x109   :  { %v1023_v50 = vpop.f32.mrf.mxu0 }
 0x10a   :  { %v1541_v51 = vpop.f32.mrf.mxu1  ;;  %v1024_v46 = vadd.f32 %v1023_v50, %v1022_v48  ;;  %v634_v48 = vadd.f32 %v1009_v44, %v1556_v4  ;;  %v1681_v26 = vld [vmem:[#allocation5_spill] sm:$0xff] }
 0x10b   :  { %v1025_v52 = vpop.f32.mrf.mxu0  ;;  %v1088_v47 = vadd.f32 %v1541_v51, %v1539_v49  ;;  %v1012_v49 = vadd.f32 %v1523_v34, %v1519_v32  ;;  %v1079_v51 = vadd.f32 %v1529_v39, %v1527_v37  ;;  %v1073_v37 = vadd.f32 %v1517_v31, %v1515_v29 }
 0x10c   :  { %v1089_v53 = vpop.f32.mrf.mxu1  ;;  %v645_v39 = vadd.f32 %v1018_v45, %v1556_v4 }
 0x10d   :  { %v1026_v54 = vpop.f32.mrf.mxu0 }
 0x10e   :  { %v1090_v55 = vpop.f32.mrf.mxu1  ;;  %v1027_v8 = vadd.f32 %v1026_v54, %v1025_v52  ;;  %v650_v54 = vadd.f32 %v1021_v33, %v1556_v4  ;;  %v653_v33 = vadd.f32 %v1024_v46, %v1556_v4  ;;  %v731_v46 = vadd.f32 %v1073_v37, %v634_v48 }
 0x10f   :  { %v1028_v56 = vpop.f32.mrf.mxu0  ;;  %v1091_v2 = vadd.f32 %v1090_v55, %v1089_v53 }
 0x110   :  { %v1092_v57 = vpop.f32.mrf.mxu1  ;;  %v658_v18 = vadd.f32 %v1027_v8, %v1556_v4  ;;  %v747_v36 = vadd.f32 %v1085_v6, %v650_v54  ;;  %v750_v10 = vadd.f32 %v1088_v47, %v653_v33 }
 0x111   :  { %v1029_v58 = vpop.f32.mrf.mxu0 }
 0x112   :  { %v1093_v59 = vpop.f32.mrf.mxu1  ;;  %v1030_v20 = vadd.f32 %v1029_v58, %v1028_v56  ;;  %v723_v58 = vadd.f32 %v1067_v24, %v626_v14  ;;  %v755_v30 = vadd.f32 %v1091_v2, %v658_v18  ;;  %v1680_v24 = vld [vmem:[#allocation4_spill] sm:$0xff] }
 0x113   :  { %v1031_v60 = vpop.f32.mrf.mxu0  ;;  %v1094_v41 = vadd.f32 %v1093_v59, %v1092_v57  ;;  %v1082_v44 = vadd.f32 %v1681_v26, %v1680_v24 }
 0x114   :  { %v1543_v61 = vpop.f32.mrf.mxu1  ;;  %v661_v21 = vadd.f32 %v1030_v20, %v1556_v4 }
 0x115   :  { %v1032_v62 = vpop.f32.mrf.mxu0 }
 0x116   :  { %v1545_v63 = vpop.f32.mrf.mxu1  ;;  %v1033_v55 = vadd.f32 %v1032_v62, %v1031_v60  ;;  %v758_v42 = vadd.f32 %v1094_v41, %v661_v21  ;;  %v742_v21 = vadd.f32 %v1082_v44, %v645_v39 }
 0x117   :  { %v1547_v0 = vpop.f32.mrf.mxu0 }
 0x118   :  { %v1549_v1 = vpop.f32.mrf.mxu1  ;;  %v666_v12 = vadd.f32 %v1033_v55, %v1556_v4 }
 0x119   :  { %1679 = vst [vmem:[#allocation6_spill] sm:$0xff] %v1549_v1  ;;  %v1551_v3 = vpop.f32.mrf.mxu0 }
 0x11a   :  { %v1558_v7 = vpop.f32.mrf.mxu1  ;;  %v1036_v14 = vadd.f32 %v1551_v3, %v1547_v0  ;;  %v1097_v3 = vadd.f32 %v1545_v63, %v1543_v61 }
 0x11b   :  { %v1037_v9 = vpop.f32.mrf.mxu0 }
 0x11c   :  { %v1101_v11 = vpop.f32.mrf.mxu1  ;;  %v669_v54 = vadd.f32 %v1036_v14, %v1556_v4  ;;  %v763_v17 = vadd.f32 %v1097_v3, %v666_v12 }
 0x11d   :  { %v1038_v1 = vpop.f32.mrf.mxu0 }
 0x11e   :  { %v1102_v43 = vpop.f32.mrf.mxu1  ;;  %v1039_v23 = vadd.f32 %v1038_v1, %v1037_v9 }
 0x11f   :  { %v1040_v22 = vpop.f32.mrf.mxu0  ;;  %v1103_v16 = vadd.f32 %v1102_v43, %v1101_v11  ;;  %v739_v43 = vadd.f32 %v1079_v51, %v642_v38 }
 0x120   :  { %v1571_v52 = vpop.f32.mrf.mxu1  ;;  %v674_v57 = vadd.f32 %v1039_v23, %v1556_v4 }
 0x121   :  { %v1041_v13 = vpop.f32.mrf.mxu0 }
 0x122   :  { %v1105_v56 = vpop.f32.mrf.mxu1  ;;  %v1042_v59 = vadd.f32 %v1041_v13, %v1040_v22  ;;  %v771_v20 = vadd.f32 %v1103_v16, %v674_v57  ;;  %v637_v22 = vadd.f32 %v1012_v49, %v1556_v4 }
 0x123   :  { %v1129_v28 = vpop.f32.mrf.mxu0  ;;  %v1106_v2 = vadd.f32 %v1105_v56, %v1571_v52  ;;  %v1684_v52 = vld [vmem:[#allocation6_spill] sm:$0xff] }
 0x124   :  { %v820_v50 = vadd.f32 %v1129_v28, %v723_v58  ;;  %v1137_v53 = vpop.f32.mrf.mxu1  ;;  %v677_v11 = vadd.f32 %v1042_v59, %v1556_v4  ;;  %v1683_v58 = vld [vmem:[#allocation3_spill] sm:$0xff]  ;;  %v1100_v56 = vadd.f32 %v1558_v7, %v1684_v52 }
 0x125   :  { %v852_v25 = vadd.f32 %v1137_v53, %v755_v30  ;;  %v811_v27 = vpop.f32.mrf.mxu0 }
 0x126   :  { %876 = vst.msk [vmem:[%s1674_s3 + $0x10] sm:$0xff] %vm558_vm0, %v820_v50  ;;  %v812_v1 = vadd.f32 %v811_v27, %v715_v15  ;;  %v843_v8 = vpop.f32.mrf.mxu1  ;;  %v774_v30 = vadd.f32 %v1106_v2, %v677_v11 }
 0x127   :  { %884 = vst.msk [vmem:[%s1674_s3 + $0x50] sm:$0xff] %vm558_vm0, %v852_v25  ;;  %v844_v60 = vadd.f32 %v843_v8, %v747_v36  ;;  %v1130_v40 = vpop.f32.mrf.mxu0 }
 0x128   :  { %874 = vst.msk [vmem:[%s1674_s3] sm:$0xff] %vm558_vm0, %v812_v1  ;;  %v823_v62 = vadd.f32 %v1130_v40, %v726_v35  ;;  %v1138_v9 = vpop.f32.mrf.mxu1  ;;  %v766_v35 = vadd.f32 %v1100_v56, %v669_v54 }
 0x129   :  { %882 = vst.msk [vmem:[%s1674_s3 + $0x40] sm:$0xff] %vm558_vm0, %v844_v60  ;;  %v855_v32 = vadd.f32 %v1138_v9, %v758_v42  ;;  %v814_v34 = vpop.f32.mrf.mxu0 }
 0x12a   :  { %877 = vst.msk [vmem:[%s1674_s3 + $0x18] sm:$0xff] %vm558_vm0, %v823_v62  ;;  %v815_v18 = vadd.f32 %v814_v34, %v718_v5  ;;  %v846_v0 = vpop.f32.mrf.mxu1  ;;  %v1076_v5 = vadd.f32 %v1683_v58, %v1682_v19 }
 0x12b   :  { %885 = vst.msk [vmem:[%s1674_s3 + $0x58] sm:$0xff] %vm558_vm0, %v855_v32  ;;  %v847_v29 = vadd.f32 %v846_v0, %v750_v10  ;;  %v1133_v31 = vpop.f32.mrf.mxu0 }
 0x12c   :  { %875 = vst.msk [vmem:[%s1674_s3 + $0x8] sm:$0xff] %vm558_vm0, %v815_v18  ;;  %v836_v61 = vadd.f32 %v1133_v31, %v739_v43  ;;  %v1141_v63 = vpop.f32.mrf.mxu1  ;;  %v734_v50 = vadd.f32 %v1076_v5, %v637_v22 }
 0x12d   :  { %883 = vst.msk [vmem:[%s1674_s3 + $0x48] sm:$0xff] %vm558_vm0, %v847_v29  ;;  %v868_v13 = vadd.f32 %v1141_v63, %v771_v20  ;;  %v827_v15 = vpop.f32.mrf.mxu0 }
 0x12e   :  { %880 = vst.msk [vmem:[%s1674_s3 + $0x30] sm:$0xff] %vm558_vm0, %v836_v61  ;;  %v828_v6 = vadd.f32 %v827_v15, %v731_v46  ;;  %v859_v4 = vpop.f32.mrf.mxu1 }
 0x12f   :  { %888 = vst.msk [vmem:[%s1674_s3 + $0x70] sm:$0xff] %vm558_vm0, %v868_v13  ;;  %v860_v23 = vadd.f32 %v859_v4, %v763_v17  ;;  %v1134_v28 = vpop.f32.mrf.mxu0 }
 0x130   :  { %878 = vst.msk [vmem:[%s1674_s3 + $0x20] sm:$0xff] %vm558_vm0, %v828_v6  ;;  %v839_v48 = vadd.f32 %v1134_v28, %v742_v21  ;;  %v1142_v33 = vpop.f32.mrf.mxu1 }
 0x131   :  { %886 = vst.msk [vmem:[%s1674_s3 + $0x60] sm:$0xff] %vm558_vm0, %v860_v23  ;;  %v871_v7 = vadd.f32 %v1142_v33, %v774_v30  ;;  %v830_v53 = vpop.f32.mrf.mxu0 }
 0x132   :  { %881 = vst.msk [vmem:[%s1674_s3 + $0x38] sm:$0xff] %vm558_vm0, %v839_v48  ;;  %v831_v41 = vadd.f32 %v830_v53, %v734_v50  ;;  %v862_v55 = vpop.f32.mrf.mxu1 }
 0x133   :  { %889 = vst.msk [vmem:[%s1674_s3 + $0x78] sm:$0xff] %vm558_vm0, %v871_v7  ;;  %v863_v25 = vadd.f32 %v862_v55, %v766_v35 }
 0x134   :  { %879 = vst.msk [vmem:[%s1674_s3 + $0x28] sm:$0xff] %vm558_vm0, %v831_v41 }
 0x135   :  { %887 = vst.msk [vmem:[%s1674_s3 + $0x68] sm:$0xff] %vm558_vm0, %v863_v25 }

// kernel: basic_encoder.40
= control target key start
LH: loop header
LB: loop body
LE: loop exit
PB: predicated region body
PF: predicated region fallthrough
CT: control target
= control target key end

     0   :  { %vm44_vm0 = vcmask 785408   ;;  %s105_s0 = inlined_call_operand.vmem [shape: f32[32,96], index: 0, kind: input, shape index: {}]   ;;  %s106_s1 = inlined_call_operand.vmem [shape: f32[1,96], index: 1, kind: input, shape index: {}]   ;;  %s107_s2 = inlined_call_operand.vmem [shape: f32[1,96], index: 2, kind: input, shape index: {}]   ;;  %s108_s3 = inlined_call_operand.vmem [shape: f32[32,96], index: 3, kind: output, shape index: {}]  }
   0x1   :  { %v14_v0 = vld [vmem:[%s105_s0] sm:$0xff]  ;;  %v15_v4 = vld [vmem:[%s105_s0 + $0x8] sm:$0xff]  ;;  %v16_v5 = vld [vmem:[%s105_s0 + $0x10] sm:$0xff] }
   0x2   :  { %v53_v1 = vld [vmem:[%s106_s1] ss:$0 sm:$0xff]  ;;  %v17_v6 = vld [vmem:[%s105_s0 + $0x18] sm:$0xff] }
   0x3   :  { %v54_v2 = vld [vmem:[%s107_s2] ss:$0 sm:$0xff]  ;;  %v25_v3 = vmul.f32 %v53_v1, %v14_v0  ;;  %v26_v7 = vmul.f32 %v53_v1, %v15_v4  ;;  %v27_v8 = vmul.f32 %v53_v1, %v16_v5  ;;  %v28_v9 = vmul.f32 %v53_v1, %v17_v6 }
   0x5   :  { %v36_v10 = vadd.f32 %v54_v2, %v25_v3  ;;  %v37_v11 = vadd.f32 %v54_v2, %v26_v7  ;;  %v38_v12 = vadd.f32 %v54_v2, %v27_v8  ;;  %v39_v13 = vadd.f32 %v54_v2, %v28_v9 }
   0x7   :  { %v40_v14 = vmax.f32 %v36_v10, 0.0  ;;  %v41_v15 = vmax.f32 %v37_v11, 0.0  ;;  %v42_v16 = vmax.f32 %v38_v12, 0.0  ;;  %v43_v17 = vmax.f32 %v39_v13, 0.0 }
   0x9   :  { %45 = vst.msk [vmem:[%s108_s3] sm:$0xff] %vm44_vm0, %v40_v14  ;;  %46 = vst.msk [vmem:[%s108_s3 + $0x8] sm:$0xff] %vm44_vm0, %v41_v15 }
   0xa   :  { %47 = vst.msk [vmem:[%s108_s3 + $0x10] sm:$0xff] %vm44_vm0, %v42_v16  ;;  %48 = vst.msk [vmem:[%s108_s3 + $0x18] sm:$0xff] %vm44_vm0, %v43_v17 }

// kernel: basic_encoder.39
= control target key start
LH: loop header
LB: loop body
LE: loop exit
PB: predicated region body
PF: predicated region fallthrough
CT: control target
= control target key end

     0   :  { %vm372_vm0 = vcmask 523264   ;;  %vm526_vm1 = vcmask 785408   ;;  %s885_s1 = inlined_call_operand.vmem [shape: bf16[576,96], index: 1, kind: input, shape index: {}]   ;;  %s886_s0 = inlined_call_operand.vmem [shape: bf16[32,576], index: 0, kind: input, shape index: {}]   ;;  %s887_s2 = inlined_call_operand.vmem [shape: f32[1,96], index: 2, kind: input, shape index: {}]   ;;  %s888_s3 = inlined_call_operand.vmem [shape: f32[32,96], index: 3, kind: output, shape index: {}]  }
   0x1   :  { %v658_v0 = vld [vmem:[%s885_s1 + $0x78] sm:$0xff]   ;;  %v662_v4 = vld [vmem:[%s885_s1 + $0x70] sm:$0xff]   ;;  %v666_v8 = vld [vmem:[%s885_s1 + $0x68] sm:$0xff]  }
   0x2   :  { %v659_v1 = vld [vmem:[%s885_s1 + $0xf8] sm:$0xff]   ;;  %584 = vmatprep.subr.bf16.mxu0 %v658_v0  ;;  %v663_v5 = vld [vmem:[%s885_s1 + $0xf0] sm:$0xff]   ;;  %v667_v9 = vld [vmem:[%s885_s1 + $0xe8] sm:$0xff]  }
   0x3   :  { %v660_v2 = vld [vmem:[%s885_s1 + $0x38] sm:$0xff]   ;;  %612 = vmatprep.subr.bf16.mxu1 %v659_v1  ;;  %v664_v6 = vld [vmem:[%s885_s1 + $0x30] sm:$0xff]   ;;  %v668_v10 = vld [vmem:[%s885_s1 + $0x28] sm:$0xff]  }
   0x4   :  { %v661_v3 = vld [vmem:[%s885_s1 + $0xb8] sm:$0xff]   ;;  %585 = vmatpush3.bf16.msra.mxu0 %v660_v2  ;;  %v665_v7 = vld [vmem:[%s885_s1 + $0xb0] sm:$0xff]   ;;  %v669_v11 = vld [vmem:[%s885_s1 + $0xa8] sm:$0xff]  }
   0x5   :  { %613 = vmatpush3.bf16.msra.mxu1 %v661_v3  ;;  %586 = vmatprep.subr.bf16.mxu0 %v662_v4  ;;  %v670_v12 = vld [vmem:[%s885_s1 + $0x60] sm:$0xff]   ;;  %v674_v16 = vld [vmem:[%s885_s1 + $0x58] sm:$0xff]   ;;  %v678_v20 = vld [vmem:[%s885_s1 + $0x50] sm:$0xff]  }
   0x6   :  { %614 = vmatprep.subr.bf16.mxu1 %v663_v5  ;;  %v671_v13 = vld [vmem:[%s885_s1 + $0xe0] sm:$0xff]   ;;  %v675_v17 = vld [vmem:[%s885_s1 + $0xd8] sm:$0xff]   ;;  %v679_v21 = vld [vmem:[%s885_s1 + $0xd0] sm:$0xff]  }
   0x7   :  { %v672_v14 = vld [vmem:[%s885_s1 + $0x20] sm:$0xff]   ;;  %v676_v18 = vld [vmem:[%s885_s1 + $0x18] sm:$0xff]   ;;  %v680_v22 = vld [vmem:[%s885_s1 + $0x10] sm:$0xff]  }
   0x8   :  { %587 = vmatpush3.bf16.msra.mxu0 %v664_v6  ;;  %v673_v15 = vld [vmem:[%s885_s1 + $0xa0] sm:$0xff]   ;;  %v677_v19 = vld [vmem:[%s885_s1 + $0x98] sm:$0xff]   ;;  %v681_v23 = vld [vmem:[%s885_s1 + $0x90] sm:$0xff]  }
   0x9   :  { %615 = vmatpush3.bf16.msra.mxu1 %v665_v7  ;;  %588 = vmatprep.subr.bf16.mxu0 %v666_v8  ;;  %v682_v24 = vld [vmem:[%s885_s1 + $0x48] sm:$0xff]   ;;  %v686_v28 = vld [vmem:[%s885_s1 + $0x40] sm:$0xff]   ;;  %v696_v36 = vld [vmem:[%s885_s1 + $0x118] sm:$0xff]  }
   0xa   :  { %616 = vmatprep.subr.bf16.mxu1 %v667_v9  ;;  %v683_v25 = vld [vmem:[%s885_s1 + $0xc8] sm:$0xff]   ;;  %v687_v29 = vld [vmem:[%s885_s1 + $0xc0] sm:$0xff]   ;;  %v697_v37 = vld [vmem:[%s885_s1 + $0x110] sm:$0xff]  }
   0xb   :  { %v684_v26 = vld [vmem:[%s885_s1 + $0x8] sm:$0xff]   ;;  %v688_v30 = vld [vmem:[%s885_s1] sm:$0xff]  }
   0xc   :  { %589 = vmatpush3.bf16.msra.mxu0 %v668_v10  ;;  %v685_v27 = vld [vmem:[%s885_s1 + $0x88] sm:$0xff]   ;;  %v689_v31 = vld [vmem:[%s885_s1 + $0x80] sm:$0xff]  }
   0xd   :  { %617 = vmatpush3.bf16.msra.mxu1 %v669_v11  ;;  %590 = vmatprep.subr.bf16.mxu0 %v670_v12  ;;  %v690_v32 = vld [vmem:[%s886_s0] ss:$20 sps:$4 sm:$0xff]   ;;  %v692_v33 = vld [vmem:[%s886_s0 + $0x4] ss:$20 sps:$4 sm:$0xff]   ;;  %v693_v34 = vld [vmem:[%s886_s0 + $0x8] ss:$20 sps:$4 sm:$0xff]  }
   0xe   :  { %618 = vmatprep.subr.bf16.mxu1 %v671_v13  ;;  %v695_v35 = vld [vmem:[%s886_s0 + $0xc] ss:$20 sps:$4 sm:$0xff]   ;;  %411 = vmatprep.mubr.bf16.mxu0 %v692_v33  ;;  %v700_v39 = vld [vmem:[%s886_s0 + $0x34] ss:$20 sps:$4 sm:$0xff]   ;;  %v703_v42 = vld [vmem:[%s886_s0 + $0x30] ss:$20 sps:$4 sm:$0xff]  }
   0xf   :  { %460 = vmatprep.mubr.bf16.mxu1 %v695_v35  ;;  %v698_v38 = vld [vmem:[%s886_s0 + $0x2c] ss:$20 sps:$4 sm:$0xff]   ;;  %v702_v40 = vld [vmem:[%s886_s0 + $0x28] ss:$20 sps:$4 sm:$0xff]   ;;  %v706_v43 = vld [vmem:[%s886_s0 + $0x10] ss:$20 sps:$4 sm:$0xff]  }
  0x10   :  { %591 = vmatpush3.bf16.msra.mxu0 %v672_v14  ;;  %v704_v41 = vld [vmem:[%s885_s1 + $0x108] sm:$0xff]   ;;  %v705_v44 = vld [vmem:[%s885_s1 + $0x100] sm:$0xff]  }
  0x11   :  { %619 = vmatpush3.bf16.msra.mxu1 %v673_v15  ;;  %592 = vmatprep.subr.bf16.mxu0 %v674_v16  ;;  %v707_v45 = vld [vmem:[%s886_s0 + $0x38] ss:$20 sps:$4 sm:$0xff]   ;;  %v535_v58 = vld [vmem:[%s887_s2] ss:$0 sm:$0xff] }
  0x12   :  { %620 = vmatprep.subr.bf16.mxu1 %v675_v17 }
  0x14   :  { %593 = vmatpush3.bf16.msra.mxu0 %v676_v18 }
  0x15   :  { %621 = vmatpush3.bf16.msra.mxu1 %v677_v19  ;;  %594 = vmatprep.subr.bf16.mxu0 %v678_v20 }
  0x16   :  { %622 = vmatprep.subr.bf16.mxu1 %v679_v21 }
  0x18   :  { %595 = vmatpush3.bf16.msra.mxu0 %v680_v22 }
  0x19   :  { %623 = vmatpush3.bf16.msra.mxu1 %v681_v23  ;;  %596 = vmatprep.subr.bf16.mxu0 %v682_v24 }
  0x1a   :  { %624 = vmatprep.subr.bf16.mxu1 %v683_v25 }
  0x1c   :  { %597 = vmatpush3.bf16.msra.mxu0 %v684_v26 }
  0x1d   :  { %625 = vmatpush3.bf16.msra.mxu1 %v685_v27  ;;  %598 = vmatprep.subr.bf16.mxu0 %v686_v28 }
  0x1e   :  { %626 = vmatprep.subr.bf16.mxu1 %v687_v29 }
  0x20   :  { %599 = vmatpush3.bf16.msra.mxu0 %v688_v30 }
  0x21   :  { %627 = vmatpush3.bf16.msra.mxu1 %v689_v31  ;;  %646 = vmatprep.subr.bf16.mxu0 %v696_v36 }
  0x23   :  { %412 = vmatmul.mubr.bf16.vlgmr.msra.gmra.mxu0 %v690_v32 }
  0x24   :  { %461 = vmatmul.mubr.bf16.vlgmr.msra.gmra.mxu1 %v693_v34  ;;  %647 = vmatpush3.bf16.msra.mxu0 %v696_v36 }
  0x25   :  { %648 = vmatprep.subr.bf16.mxu0 %v697_v37  ;;  %419 = vmatprep.mubr.bf16.mxu0 %v698_v38 }
  0x26   :  { %468 = vmatprep.mubr.bf16.mxu1 %v700_v39 }
  0x28   :  { %649 = vmatpush3.bf16.msra.mxu0 %v697_v37 }
  0x29   :  { %650 = vmatprep.subr.bf16.mxu0 %v704_v41 }
  0x2b   :  { %420 = vmatmul.mubr.bf16.gmra.mxu0 %v702_v40 }
  0x2c   :  { %469 = vmatmul.mubr.bf16.gmra.mxu1 %v703_v42  ;;  %654 = vmatprep.mubr.msk.bf16.mxu0 %vm372_vm0, %v706_v43 }
  0x2d   :  { %651 = vmatpush3.bf16.msra.mxu0 %v704_v41 }
  0x2e   :  { %652 = vmatprep.subr.bf16.mxu0 %v705_v44 }
  0x31   :  { %653 = vmatpush3.bf16.msra.mxu0 %v705_v44 }
  0x34   :  { %655 = vmatmul.mubr.msk.bf16.vlgmr.msra.gmra.mxu0 %vm372_vm0, %v707_v45 }
  0xe3   :  { %v600_v46 = vpop.f32.mrf.mxu0 }
  0xe4   :  { %v628_v47 = vpop.f32.mrf.mxu1 }
  0xe5   :  { %v601_v48 = vpop.f32.mrf.mxu0 }
  0xe6   :  { %v629_v49 = vpop.f32.mrf.mxu1  ;;  %v602_v56 = vadd.f32 %v601_v48, %v600_v46 }
  0xe7   :  { %v603_v50 = vpop.f32.mrf.mxu0  ;;  %v630_v2 = vadd.f32 %v629_v49, %v628_v47 }
  0xe8   :  { %v631_v51 = vpop.f32.mrf.mxu1  ;;  %v414_v1 = vadd.f32 %v602_v56, %v535_v58 }
  0xe9   :  { %v604_v52 = vpop.f32.mrf.mxu0 }
  0xea   :  { %v632_v53 = vpop.f32.mrf.mxu1  ;;  %v605_v3 = vadd.f32 %v604_v52, %v603_v50  ;;  %v463_v13 = vadd.f32 %v630_v2, %v414_v1 }
  0xeb   :  { %v606_v54 = vpop.f32.mrf.mxu0  ;;  %v633_v16 = vadd.f32 %v632_v53, %v631_v51 }
  0xec   :  { %v634_v55 = vpop.f32.mrf.mxu1  ;;  %v417_v11 = vadd.f32 %v605_v3, %v535_v58 }
  0xed   :  { %v607_v57 = vpop.f32.mrf.mxu0 }
  0xee   :  { %v608_v59 = vadd.f32 %v607_v57, %v606_v54  ;;  %v635_v60 = vpop.f32.mrf.mxu1  ;;  %v466_v20 = vadd.f32 %v633_v16, %v417_v11 }
  0xef   :  { %v636_v61 = vadd.f32 %v635_v60, %v634_v55  ;;  %v609_v62 = vpop.f32.mrf.mxu0 }
  0xf0   :  { %v422_v63 = vadd.f32 %v608_v59, %v535_v58  ;;  %v637_v0 = vpop.f32.mrf.mxu1 }
  0xf1   :  { %v610_v4 = vpop.f32.mrf.mxu0 }
  0xf2   :  { %v611_v5 = vadd.f32 %v610_v4, %v609_v62  ;;  %v638_v6 = vpop.f32.mrf.mxu1  ;;  %v471_v7 = vadd.f32 %v636_v61, %v422_v63 }
  0xf3   :  { %v639_v9 = vadd.f32 %v638_v6, %v637_v0 }
  0xf4   :  { %v425_v8 = vadd.f32 %v611_v5, %v535_v58  ;;  %v656_v10 = vpop.f32.mrf.mxu0 }
  0xf5   :  { %v520_v12 = vadd.f32 %v656_v10, %v471_v7 }
  0xf6   :  { %v511_v14 = vpop.f32.mrf.mxu0  ;;  %v474_v15 = vadd.f32 %v639_v9, %v425_v8 }
  0xf7   :  { %529 = vst.msk [vmem:[%s888_s3 + $0x10] sm:$0xff] %vm526_vm1, %v520_v12  ;;  %v512_v17 = vadd.f32 %v511_v14, %v463_v13 }
  0xf8   :  { %v657_v18 = vpop.f32.mrf.mxu0 }
  0xf9   :  { %527 = vst.msk [vmem:[%s888_s3] sm:$0xff] %vm526_vm1, %v512_v17  ;;  %v523_v19 = vadd.f32 %v657_v18, %v474_v15 }
  0xfa   :  { %v514_v21 = vpop.f32.mrf.mxu0 }
  0xfb   :  { %530 = vst.msk [vmem:[%s888_s3 + $0x18] sm:$0xff] %vm526_vm1, %v523_v19  ;;  %v515_v22 = vadd.f32 %v514_v21, %v466_v20 }
  0xfd   :  { %528 = vst.msk [vmem:[%s888_s3 + $0x8] sm:$0xff] %vm526_vm1, %v515_v22 }

// kernel: basic_encoder.42
= control target key start
LH: loop header
LB: loop body
LE: loop exit
PB: predicated region body
PF: predicated region fallthrough
CT: control target
= control target key end

     0   :  { %vm68_vm0 = vcmask 523264   ;;  %vm124_vm1 = vcmask 785408   ;;  %s219_s1 = inlined_call_operand.vmem [shape: bf16[64,96], index: 1, kind: input, shape index: {}]   ;;  %s220_s0 = inlined_call_operand.vmem [shape: bf16[32,64], index: 0, kind: input, shape index: {}]   ;;  %s221_s2 = inlined_call_operand.vmem [shape: f32[1,96], index: 2, kind: input, shape index: {}]   ;;  %s222_s3 = inlined_call_operand.vmem [shape: f32[32,96], index: 3, kind: output, shape index: {}]  }
   0x1   :  { %v160_v0 = vld [vmem:[%s219_s1 + $0x18] sm:$0xff]   ;;  %v161_v1 = vld [vmem:[%s219_s1 + $0x10] sm:$0xff]   ;;  %v162_v2 = vld [vmem:[%s219_s1 + $0x8] sm:$0xff]  }
   0x2   :  { %148 = vmatprep.subr.bf16.mxu0 %v160_v0  ;;  %v164_v3 = vld [vmem:[%s220_s0] sm:$0xff]   ;;  %v165_v5 = vld [vmem:[%s220_s0 + $0x8] sm:$0xff]  }
   0x3   :  { %149 = vmatpush3.bf16.msra.mxu0 %v160_v0  ;;  %156 = vmatprep.mubr.msk.bf16.mxu0 %vm68_vm0, %v164_v3  ;;  %v163_v4 = vld [vmem:[%s219_s1] sm:$0xff]  }
   0x4   :  { %150 = vmatprep.subr.bf16.mxu0 %v161_v1  ;;  %v133_v6 = vld [vmem:[%s221_s2] ss:$0 sm:$0xff] }
   0x7   :  { %151 = vmatpush3.bf16.msra.mxu0 %v161_v1 }
   0x8   :  { %152 = vmatprep.subr.bf16.mxu0 %v162_v2 }
   0xb   :  { %153 = vmatpush3.bf16.msra.mxu0 %v162_v2 }
   0xc   :  { %154 = vmatprep.subr.bf16.mxu0 %v163_v4 }
   0xf   :  { %155 = vmatpush3.bf16.msra.mxu0 %v163_v4 }
  0x12   :  { %157 = vmatmul.mubr.msk.bf16.vlgmr.msra.gmra.mxu0 %vm68_vm0, %v165_v5 }
  0xd2   :  { %v158_v7 = vpop.f32.mrf.mxu0 }
  0xd3   :  { %v118_v8 = vadd.f32 %v158_v7, %v133_v6 }
  0xd4   :  { %v109_v9 = vpop.f32.mrf.mxu0 }
  0xd5   :  { %127 = vst.msk [vmem:[%s222_s3 + $0x10] sm:$0xff] %vm124_vm1, %v118_v8  ;;  %v110_v10 = vadd.f32 %v133_v6, %v109_v9 }
  0xd6   :  { %v159_v11 = vpop.f32.mrf.mxu0 }
  0xd7   :  { %125 = vst.msk [vmem:[%s222_s3] sm:$0xff] %vm124_vm1, %v110_v10  ;;  %v121_v12 = vadd.f32 %v159_v11, %v133_v6 }
  0xd8   :  { %v112_v13 = vpop.f32.mrf.mxu0 }
  0xd9   :  { %128 = vst.msk [vmem:[%s222_s3 + $0x18] sm:$0xff] %vm124_vm1, %v121_v12  ;;  %v113_v14 = vadd.f32 %v133_v6, %v112_v13 }
  0xdb   :  { %126 = vst.msk [vmem:[%s222_s3 + $0x8] sm:$0xff] %vm124_vm1, %v113_v14 }

// kernel: basic_encoder.43
= control target key start
LH: loop header
LB: loop body
LE: loop exit
PB: predicated region body
PF: predicated region fallthrough
CT: control target
= control target key end

     0   :  { %vm83_vm0 = vcmask 785408   ;;  %s179_s0 = inlined_call_operand.vmem [shape: f32[32,96], index: 0, kind: input, shape index: {}]   ;;  %s180_s1 = inlined_call_operand.vmem [shape: f32[32,96], index: 1, kind: input, shape index: {}]   ;;  %s181_s2 = inlined_call_operand.vmem [shape: f32[1,96], index: 2, kind: input, shape index: {}]   ;;  %s182_s4 = inlined_call_operand.vmem [shape: f32[1,96], index: 4, kind: input, shape index: {}]   ;;  %s183_s5 = inlined_call_operand.vmem [shape: f32[1,96], index: 5, kind: input, shape index: {}]   ;;  %s184_s3 = inlined_call_operand.vmem [shape: f32[1,96], index: 3, kind: input, shape index: {}]   ;;  %s185_s6 = inlined_call_operand.vmem [shape: f32[32,96], index: 6, kind: output, shape index: {}]  }
   0x1   :  { %v23_v0 = vld [vmem:[%s180_s1] sm:$0xff]  ;;  %v24_v7 = vld [vmem:[%s180_s1 + $0x8] sm:$0xff]  ;;  %v25_v9 = vld [vmem:[%s180_s1 + $0x10] sm:$0xff] }
   0x2   :  { %v92_v1 = vld [vmem:[%s182_s4] ss:$0 sm:$0xff]  ;;  %v50_v8 = vld [vmem:[%s179_s0 + $0x8] sm:$0xff]  ;;  %v51_v14 = vld [vmem:[%s179_s0 + $0x10] sm:$0xff] }
   0x3   :  { %v93_v2 = vld [vmem:[%s183_s5] ss:$0 sm:$0xff]  ;;  %v34_v3 = vmul.f32 %v92_v1, %v23_v0  ;;  %v35_v11 = vmul.f32 %v92_v1, %v24_v7  ;;  %v36_v13 = vmul.f32 %v92_v1, %v25_v9  ;;  %v26_v15 = vld [vmem:[%s180_s1 + $0x18] sm:$0xff] }
   0x4   :  { %v49_v4 = vld [vmem:[%s179_s0] sm:$0xff]  ;;  %v52_v16 = vld [vmem:[%s179_s0 + $0x18] sm:$0xff]  ;;  %v37_v19 = vmul.f32 %v92_v1, %v26_v15 }
   0x5   :  { %v94_v5 = vld [vmem:[%s181_s2] ss:$0 sm:$0xff]  ;;  %v45_v10 = vadd.f32 %v93_v2, %v34_v3  ;;  %v46_v22 = vadd.f32 %v93_v2, %v35_v11  ;;  %v47_v23 = vadd.f32 %v93_v2, %v36_v13 }
   0x6   :  { %v60_v6 = vmul.f32 %v94_v5, %v49_v4  ;;  %v61_v12 = vmul.f32 %v94_v5, %v50_v8  ;;  %v95_v17 = vld [vmem:[%s184_s3] ss:$0 sm:$0xff]  ;;  %v62_v18 = vmul.f32 %v94_v5, %v51_v14  ;;  %v63_v20 = vmul.f32 %v94_v5, %v52_v16 }
   0x7   :  { %v48_v24 = vadd.f32 %v93_v2, %v37_v19 }
   0x8   :  { %v64_v21 = vadd.f32 %v60_v6, %v45_v10  ;;  %v65_v26 = vadd.f32 %v61_v12, %v46_v22  ;;  %v66_v27 = vadd.f32 %v62_v18, %v47_v23 }
   0x9   :  { %v67_v28 = vadd.f32 %v63_v20, %v48_v24 }
   0xa   :  { %v75_v25 = vadd.f32 %v95_v17, %v64_v21  ;;  %v76_v30 = vadd.f32 %v95_v17, %v65_v26  ;;  %v77_v31 = vadd.f32 %v95_v17, %v66_v27 }
   0xb   :  { %v78_v32 = vadd.f32 %v95_v17, %v67_v28 }
   0xc   :  { %v79_v29 = vmax.f32 %v75_v25, 0.0  ;;  %v80_v33 = vmax.f32 %v76_v30, 0.0  ;;  %v81_v34 = vmax.f32 %v77_v31, 0.0 }
   0xd   :  { %v82_v35 = vmax.f32 %v78_v32, 0.0 }
   0xe   :  { %84 = vst.msk [vmem:[%s185_s6] sm:$0xff] %vm83_vm0, %v79_v29  ;;  %85 = vst.msk [vmem:[%s185_s6 + $0x8] sm:$0xff] %vm83_vm0, %v80_v33 }
   0xf   :  { %86 = vst.msk [vmem:[%s185_s6 + $0x10] sm:$0xff] %vm83_vm0, %v81_v34  ;;  %87 = vst.msk [vmem:[%s185_s6 + $0x18] sm:$0xff] %vm83_vm0, %v82_v35 }

// kernel: basic_encoder.41
= control target key start
LH: loop header
LB: loop body
LE: loop exit
PB: predicated region body
PF: predicated region fallthrough
CT: control target
= control target key end

     0   :  { %vm540_vm0 = vcmask 785408   ;;  %s1249_s1 = inlined_call_operand.vmem [shape: bf16[864,96], index: 1, kind: input, shape index: {}]   ;;  %s1250_s0 = inlined_call_operand.vmem [shape: bf16[32,864], index: 0, kind: input, shape index: {}]   ;;  %s1251_s2 = inlined_call_operand.vmem [shape: f32[1,96], index: 2, kind: input, shape index: {}]   ;;  %s1252_s3 = inlined_call_operand.vmem [shape: f32[32,96], index: 3, kind: output, shape index: {}]  }
   0x1   :  { %v930_v0 = vld [vmem:[%s1249_s1 + $0x78] sm:$0xff]   ;;  %v934_v4 = vld [vmem:[%s1249_s1 + $0x70] sm:$0xff]   ;;  %v938_v8 = vld [vmem:[%s1249_s1 + $0x68] sm:$0xff]  }
   0x2   :  { %v931_v1 = vld [vmem:[%s1249_s1 + $0x38] sm:$0xff]   ;;  %822 = vmatprep.subr.bf16.mxu0 %v930_v0  ;;  %v935_v5 = vld [vmem:[%s1249_s1 + $0x30] sm:$0xff]   ;;  %v939_v9 = vld [vmem:[%s1249_s1 + $0x28] sm:$0xff]  }
   0x3   :  { %v932_v2 = vld [vmem:[%s1249_s1 + $0xf8] sm:$0xff]   ;;  %823 = vmatpush3.bf16.msra.mxu0 %v931_v1  ;;  %v936_v6 = vld [vmem:[%s1249_s1 + $0xf0] sm:$0xff]   ;;  %v940_v10 = vld [vmem:[%s1249_s1 + $0xe8] sm:$0xff]  }
   0x4   :  { %v933_v3 = vld [vmem:[%s1249_s1 + $0xb8] sm:$0xff]   ;;  %850 = vmatprep.subr.bf16.mxu1 %v932_v2  ;;  %824 = vmatprep.subr.bf16.mxu0 %v934_v4  ;;  %v937_v7 = vld [vmem:[%s1249_s1 + $0xb0] sm:$0xff]   ;;  %v941_v11 = vld [vmem:[%s1249_s1 + $0xa8] sm:$0xff]  }
   0x5   :  { %851 = vmatpush3.bf16.msra.mxu1 %v933_v3  ;;  %v942_v12 = vld [vmem:[%s1249_s1 + $0x60] sm:$0xff]   ;;  %v946_v16 = vld [vmem:[%s1249_s1 + $0x58] sm:$0xff]   ;;  %v950_v20 = vld [vmem:[%s1249_s1 + $0x50] sm:$0xff]  }
   0x6   :  { %852 = vmatprep.subr.bf16.mxu1 %v936_v6  ;;  %v943_v13 = vld [vmem:[%s1249_s1 + $0x20] sm:$0xff]   ;;  %v947_v17 = vld [vmem:[%s1249_s1 + $0x18] sm:$0xff]   ;;  %v951_v21 = vld [vmem:[%s1249_s1 + $0x10] sm:$0xff]  }
   0x7   :  { %825 = vmatpush3.bf16.msra.mxu0 %v935_v5  ;;  %v944_v14 = vld [vmem:[%s1249_s1 + $0xe0] sm:$0xff]   ;;  %v948_v18 = vld [vmem:[%s1249_s1 + $0xd8] sm:$0xff]   ;;  %v952_v22 = vld [vmem:[%s1249_s1 + $0xd0] sm:$0xff]  }
   0x8   :  { %826 = vmatprep.subr.bf16.mxu0 %v938_v8  ;;  %v945_v15 = vld [vmem:[%s1249_s1 + $0xa0] sm:$0xff]   ;;  %v949_v19 = vld [vmem:[%s1249_s1 + $0x98] sm:$0xff]   ;;  %v953_v23 = vld [vmem:[%s1249_s1 + $0x90] sm:$0xff]  }
   0x9   :  { %853 = vmatpush3.bf16.msra.mxu1 %v937_v7  ;;  %v954_v24 = vld [vmem:[%s1249_s1 + $0x48] sm:$0xff]   ;;  %v958_v28 = vld [vmem:[%s1249_s1 + $0x40] sm:$0xff]   ;;  %v965_v34 = vld [vmem:[%s1249_s1 + $0x178] sm:$0xff]  }
   0xa   :  { %854 = vmatprep.subr.bf16.mxu1 %v940_v10  ;;  %v955_v25 = vld [vmem:[%s1249_s1 + $0x8] sm:$0xff]   ;;  %v959_v29 = vld [vmem:[%s1249_s1] sm:$0xff]   ;;  %v969_v37 = vld [vmem:[%s1249_s1 + $0x138] sm:$0xff]  }
   0xb   :  { %827 = vmatpush3.bf16.msra.mxu0 %v939_v9  ;;  %v956_v26 = vld [vmem:[%s1249_s1 + $0xc8] sm:$0xff]   ;;  %v960_v30 = vld [vmem:[%s1249_s1 + $0xc0] sm:$0xff]   ;;  %v970_v38 = vld [vmem:[%s1249_s1 + $0x170] sm:$0xff]  }
   0xc   :  { %828 = vmatprep.subr.bf16.mxu0 %v942_v12  ;;  %v957_v27 = vld [vmem:[%s1249_s1 + $0x88] sm:$0xff]   ;;  %v961_v31 = vld [vmem:[%s1250_s0] ss:$28 sps:$4 sm:$0xff]   ;;  %v971_v39 = vld [vmem:[%s1249_s1 + $0x130] sm:$0xff]  }
   0xd   :  { %855 = vmatpush3.bf16.msra.mxu1 %v941_v11  ;;  %v963_v32 = vld [vmem:[%s1250_s0 + $0x4] ss:$28 sps:$4 sm:$0xff]   ;;  %v968_v36 = vld [vmem:[%s1250_s0 + $0xc] ss:$28 sps:$4 sm:$0xff]   ;;  %v979_v46 = vld [vmem:[%s1250_s0 + $0x3c] ss:$28 sps:$4 sm:$0xff]  }
   0xe   :  { %856 = vmatprep.subr.bf16.mxu1 %v944_v14  ;;  %v964_v33 = vld [vmem:[%s1249_s1 + $0x80] sm:$0xff]   ;;  %579 = vmatprep.mubr.bf16.mxu0 %v963_v32  ;;  %v972_v40 = vld [vmem:[%s1249_s1 + $0x168] sm:$0xff]   ;;  %v977_v47 = vld [vmem:[%s1249_s1 + $0x158] sm:$0xff]  }
   0xf   :  { %829 = vmatpush3.bf16.msra.mxu0 %v943_v13  ;;  %v966_v35 = vld [vmem:[%s1250_s0 + $0x8] ss:$28 sps:$4 sm:$0xff]   ;;  %628 = vmatprep.mubr.bf16.mxu1 %v968_v36  ;;  %v982_v48 = vld [vmem:[%s1250_s0 + $0x38] ss:$28 sps:$4 sm:$0xff]   ;;  %v985_v51 = vld [vmem:[%s1250_s0 + $0x40] ss:$28 sps:$4 sm:$0xff]  }
  0x10   :  { %830 = vmatprep.subr.bf16.mxu0 %v946_v16  ;;  %v973_v41 = vld [vmem:[%s1249_s1 + $0x128] sm:$0xff]   ;;  %v974_v43 = vld [vmem:[%s1249_s1 + $0x160] sm:$0xff]   ;;  %v981_v49 = vld [vmem:[%s1249_s1 + $0x118] sm:$0xff]  }
  0x11   :  { %857 = vmatpush3.bf16.msra.mxu1 %v945_v15  ;;  %v975_v42 = vld [vmem:[%s1249_s1 + $0x1a8] sm:$0xff]   ;;  %v976_v44 = vld [vmem:[%s1249_s1 + $0x120] sm:$0xff]   ;;  %v986_v52 = vld [vmem:[%s1249_s1 + $0x150] sm:$0xff]  }
  0x12   :  { %858 = vmatprep.subr.bf16.mxu1 %v948_v18  ;;  %v978_v45 = vld [vmem:[%s1249_s1 + $0x1a0] sm:$0xff]   ;;  %v987_v53 = vld [vmem:[%s1249_s1 + $0x198] sm:$0xff]   ;;  %v988_v54 = vld [vmem:[%s1249_s1 + $0x110] sm:$0xff]  }
  0x13   :  { %831 = vmatpush3.bf16.msra.mxu0 %v947_v17  ;;  %v983_v50 = vld [vmem:[%s1250_s0 + $0x44] ss:$28 sps:$4 sm:$0xff]   ;;  %v990_v55 = vld [vmem:[%s1249_s1 + $0x190] sm:$0xff]   ;;  %v989_v56 = vld [vmem:[%s1249_s1 + $0x148] sm:$0xff]  }
  0x14   :  { %832 = vmatprep.subr.bf16.mxu0 %v950_v20  ;;  %v993_v57 = vld [vmem:[%s1249_s1 + $0x188] sm:$0xff]   ;;  %v992_v59 = vld [vmem:[%s1249_s1 + $0x140] sm:$0xff]   ;;  %v997_v60 = vld [vmem:[%s1250_s0 + $0x14] ss:$28 sps:$4 sm:$0xff]  }
  0x15   :  { %859 = vmatpush3.bf16.msra.mxu1 %v949_v19  ;;  %v991_v58 = vld [vmem:[%s1249_s1 + $0x108] sm:$0xff]   ;;  %v998_v61 = vld [vmem:[%s1249_s1 + $0x180] sm:$0xff]   ;;  %v999_v62 = vld [vmem:[%s1250_s0 + $0x18] ss:$28 sps:$4 sm:$0xff]  }
  0x16   :  { %860 = vmatprep.subr.bf16.mxu1 %v952_v22  ;;  %v994_v63 = vld [vmem:[%s1249_s1 + $0x100] sm:$0xff]   ;;  %v995_v0 = vld [vmem:[%s1250_s0 + $0x10] ss:$28 sps:$4 sm:$0xff]  }
  0x17   :  { %833 = vmatpush3.bf16.msra.mxu0 %v951_v21  ;;  %v1000_v1 = vld [vmem:[%s1250_s0 + $0x50] ss:$28 sps:$4 sm:$0xff]   ;;  %v1003_v3 = vld [vmem:[%s1250_s0 + $0x48] ss:$28 sps:$4 sm:$0xff]   ;;  %v751_v19 = vld [vmem:[%s1251_s2] ss:$0 sm:$0xff] }
  0x18   :  { %834 = vmatprep.subr.bf16.mxu0 %v954_v24  ;;  %v1001_v2 = vld [vmem:[%s1250_s0 + $0x4c] ss:$28 sps:$4 sm:$0xff]  }
  0x19   :  { %861 = vmatpush3.bf16.msra.mxu1 %v953_v23 }
  0x1a   :  { %862 = vmatprep.subr.bf16.mxu1 %v956_v26 }
  0x1b   :  { %835 = vmatpush3.bf16.msra.mxu0 %v955_v25 }
  0x1c   :  { %836 = vmatprep.subr.bf16.mxu0 %v958_v28 }
  0x1d   :  { %863 = vmatpush3.bf16.msra.mxu1 %v957_v27 }
  0x1e   :  { %864 = vmatprep.subr.bf16.mxu1 %v960_v30 }
  0x1f   :  { %837 = vmatpush3.bf16.msra.mxu0 %v959_v29 }
  0x20   :  { %878 = vmatprep.subr.bf16.mxu0 %v965_v34 }
  0x21   :  { %865 = vmatpush3.bf16.msra.mxu1 %v964_v33 }
  0x22   :  { %580 = vmatmul.mubr.bf16.vlgmr.msra.gmra.mxu0 %v961_v31  ;;  %914 = vmatprep.subr.bf16.mxu1 %v975_v42 }
  0x23   :  { %879 = vmatpush3.bf16.msra.mxu0 %v969_v37  ;;  %587 = vmatprep.mubr.bf16.mxu0 %v979_v46 }
  0x24   :  { %629 = vmatmul.mubr.bf16.vlgmr.msra.gmra.mxu1 %v966_v35  ;;  %880 = vmatprep.subr.bf16.mxu0 %v970_v38 }
  0x25   :  { %915 = vmatpush3.bf16.msra.mxu1 %v975_v42  ;;  %636 = vmatprep.mubr.bf16.mxu1 %v983_v50 }
  0x26   :  { %916 = vmatprep.subr.bf16.mxu1 %v978_v45 }
  0x27   :  { %881 = vmatpush3.bf16.msra.mxu0 %v971_v39 }
  0x28   :  { %882 = vmatprep.subr.bf16.mxu0 %v972_v40 }
  0x29   :  { %917 = vmatpush3.bf16.msra.mxu1 %v978_v45 }
  0x2a   :  { %588 = vmatmul.mubr.bf16.gmra.mxu0 %v982_v48  ;;  %918 = vmatprep.subr.bf16.mxu1 %v987_v53 }
  0x2b   :  { %883 = vmatpush3.bf16.msra.mxu0 %v973_v41  ;;  %677 = vmatprep.mubr.bf16.mxu0 %v997_v60 }
  0x2c   :  { %884 = vmatprep.subr.bf16.mxu0 %v974_v43  ;;  %637 = vmatmul.mubr.bf16.gmra.mxu1 %v985_v51 }
  0x2d   :  { %919 = vmatpush3.bf16.msra.mxu1 %v987_v53  ;;  %926 = vmatprep.mubr.msk.bf16.mxu1 %vm540_vm0, %v999_v62 }
  0x2e   :  { %920 = vmatprep.subr.bf16.mxu1 %v990_v55 }
  0x2f   :  { %885 = vmatpush3.bf16.msra.mxu0 %v976_v44 }
  0x30   :  { %886 = vmatprep.subr.bf16.mxu0 %v977_v47 }
  0x31   :  { %921 = vmatpush3.bf16.msra.mxu1 %v990_v55 }
  0x32   :  { %922 = vmatprep.subr.bf16.mxu1 %v993_v57 }
  0x33   :  { %887 = vmatpush3.bf16.msra.mxu0 %v981_v49 }
  0x34   :  { %888 = vmatprep.subr.bf16.mxu0 %v986_v52 }
  0x35   :  { %923 = vmatpush3.bf16.msra.mxu1 %v993_v57 }
  0x36   :  { %924 = vmatprep.subr.bf16.mxu1 %v998_v61 }
  0x37   :  { %889 = vmatpush3.bf16.msra.mxu0 %v988_v54 }
  0x38   :  { %890 = vmatprep.subr.bf16.mxu0 %v989_v56 }
  0x39   :  { %925 = vmatpush3.bf16.msra.mxu1 %v998_v61 }
  0x3b   :  { %891 = vmatpush3.bf16.msra.mxu0 %v991_v58 }
  0x3c   :  { %892 = vmatprep.subr.bf16.mxu0 %v992_v59  ;;  %927 = vmatmul.mubr.msk.bf16.vlgmr.msra.gmra.mxu1 %vm540_vm0, %v1000_v1 }
  0x3f   :  { %893 = vmatpush3.bf16.msra.mxu0 %v994_v63 }
  0x42   :  { %678 = vmatmul.mubr.bf16.vlgmr.msra.gmra.mxu0 %v995_v0 }
  0x43   :  { %685 = vmatprep.mubr.bf16.mxu0 %v1001_v2 }
  0x4a   :  { %686 = vmatmul.mubr.bf16.gmra.mxu0 %v1003_v3 }
  0xe2   :  { %v838_v4 = vpop.f32.mrf.mxu0 }
  0xe4   :  { %v866_v5 = vpop.f32.mrf.mxu1  ;;  %v839_v6 = vpop.f32.mrf.mxu0 }
  0xe5   :  { %v840_v18 = vadd.f32 %v839_v6, %v838_v4 }
  0xe6   :  { %v867_v7 = vpop.f32.mrf.mxu1  ;;  %v841_v8 = vpop.f32.mrf.mxu0 }
  0xe7   :  { %v582_v22 = vadd.f32 %v840_v18, %v751_v19  ;;  %v868_v23 = vadd.f32 %v867_v7, %v866_v5 }
  0xe8   :  { %v869_v9 = vpop.f32.mrf.mxu1  ;;  %v842_v10 = vpop.f32.mrf.mxu0 }
  0xe9   :  { %v843_v24 = vadd.f32 %v842_v10, %v841_v8  ;;  %v631_v30 = vadd.f32 %v868_v23, %v582_v22 }
  0xea   :  { %v870_v11 = vpop.f32.mrf.mxu1  ;;  %v844_v12 = vpop.f32.mrf.mxu0 }
  0xeb   :  { %v585_v31 = vadd.f32 %v843_v24, %v751_v19  ;;  %v871_v32 = vadd.f32 %v870_v11, %v869_v9 }
  0xec   :  { %v872_v13 = vpop.f32.mrf.mxu1  ;;  %v845_v14 = vpop.f32.mrf.mxu0 }
  0xed   :  { %v846_v27 = vadd.f32 %v845_v14, %v844_v12  ;;  %v634_v40 = vadd.f32 %v871_v32, %v585_v31 }
  0xee   :  { %v873_v15 = vpop.f32.mrf.mxu1  ;;  %v847_v16 = vpop.f32.mrf.mxu0 }
  0xef   :  { %v590_v37 = vadd.f32 %v846_v27, %v751_v19  ;;  %v874_v38 = vadd.f32 %v873_v15, %v872_v13 }
  0xf0   :  { %v875_v17 = vpop.f32.mrf.mxu1  ;;  %v848_v20 = vpop.f32.mrf.mxu0 }
  0xf1   :  { %v849_v41 = vadd.f32 %v848_v20, %v847_v16  ;;  %v639_v47 = vadd.f32 %v874_v38, %v590_v37 }
  0xf2   :  { %v876_v21 = vpop.f32.mrf.mxu1 }
  0xf3   :  { %v593_v49 = vadd.f32 %v849_v41, %v751_v19  ;;  %v877_v50 = vadd.f32 %v876_v21, %v875_v17 }
  0xf5   :  { %v642_v56 = vadd.f32 %v877_v50, %v593_v49 }
  0xfc   :  { %v928_v26 = vpop.f32.mrf.mxu1 }
  0xfe   :  { %v728_v29 = vpop.f32.mrf.mxu1 }
 0x100   :  { %v929_v35 = vpop.f32.mrf.mxu1 }
 0x102   :  { %v894_v25 = vpop.f32.mrf.mxu0  ;;  %v731_v45 = vpop.f32.mrf.mxu1 }
 0x104   :  { %v895_v28 = vpop.f32.mrf.mxu0 }
 0x105   :  { %v896_v33 = vadd.f32 %v895_v28, %v894_v25 }
 0x106   :  { %v897_v34 = vpop.f32.mrf.mxu0 }
 0x107   :  { %v680_v36 = vadd.f32 %v896_v33, %v631_v30 }
 0x108   :  { %v898_v39 = vpop.f32.mrf.mxu0 }
 0x109   :  { %v899_v42 = vadd.f32 %v898_v39, %v897_v34  ;;  %v729_v43 = vadd.f32 %v728_v29, %v680_v36 }
 0x10a   :  { %v900_v44 = vpop.f32.mrf.mxu0 }
 0x10b   :  { %743 = vst.msk [vmem:[%s1252_s3] sm:$0xff] %vm540_vm0, %v729_v43  ;;  %v683_v46 = vadd.f32 %v899_v42, %v634_v40 }
 0x10c   :  { %v901_v48 = vpop.f32.mrf.mxu0 }
 0x10d   :  { %v902_v51 = vadd.f32 %v901_v48, %v900_v44  ;;  %v732_v52 = vadd.f32 %v731_v45, %v683_v46 }
 0x10e   :  { %v903_v53 = vpop.f32.mrf.mxu0 }
 0x10f   :  { %v688_v54 = vadd.f32 %v902_v51, %v639_v47  ;;  %744 = vst.msk [vmem:[%s1252_s3 + $0x8] sm:$0xff] %vm540_vm0, %v732_v52 }
 0x110   :  { %v904_v55 = vpop.f32.mrf.mxu0 }
 0x111   :  { %v737_v57 = vadd.f32 %v928_v26, %v688_v54  ;;  %v905_v58 = vadd.f32 %v904_v55, %v903_v53 }
 0x113   :  { %745 = vst.msk [vmem:[%s1252_s3 + $0x10] sm:$0xff] %vm540_vm0, %v737_v57  ;;  %v691_v59 = vadd.f32 %v905_v58, %v642_v56 }
 0x115   :  { %v740_v60 = vadd.f32 %v929_v35, %v691_v59 }
 0x117   :  { %746 = vst.msk [vmem:[%s1252_s3 + $0x18] sm:$0xff] %vm540_vm0, %v740_v60 }

// kernel: basic_encoder.47
= control target key start
LH: loop header
LB: loop body
LE: loop exit
PB: predicated region body
PF: predicated region fallthrough
CT: control target
= control target key end

     0   :  { %vm55_vm0 = vcmask 785408   ;;  %s133_s0 = inlined_call_operand.vmem [shape: f32[32,96], index: 0, kind: input, shape index: {}]   ;;  %s134_s1 = inlined_call_operand.vmem [shape: f32[32,96], index: 1, kind: input, shape index: {}]   ;;  %s135_s2 = inlined_call_operand.vmem [shape: f32[1,96], index: 2, kind: input, shape index: {}]   ;;  %s136_s3 = inlined_call_operand.vmem [shape: f32[1,96], index: 3, kind: input, shape index: {}]   ;;  %s137_s4 = inlined_call_operand.vmem [shape: f32[32,96], index: 4, kind: output, shape index: {}]  }
   0x1   :  { %v17_v0 = vld [vmem:[%s134_s1] sm:$0xff]  ;;  %v18_v4 = vld [vmem:[%s134_s1 + $0x8] sm:$0xff]  ;;  %v19_v8 = vld [vmem:[%s134_s1 + $0x10] sm:$0xff] }
   0x2   :  { %v21_v1 = vld [vmem:[%s133_s0] sm:$0xff]  ;;  %v22_v5 = vld [vmem:[%s133_s0 + $0x8] sm:$0xff]  ;;  %v23_v9 = vld [vmem:[%s133_s0 + $0x10] sm:$0xff] }
   0x3   :  { %v64_v2 = vld [vmem:[%s135_s2] ss:$0 sm:$0xff]  ;;  %v20_v12 = vld [vmem:[%s134_s1 + $0x18] sm:$0xff] }
   0x4   :  { %v32_v3 = vmul.f32 %v64_v2, %v21_v1  ;;  %v65_v6 = vld [vmem:[%s136_s3] ss:$0 sm:$0xff]  ;;  %v33_v7 = vmul.f32 %v64_v2, %v22_v5  ;;  %v34_v11 = vmul.f32 %v64_v2, %v23_v9  ;;  %v24_v13 = vld [vmem:[%s133_s0 + $0x18] sm:$0xff] }
   0x5   :  { %v35_v15 = vmul.f32 %v64_v2, %v24_v13 }
   0x6   :  { %v36_v10 = vadd.f32 %v32_v3, %v17_v0  ;;  %v37_v14 = vadd.f32 %v33_v7, %v18_v4  ;;  %v38_v17 = vadd.f32 %v34_v11, %v19_v8 }
   0x7   :  { %v39_v19 = vadd.f32 %v35_v15, %v20_v12 }
   0x8   :  { %v47_v16 = vadd.f32 %v65_v6, %v36_v10  ;;  %v48_v18 = vadd.f32 %v65_v6, %v37_v14  ;;  %v49_v21 = vadd.f32 %v65_v6, %v38_v17 }
   0x9   :  { %v50_v23 = vadd.f32 %v65_v6, %v39_v19 }
   0xa   :  { %v51_v20 = vmax.f32 %v47_v16, 0.0  ;;  %v52_v22 = vmax.f32 %v48_v18, 0.0  ;;  %v53_v24 = vmax.f32 %v49_v21, 0.0 }
   0xb   :  { %v54_v25 = vmax.f32 %v50_v23, 0.0 }
   0xc   :  { %56 = vst.msk [vmem:[%s137_s4] sm:$0xff] %vm55_vm0, %v51_v20  ;;  %57 = vst.msk [vmem:[%s137_s4 + $0x8] sm:$0xff] %vm55_vm0, %v52_v22 }
   0xd   :  { %58 = vst.msk [vmem:[%s137_s4 + $0x10] sm:$0xff] %vm55_vm0, %v53_v24  ;;  %59 = vst.msk [vmem:[%s137_s4 + $0x18] sm:$0xff] %vm55_vm0, %v54_v25 }

// kernel: basic_encoder.51
= control target key start
LH: loop header
LB: loop body
LE: loop exit
PB: predicated region body
PF: predicated region fallthrough
CT: control target
= control target key end

     0   :  { %v159_v0 = vmov 0.0   ;;  %vm160_vm0 = vmmov 0   ;;  %vm71_vm1 = vcmask 785408   ;;  %s208_s1 = inlined_call_operand.vmem [shape: bf16[96,128], index: 1, kind: input, shape index: {}]   ;;  %s209_s0 = inlined_call_operand.vmem [shape: bf16[8,96], index: 0, kind: input, shape index: {}]   ;;  %s210_s2 = inlined_call_operand.vmem [shape: f32[1,128], index: 2, kind: input, shape index: {}]   ;;  %s211_s3 = inlined_call_operand.vmem [shape: f32[8,128], index: 3, kind: output, shape index: {}]  }
   0x1   :  { %135 = vmatprep.subr.bf16.mxu0 %v159_v0  ;;  %v153_v1 = vld [vmem:[%s208_s1 + $0x28] sm:$0xff]   ;;  %147 = vmatprep.mubr.msk.bf16.mxu0 %vm160_vm0, %v159_v0  ;;  %v154_v2 = vld [vmem:[%s208_s1 + $0x20] sm:$0xff]   ;;  %v155_v3 = vld [vmem:[%s208_s1 + $0x18] sm:$0xff]  }
   0x2   :  { %136 = vmatpush3.bf16.msra.mxu0 %v153_v1  ;;  %v156_v4 = vld [vmem:[%s208_s1 + $0x10] sm:$0xff]   ;;  %v157_v5 = vld [vmem:[%s208_s1 + $0x8] sm:$0xff]   ;;  %v158_v6 = vld [vmem:[%s208_s1] sm:$0xff]  }
   0x3   :  { %137 = vmatprep.subr.bf16.mxu0 %v159_v0  ;;  %v15_v7 = vld [vmem:[%s209_s0] sm:$0xf] }
   0x4   :  { %v120_v8 = vld [vmem:[%s210_s2] ss:$0 sm:$0xff] }
   0x6   :  { %138 = vmatpush3.bf16.msra.mxu0 %v154_v2 }
   0x7   :  { %139 = vmatprep.subr.bf16.mxu0 %v159_v0 }
   0xa   :  { %140 = vmatpush3.bf16.msra.mxu0 %v155_v3 }
   0xb   :  { %141 = vmatprep.subr.bf16.mxu0 %v159_v0 }
   0xe   :  { %142 = vmatpush3.bf16.msra.mxu0 %v156_v4 }
   0xf   :  { %143 = vmatprep.subr.bf16.mxu0 %v159_v0 }
  0x12   :  { %144 = vmatpush3.bf16.msra.mxu0 %v157_v5 }
  0x13   :  { %145 = vmatprep.subr.bf16.mxu0 %v159_v0 }
  0x16   :  { %146 = vmatpush3.bf16.msra.mxu0 %v158_v6 }
  0x19   :  { %148 = vmatmul.mubr.msk.bf16.vlgmr.msra.gmra.mxu0 %vm71_vm1, %v15_v7 }
  0xd9   :  { %v109_v9 = vpop.f32.mrf.mxu0 }
  0xda   :  { %v110_v10 = vadd.f32 %v120_v8, %v109_v9 }
  0xdb   :  { %v149_v11 = vpop.f32.mrf.mxu0 }
  0xdc   :  { %115 = vst [vmem:[%s211_s3] sm:$0xff] %v110_v10 }
  0xdd   :  { %v112_v12 = vpop.f32.mrf.mxu0 }
  0xdf   :  { %v150_v13 = vpop.f32.mrf.mxu0 }

// kernel: basic_encoder.49
= control target key start
LH: loop header
LB: loop body
LE: loop exit
PB: predicated region body
PF: predicated region fallthrough
CT: control target
= control target key end

     0   :  { %s71_s0 = inlined_call_operand.vmem [shape: f32[8,128], index: 0, kind: input, shape index: {}]   ;;  %s72_s1 = inlined_call_operand.vmem [shape: f32[1,128], index: 1, kind: input, shape index: {}]   ;;  %s73_s2 = inlined_call_operand.vmem [shape: f32[1,128], index: 2, kind: input, shape index: {}]   ;;  %s74_s3 = inlined_call_operand.vmem [shape: f32[8,128], index: 3, kind: output, shape index: {}]  }
   0x1   :  { %v14_v0 = vld [vmem:[%s71_s0] sm:$0xff] }
   0x2   :  { %v37_v1 = vld [vmem:[%s72_s1] ss:$0 sm:$0xff] }
   0x3   :  { %v38_v2 = vld [vmem:[%s73_s2] ss:$0 sm:$0xff]  ;;  %v22_v3 = vmul.f32 %v37_v1, %v14_v0 }
   0x5   :  { %v30_v4 = vadd.f32 %v38_v2, %v22_v3 }
   0x7   :  { %v31_v5 = vmax.f32 %v30_v4, 0.0 }
   0x9   :  { %32 = vst [vmem:[%s74_s3] sm:$0xff] %v31_v5 }

// kernel: basic_encoder.48
= control target key start
LH: loop header
LB: loop body
LE: loop exit
PB: predicated region body
PF: predicated region fallthrough
CT: control target
= control target key end

     0   :  { %v866_v41 = vmov 0.0   ;;  %vm867_vm0 = vmmov 0   ;;  %vm482_vm1 = vcmask 785408   ;;  %s1068_s1 = inlined_call_operand.vmem [shape: bf16[864,128], index: 1, kind: input, shape index: {}]   ;;  %s1069_s0 = inlined_call_operand.vmem [shape: bf16[8,864], index: 0, kind: input, shape index: {}]   ;;  %s1070_s2 = inlined_call_operand.vmem [shape: f32[1,128], index: 2, kind: input, shape index: {}]   ;;  %s1071_s3 = inlined_call_operand.vmem [shape: f32[8,128], index: 3, kind: output, shape index: {}]  }
   0x1   :  { %v805_v0 = vld [vmem:[%s1068_s1 + $0x78] sm:$0xff]   ;;  %v809_v4 = vld [vmem:[%s1068_s1 + $0x70] sm:$0xff]   ;;  %v813_v8 = vld [vmem:[%s1068_s1 + $0x68] sm:$0xff]  }
   0x2   :  { %v806_v1 = vld [vmem:[%s1068_s1 + $0x38] sm:$0xff]   ;;  %714 = vmatprep.subr.bf16.mxu0 %v805_v0  ;;  %v810_v5 = vld [vmem:[%s1068_s1 + $0x30] sm:$0xff]   ;;  %v814_v9 = vld [vmem:[%s1068_s1 + $0x28] sm:$0xff]  }
   0x3   :  { %v807_v2 = vld [vmem:[%s1068_s1 + $0xf8] sm:$0xff]   ;;  %715 = vmatpush3.bf16.msra.mxu0 %v806_v1  ;;  %v811_v6 = vld [vmem:[%s1068_s1 + $0xf0] sm:$0xff]   ;;  %v815_v10 = vld [vmem:[%s1068_s1 + $0xe8] sm:$0xff]  }
   0x4   :  { %v808_v3 = vld [vmem:[%s1068_s1 + $0xb8] sm:$0xff]   ;;  %736 = vmatprep.subr.bf16.mxu1 %v807_v2  ;;  %716 = vmatprep.subr.bf16.mxu0 %v809_v4  ;;  %v812_v7 = vld [vmem:[%s1068_s1 + $0xb0] sm:$0xff]   ;;  %v816_v11 = vld [vmem:[%s1068_s1 + $0xa8] sm:$0xff]  }
   0x5   :  { %737 = vmatpush3.bf16.msra.mxu1 %v808_v3  ;;  %v817_v12 = vld [vmem:[%s1068_s1 + $0x60] sm:$0xff]   ;;  %v821_v16 = vld [vmem:[%s1068_s1 + $0x58] sm:$0xff]   ;;  %v825_v20 = vld [vmem:[%s1068_s1 + $0x50] sm:$0xff]  }
   0x6   :  { %738 = vmatprep.subr.bf16.mxu1 %v811_v6  ;;  %v818_v13 = vld [vmem:[%s1068_s1 + $0x20] sm:$0xff]   ;;  %v822_v17 = vld [vmem:[%s1068_s1 + $0x18] sm:$0xff]   ;;  %v826_v21 = vld [vmem:[%s1068_s1 + $0x10] sm:$0xff]  }
   0x7   :  { %717 = vmatpush3.bf16.msra.mxu0 %v810_v5  ;;  %v819_v14 = vld [vmem:[%s1068_s1 + $0xe0] sm:$0xff]   ;;  %v823_v18 = vld [vmem:[%s1068_s1 + $0xd8] sm:$0xff]   ;;  %v827_v22 = vld [vmem:[%s1068_s1 + $0xd0] sm:$0xff]  }
   0x8   :  { %718 = vmatprep.subr.bf16.mxu0 %v813_v8  ;;  %v820_v15 = vld [vmem:[%s1068_s1 + $0xa0] sm:$0xff]   ;;  %v824_v19 = vld [vmem:[%s1068_s1 + $0x98] sm:$0xff]   ;;  %v828_v23 = vld [vmem:[%s1068_s1 + $0x90] sm:$0xff]  }
   0x9   :  { %739 = vmatpush3.bf16.msra.mxu1 %v812_v7  ;;  %v829_v24 = vld [vmem:[%s1068_s1 + $0x48] sm:$0xff]   ;;  %v833_v28 = vld [vmem:[%s1068_s1 + $0x40] sm:$0xff]   ;;  %v840_v35 = vld [vmem:[%s1068_s1 + $0x178] sm:$0xff]  }
   0xa   :  { %740 = vmatprep.subr.bf16.mxu1 %v815_v10  ;;  %v830_v25 = vld [vmem:[%s1068_s1 + $0x8] sm:$0xff]   ;;  %v834_v29 = vld [vmem:[%s1068_s1] sm:$0xff]   ;;  %v843_v39 = vld [vmem:[%s1068_s1 + $0x138] sm:$0xff]  }
   0xb   :  { %719 = vmatpush3.bf16.msra.mxu0 %v814_v9  ;;  %v831_v26 = vld [vmem:[%s1068_s1 + $0xc8] sm:$0xff]   ;;  %v835_v30 = vld [vmem:[%s1068_s1 + $0xc0] sm:$0xff]   ;;  %v844_v40 = vld [vmem:[%s1068_s1 + $0x170] sm:$0xff]  }
   0xc   :  { %720 = vmatprep.subr.bf16.mxu0 %v817_v12  ;;  %v832_v27 = vld [vmem:[%s1068_s1 + $0x88] sm:$0xff]   ;;  %v15_v31 = vld [vmem:[%s1069_s0] sm:$0xff]  ;;  %v845_v42 = vld [vmem:[%s1068_s1 + $0x130] sm:$0xff]  }
   0xd   :  { %741 = vmatpush3.bf16.msra.mxu1 %v816_v11  ;;  %v652_v32 = vcombine.low %v15_v31, %v15_v31  ;;  %v653_v33 = vcombine.high %v15_v31, %v15_v31  ;;  %v839_v34 = vld [vmem:[%s1068_s1 + $0x80] sm:$0xff]   ;;  %v16_v36 = vld [vmem:[%s1069_s0 + $0x8] sm:$0xff]  ;;  %v852_v48 = vld [vmem:[%s1068_s1 + $0x198] sm:$0xff]  }
   0xe   :  { %742 = vmatprep.subr.bf16.mxu1 %v819_v14  ;;  %v654_v37 = vcombine.low %v16_v36, %v16_v36  ;;  %v655_v38 = vcombine.high %v16_v36, %v16_v36  ;;  %v846_v43 = vld [vmem:[%s1068_s1 + $0x1a8] sm:$0xff]   ;;  %v849_v46 = vld [vmem:[%s1068_s1 + $0x1a0] sm:$0xff]   ;;  %v853_v50 = vld [vmem:[%s1068_s1 + $0x158] sm:$0xff]  }
   0xf   :  { %721 = vmatpush3.bf16.msra.mxu0 %v818_v13  ;;  %518 = vmatprep.mubr.bf16.mxu0 %v653_v33  ;;  %v847_v44 = vld [vmem:[%s1068_s1 + $0x168] sm:$0xff]   ;;  %v850_v47 = vld [vmem:[%s1068_s1 + $0x160] sm:$0xff]   ;;  %v855_v51 = vld [vmem:[%s1068_s1 + $0x190] sm:$0xff]  }
  0x10   :  { %722 = vmatprep.subr.bf16.mxu0 %v821_v16  ;;  %558 = vmatprep.mubr.bf16.mxu1 %v655_v38  ;;  %v848_v45 = vld [vmem:[%s1068_s1 + $0x128] sm:$0xff]   ;;  %v851_v49 = vld [vmem:[%s1068_s1 + $0x120] sm:$0xff]   ;;  %v854_v52 = vld [vmem:[%s1068_s1 + $0x118] sm:$0xff]  }
  0x11   :  { %743 = vmatpush3.bf16.msra.mxu1 %v820_v15  ;;  %v856_v53 = vld [vmem:[%s1068_s1 + $0x150] sm:$0xff]   ;;  %v858_v54 = vld [vmem:[%s1068_s1 + $0x188] sm:$0xff]   ;;  %v861_v58 = vld [vmem:[%s1068_s1 + $0x180] sm:$0xff]  }
  0x12   :  { %744 = vmatprep.subr.bf16.mxu1 %v823_v18  ;;  %v857_v55 = vld [vmem:[%s1068_s1 + $0x110] sm:$0xff]   ;;  %v859_v56 = vld [vmem:[%s1068_s1 + $0x148] sm:$0xff]   ;;  %v862_v61 = vld [vmem:[%s1068_s1 + $0x140] sm:$0xff]  }
  0x13   :  { %723 = vmatpush3.bf16.msra.mxu0 %v822_v17  ;;  %v17_v57 = vld [vmem:[%s1069_s0 + $0x10] sm:$0xff]  ;;  %v860_v60 = vld [vmem:[%s1068_s1 + $0x108] sm:$0xff]   ;;  %v838_v62 = vld [vmem:[%s1069_s0 + $0x18] ss:$0 sps:$4 sm:$0xff]  }
  0x14   :  { %724 = vmatprep.subr.bf16.mxu0 %v825_v20  ;;  %v657_v59 = vcombine.high %v17_v57, %v17_v57  ;;  %v863_v63 = vld [vmem:[%s1068_s1 + $0x100] sm:$0xff]   ;;  %v656_v0 = vcombine.low %v17_v57, %v17_v57 }
  0x15   :  { %745 = vmatpush3.bf16.msra.mxu1 %v824_v19  ;;  %v651_v11 = vld [vmem:[%s1070_s2] ss:$0 sm:$0xff] }
  0x16   :  { %746 = vmatprep.subr.bf16.mxu1 %v827_v22 }
  0x17   :  { %725 = vmatpush3.bf16.msra.mxu0 %v826_v21 }
  0x18   :  { %726 = vmatprep.subr.bf16.mxu0 %v829_v24 }
  0x19   :  { %747 = vmatpush3.bf16.msra.mxu1 %v828_v23 }
  0x1a   :  { %748 = vmatprep.subr.bf16.mxu1 %v831_v26 }
  0x1b   :  { %727 = vmatpush3.bf16.msra.mxu0 %v830_v25 }
  0x1c   :  { %728 = vmatprep.subr.bf16.mxu0 %v833_v28 }
  0x1d   :  { %749 = vmatpush3.bf16.msra.mxu1 %v832_v27 }
  0x1e   :  { %750 = vmatprep.subr.bf16.mxu1 %v835_v30 }
  0x1f   :  { %729 = vmatpush3.bf16.msra.mxu0 %v834_v29 }
  0x20   :  { %758 = vmatprep.subr.bf16.mxu0 %v840_v35 }
  0x21   :  { %751 = vmatpush3.bf16.msra.mxu1 %v839_v34 }
  0x22   :  { %519 = vmatmul.mubr.bf16.vlgmr.msra.gmra.mxu0 %v652_v32  ;;  %787 = vmatprep.subr.bf16.mxu1 %v866_v41 }
  0x23   :  { %759 = vmatpush3.bf16.msra.mxu0 %v843_v39  ;;  %598 = vmatprep.mubr.bf16.mxu0 %v657_v59 }
  0x24   :  { %559 = vmatmul.mubr.bf16.vlgmr.msra.gmra.mxu1 %v654_v37  ;;  %760 = vmatprep.subr.bf16.mxu0 %v844_v40 }
  0x25   :  { %799 = vmatprep.mubr.msk.bf16.mxu1 %vm867_vm0, %v866_v41  ;;  %788 = vmatpush3.bf16.msra.mxu1 %v846_v43 }
  0x26   :  { %789 = vmatprep.subr.bf16.mxu1 %v866_v41 }
  0x27   :  { %761 = vmatpush3.bf16.msra.mxu0 %v845_v42 }
  0x28   :  { %762 = vmatprep.subr.bf16.mxu0 %v847_v44 }
  0x29   :  { %790 = vmatpush3.bf16.msra.mxu1 %v849_v46 }
  0x2a   :  { %791 = vmatprep.subr.bf16.mxu1 %v866_v41 }
  0x2b   :  { %763 = vmatpush3.bf16.msra.mxu0 %v848_v45 }
  0x2c   :  { %764 = vmatprep.subr.bf16.mxu0 %v850_v47 }
  0x2d   :  { %792 = vmatpush3.bf16.msra.mxu1 %v852_v48 }
  0x2e   :  { %793 = vmatprep.subr.bf16.mxu1 %v866_v41 }
  0x2f   :  { %765 = vmatpush3.bf16.msra.mxu0 %v851_v49 }
  0x30   :  { %766 = vmatprep.subr.bf16.mxu0 %v853_v50 }
  0x31   :  { %794 = vmatpush3.bf16.msra.mxu1 %v855_v51 }
  0x32   :  { %795 = vmatprep.subr.bf16.mxu1 %v866_v41 }
  0x33   :  { %767 = vmatpush3.bf16.msra.mxu0 %v854_v52 }
  0x34   :  { %768 = vmatprep.subr.bf16.mxu0 %v856_v53 }
  0x35   :  { %796 = vmatpush3.bf16.msra.mxu1 %v858_v54 }
  0x36   :  { %797 = vmatprep.subr.bf16.mxu1 %v866_v41 }
  0x37   :  { %769 = vmatpush3.bf16.msra.mxu0 %v857_v55 }
  0x38   :  { %770 = vmatprep.subr.bf16.mxu0 %v859_v56 }
  0x39   :  { %798 = vmatpush3.bf16.msra.mxu1 %v861_v58 }
  0x3b   :  { %771 = vmatpush3.bf16.msra.mxu0 %v860_v60 }
  0x3c   :  { %772 = vmatprep.subr.bf16.mxu0 %v862_v61  ;;  %800 = vmatmul.mubr.msk.bf16.vlgmr.msra.gmra.mxu1 %vm482_vm1, %v838_v62 }
  0x3f   :  { %773 = vmatpush3.bf16.msra.mxu0 %v863_v63 }
  0x42   :  { %599 = vmatmul.mubr.bf16.vlgmr.msra.gmra.mxu0 %v656_v0 }
  0xe2   :  { %v730_v1 = vpop.f32.mrf.mxu0 }
  0xe4   :  { %v731_v2 = vpop.f32.mrf.mxu0  ;;  %v752_v3 = vpop.f32.mrf.mxu1 }
  0xe5   :  { %v732_v9 = vadd.f32 %v731_v2, %v730_v1 }
  0xe6   :  { %v733_v4 = vpop.f32.mrf.mxu0  ;;  %v753_v5 = vpop.f32.mrf.mxu1 }
  0xe7   :  { %v521_v13 = vadd.f32 %v732_v9, %v651_v11  ;;  %v754_v14 = vadd.f32 %v753_v5, %v752_v3 }
  0xe8   :  { %v734_v6 = vpop.f32.mrf.mxu0  ;;  %v755_v7 = vpop.f32.mrf.mxu1 }
  0xe9   :  { %v561_v19 = vadd.f32 %v754_v14, %v521_v13 }
  0xea   :  { %v756_v8 = vpop.f32.mrf.mxu1 }
  0xfc   :  { %v640_v10 = vpop.f32.mrf.mxu1 }
  0xfe   :  { %v801_v12 = vpop.f32.mrf.mxu1 }
 0x100   :  { %v643_v15 = vpop.f32.mrf.mxu1 }
 0x102   :  { %v774_v16 = vpop.f32.mrf.mxu0  ;;  %v802_v17 = vpop.f32.mrf.mxu1 }
 0x104   :  { %v775_v18 = vpop.f32.mrf.mxu0 }
 0x105   :  { %v776_v20 = vadd.f32 %v775_v18, %v774_v16 }
 0x106   :  { %v777_v21 = vpop.f32.mrf.mxu0 }
 0x107   :  { %v601_v22 = vadd.f32 %v776_v20, %v561_v19 }
 0x108   :  { %v778_v23 = vpop.f32.mrf.mxu0 }
 0x109   :  { %v641_v24 = vadd.f32 %v640_v10, %v601_v22 }
 0x10b   :  { %646 = vst [vmem:[%s1071_s3] sm:$0xff] %v641_v24 }

// kernel: basic_encoder.52
= control target key start
LH: loop header
LB: loop body
LE: loop exit
PB: predicated region body
PF: predicated region fallthrough
CT: control target
= control target key end

     0   :  { %s124_s0 = inlined_call_operand.vmem [shape: f32[8,128], index: 0, kind: input, shape index: {}]   ;;  %s125_s1 = inlined_call_operand.vmem [shape: f32[8,128], index: 1, kind: input, shape index: {}]   ;;  %s126_s2 = inlined_call_operand.vmem [shape: f32[1,128], index: 2, kind: input, shape index: {}]   ;;  %s127_s4 = inlined_call_operand.vmem [shape: f32[1,128], index: 4, kind: input, shape index: {}]   ;;  %s128_s5 = inlined_call_operand.vmem [shape: f32[1,128], index: 5, kind: input, shape index: {}]   ;;  %s129_s3 = inlined_call_operand.vmem [shape: f32[1,128], index: 3, kind: input, shape index: {}]   ;;  %s130_s6 = inlined_call_operand.vmem [shape: f32[8,128], index: 6, kind: output, shape index: {}]  }
   0x1   :  { %v23_v0 = vld [vmem:[%s125_s1] sm:$0xff] }
   0x2   :  { %v64_v1 = vld [vmem:[%s127_s4] ss:$0 sm:$0xff] }
   0x3   :  { %v65_v2 = vld [vmem:[%s128_s5] ss:$0 sm:$0xff]  ;;  %v31_v3 = vmul.f32 %v64_v1, %v23_v0 }
   0x4   :  { %v40_v4 = vld [vmem:[%s124_s0] sm:$0xff] }
   0x5   :  { %v66_v5 = vld [vmem:[%s126_s2] ss:$0 sm:$0xff]  ;;  %v39_v7 = vadd.f32 %v65_v2, %v31_v3 }
   0x6   :  { %v48_v6 = vmul.f32 %v66_v5, %v40_v4  ;;  %v67_v8 = vld [vmem:[%s129_s3] ss:$0 sm:$0xff] }
   0x8   :  { %v49_v9 = vadd.f32 %v48_v6, %v39_v7 }
   0xa   :  { %v57_v10 = vadd.f32 %v67_v8, %v49_v9 }
   0xc   :  { %v58_v11 = vmax.f32 %v57_v10, 0.0 }
   0xe   :  { %59 = vst [vmem:[%s130_s6] sm:$0xff] %v58_v11 }

// kernel: basic_encoder.56
= control target key start
LH: loop header
LB: loop body
LE: loop exit
PB: predicated region body
PF: predicated region fallthrough
CT: control target
= control target key end

     0   :  { %s84_s0 = inlined_call_operand.vmem [shape: f32[8,128], index: 0, kind: input, shape index: {}]   ;;  %s85_s1 = inlined_call_operand.vmem [shape: f32[8,128], index: 1, kind: input, shape index: {}]   ;;  %s86_s2 = inlined_call_operand.vmem [shape: f32[1,128], index: 2, kind: input, shape index: {}]   ;;  %s87_s3 = inlined_call_operand.vmem [shape: f32[1,128], index: 3, kind: input, shape index: {}]   ;;  %s88_s4 = inlined_call_operand.vmem [shape: f32[8,128], index: 4, kind: output, shape index: {}]  }
   0x1   :  { %v17_v0 = vld [vmem:[%s85_s1] sm:$0xff] }
   0x2   :  { %v18_v1 = vld [vmem:[%s84_s0] sm:$0xff] }
   0x3   :  { %v42_v2 = vld [vmem:[%s86_s2] ss:$0 sm:$0xff] }
   0x4   :  { %v26_v3 = vmul.f32 %v42_v2, %v18_v1  ;;  %v43_v4 = vld [vmem:[%s87_s3] ss:$0 sm:$0xff] }
   0x6   :  { %v27_v5 = vadd.f32 %v26_v3, %v17_v0 }
   0x8   :  { %v35_v6 = vadd.f32 %v43_v4, %v27_v5 }
   0xa   :  { %v36_v7 = vmax.f32 %v35_v6, 0.0 }
   0xc   :  { %37 = vst [vmem:[%s88_s4] sm:$0xff] %v36_v7 }

// kernel: basic_encoder.50
= control target key start
LH: loop header
LB: loop body
LE: loop exit
PB: predicated region body
PF: predicated region fallthrough
CT: control target
= control target key end

     0   :  { %vm1123_vm0 = vmmov 0   ;;  %s1381_s1 = inlined_call_operand.vmem [shape: bf16[1152,128], index: 1, kind: input, shape index: {}]   ;;  %s1382_s0 = inlined_call_operand.vmem [shape: bf16[8,1152], index: 0, kind: input, shape index: {}]   ;;  %s1383_s2 = inlined_call_operand.vmem [shape: f32[1,128], index: 2, kind: input, shape index: {}]   ;;  %s1384_s3 = inlined_call_operand.vmem [shape: f32[8,128], index: 3, kind: output, shape index: {}]  }
   0x1   :  { %v1041_v0 = vld [vmem:[%s1381_s1 + $0x78] sm:$0xff]   ;;  %v1045_v4 = vld [vmem:[%s1381_s1 + $0x70] sm:$0xff]   ;;  %v1049_v8 = vld [vmem:[%s1381_s1 + $0x68] sm:$0xff]  }
   0x2   :  { %v1042_v1 = vld [vmem:[%s1381_s1 + $0x38] sm:$0xff]   ;;  %922 = vmatprep.subr.bf16.mxu0 %v1041_v0  ;;  %v1046_v5 = vld [vmem:[%s1381_s1 + $0x30] sm:$0xff]   ;;  %v1050_v9 = vld [vmem:[%s1381_s1 + $0x28] sm:$0xff]  }
   0x3   :  { %v1043_v2 = vld [vmem:[%s1381_s1 + $0xf8] sm:$0xff]   ;;  %923 = vmatpush3.bf16.msra.mxu0 %v1042_v1  ;;  %v1047_v6 = vld [vmem:[%s1381_s1 + $0xf0] sm:$0xff]   ;;  %v1051_v10 = vld [vmem:[%s1381_s1 + $0xe8] sm:$0xff]  }
   0x4   :  { %v1044_v3 = vld [vmem:[%s1381_s1 + $0xb8] sm:$0xff]   ;;  %944 = vmatprep.subr.bf16.mxu1 %v1043_v2  ;;  %924 = vmatprep.subr.bf16.mxu0 %v1045_v4  ;;  %v1048_v7 = vld [vmem:[%s1381_s1 + $0xb0] sm:$0xff]   ;;  %v1052_v11 = vld [vmem:[%s1381_s1 + $0xa8] sm:$0xff]  }
   0x5   :  { %945 = vmatpush3.bf16.msra.mxu1 %v1044_v3  ;;  %v1053_v12 = vld [vmem:[%s1381_s1 + $0x60] sm:$0xff]   ;;  %v1057_v16 = vld [vmem:[%s1381_s1 + $0x58] sm:$0xff]   ;;  %v1061_v20 = vld [vmem:[%s1381_s1 + $0x50] sm:$0xff]  }
   0x6   :  { %946 = vmatprep.subr.bf16.mxu1 %v1047_v6  ;;  %v1054_v13 = vld [vmem:[%s1381_s1 + $0x20] sm:$0xff]   ;;  %v1058_v17 = vld [vmem:[%s1381_s1 + $0x18] sm:$0xff]   ;;  %v1062_v21 = vld [vmem:[%s1381_s1 + $0x10] sm:$0xff]  }
   0x7   :  { %925 = vmatpush3.bf16.msra.mxu0 %v1046_v5  ;;  %v1055_v14 = vld [vmem:[%s1381_s1 + $0xe0] sm:$0xff]   ;;  %v1059_v18 = vld [vmem:[%s1381_s1 + $0xd8] sm:$0xff]   ;;  %v1063_v22 = vld [vmem:[%s1381_s1 + $0xd0] sm:$0xff]  }
   0x8   :  { %926 = vmatprep.subr.bf16.mxu0 %v1049_v8  ;;  %v1056_v15 = vld [vmem:[%s1381_s1 + $0xa0] sm:$0xff]   ;;  %v1060_v19 = vld [vmem:[%s1381_s1 + $0x98] sm:$0xff]   ;;  %v1064_v23 = vld [vmem:[%s1381_s1 + $0x90] sm:$0xff]  }
   0x9   :  { %947 = vmatpush3.bf16.msra.mxu1 %v1048_v7  ;;  %v1065_v24 = vld [vmem:[%s1381_s1 + $0x48] sm:$0xff]   ;;  %v1069_v28 = vld [vmem:[%s1381_s1 + $0x40] sm:$0xff]   ;;  %v1075_v35 = vld [vmem:[%s1381_s1 + $0x178] sm:$0xff]  }
   0xa   :  { %948 = vmatprep.subr.bf16.mxu1 %v1051_v10  ;;  %v1066_v25 = vld [vmem:[%s1381_s1 + $0x8] sm:$0xff]   ;;  %v1070_v29 = vld [vmem:[%s1381_s1] sm:$0xff]   ;;  %v1078_v39 = vld [vmem:[%s1381_s1 + $0x138] sm:$0xff]  }
   0xb   :  { %927 = vmatpush3.bf16.msra.mxu0 %v1050_v9  ;;  %v1067_v26 = vld [vmem:[%s1381_s1 + $0xc8] sm:$0xff]   ;;  %v1071_v30 = vld [vmem:[%s1381_s1 + $0xc0] sm:$0xff]   ;;  %v1079_v40 = vld [vmem:[%s1381_s1 + $0x1f8] sm:$0xff]   ;;  %v1122_v9 = vmov 0.0  }
   0xc   :  { %928 = vmatprep.subr.bf16.mxu0 %v1053_v12  ;;  %v1068_v27 = vld [vmem:[%s1381_s1 + $0x88] sm:$0xff]   ;;  %v15_v31 = vld [vmem:[%s1382_s0] sm:$0xff]  ;;  %v1080_v41 = vld [vmem:[%s1381_s1 + $0x1b8] sm:$0xff]  }
   0xd   :  { %949 = vmatpush3.bf16.msra.mxu1 %v1052_v11  ;;  %v841_v32 = vcombine.low %v15_v31, %v15_v31  ;;  %v842_v33 = vcombine.high %v15_v31, %v15_v31  ;;  %v1074_v34 = vld [vmem:[%s1381_s1 + $0x80] sm:$0xff]   ;;  %v16_v36 = vld [vmem:[%s1382_s0 + $0x8] sm:$0xff]  ;;  %v1081_v42 = vld [vmem:[%s1381_s1 + $0x170] sm:$0xff]  }
   0xe   :  { %950 = vmatprep.subr.bf16.mxu1 %v1055_v14  ;;  %v843_v37 = vcombine.low %v16_v36, %v16_v36  ;;  %v844_v38 = vcombine.high %v16_v36, %v16_v36  ;;  %v1082_v43 = vld [vmem:[%s1381_s1 + $0x130] sm:$0xff]   ;;  %v1085_v46 = vld [vmem:[%s1381_s1 + $0x168] sm:$0xff]   ;;  %v1089_v50 = vld [vmem:[%s1381_s1 + $0x160] sm:$0xff]  }
   0xf   :  { %929 = vmatpush3.bf16.msra.mxu0 %v1054_v13  ;;  %667 = vmatprep.mubr.bf16.mxu0 %v842_v33  ;;  %v1083_v44 = vld [vmem:[%s1381_s1 + $0x1f0] sm:$0xff]   ;;  %v1086_v47 = vld [vmem:[%s1381_s1 + $0x128] sm:$0xff]   ;;  %v1090_v51 = vld [vmem:[%s1381_s1 + $0x120] sm:$0xff]  }
  0x10   :  { %930 = vmatprep.subr.bf16.mxu0 %v1057_v16  ;;  %707 = vmatprep.mubr.bf16.mxu1 %v844_v38  ;;  %v1084_v45 = vld [vmem:[%s1381_s1 + $0x1b0] sm:$0xff]   ;;  %v1087_v48 = vld [vmem:[%s1381_s1 + $0x1e8] sm:$0xff]   ;;  %v1091_v52 = vld [vmem:[%s1381_s1 + $0x1e0] sm:$0xff]  }
  0x11   :  { %951 = vmatpush3.bf16.msra.mxu1 %v1056_v15  ;;  %v1088_v49 = vld [vmem:[%s1381_s1 + $0x1a8] sm:$0xff]   ;;  %v1092_v53 = vld [vmem:[%s1381_s1 + $0x1a0] sm:$0xff]   ;;  %v1093_v54 = vld [vmem:[%s1381_s1 + $0x158] sm:$0xff]  }
  0x12   :  { %952 = vmatprep.subr.bf16.mxu1 %v1059_v18  ;;  %v1094_v55 = vld [vmem:[%s1381_s1 + $0x118] sm:$0xff]   ;;  %v1097_v58 = vld [vmem:[%s1381_s1 + $0x150] sm:$0xff]   ;;  %v1101_v62 = vld [vmem:[%s1381_s1 + $0x148] sm:$0xff]  }
  0x13   :  { %931 = vmatpush3.bf16.msra.mxu0 %v1058_v17  ;;  %v1095_v56 = vld [vmem:[%s1381_s1 + $0x1d8] sm:$0xff]   ;;  %v1098_v59 = vld [vmem:[%s1381_s1 + $0x110] sm:$0xff]   ;;  %v1102_v63 = vld [vmem:[%s1381_s1 + $0x108] sm:$0xff]  }
  0x14   :  { %932 = vmatprep.subr.bf16.mxu0 %v1061_v20  ;;  %v1096_v57 = vld [vmem:[%s1381_s1 + $0x198] sm:$0xff]   ;;  %v1099_v60 = vld [vmem:[%s1381_s1 + $0x1d0] sm:$0xff]   ;;  %v1103_v0 = vld [vmem:[%s1381_s1 + $0x1c8] sm:$0xff]  }
  0x15   :  { %953 = vmatpush3.bf16.msra.mxu1 %v1060_v19  ;;  %v1100_v61 = vld [vmem:[%s1381_s1 + $0x190] sm:$0xff]   ;;  %v1104_v1 = vld [vmem:[%s1381_s1 + $0x188] sm:$0xff]   ;;  %v1105_v2 = vld [vmem:[%s1381_s1 + $0x140] sm:$0xff]  }
  0x16   :  { %954 = vmatprep.subr.bf16.mxu1 %v1063_v22  ;;  %v1106_v3 = vld [vmem:[%s1381_s1 + $0x100] sm:$0xff]   ;;  %v17_v5 = vld [vmem:[%s1382_s0 + $0x10] sm:$0xff]  ;;  %v18_v10 = vld [vmem:[%s1382_s0 + $0x18] sm:$0xff] }
  0x17   :  { %933 = vmatpush3.bf16.msra.mxu0 %v1062_v21  ;;  %v1107_v4 = vld [vmem:[%s1381_s1 + $0x1c0] sm:$0xff]   ;;  %v845_v6 = vcombine.low %v17_v5, %v17_v5  ;;  %v846_v7 = vcombine.high %v17_v5, %v17_v5  ;;  %v847_v11 = vcombine.low %v18_v10, %v18_v10  ;;  %v848_v12 = vcombine.high %v18_v10, %v18_v10  ;;  %v1113_v13 = vld [vmem:[%s1381_s1 + $0x238] sm:$0xff]   ;;  %v1114_v14 = vld [vmem:[%s1381_s1 + $0x230] sm:$0xff]  }
  0x18   :  { %934 = vmatprep.subr.bf16.mxu0 %v1065_v24  ;;  %v1110_v8 = vld [vmem:[%s1381_s1 + $0x180] sm:$0xff]   ;;  %v1115_v15 = vld [vmem:[%s1381_s1 + $0x228] sm:$0xff]   ;;  %v1117_v17 = vld [vmem:[%s1381_s1 + $0x218] sm:$0xff]  }
  0x19   :  { %955 = vmatpush3.bf16.msra.mxu1 %v1064_v23  ;;  %v1116_v16 = vld [vmem:[%s1381_s1 + $0x220] sm:$0xff]   ;;  %v1118_v18 = vld [vmem:[%s1381_s1 + $0x210] sm:$0xff]   ;;  %v1119_v19 = vld [vmem:[%s1381_s1 + $0x208] sm:$0xff]  }
  0x1a   :  { %956 = vmatprep.subr.bf16.mxu1 %v1067_v26  ;;  %v1120_v20 = vld [vmem:[%s1381_s1 + $0x200] sm:$0xff]  }
  0x1b   :  { %935 = vmatpush3.bf16.msra.mxu0 %v1066_v25  ;;  %v1121_v21 = vld [vmem:[%s1382_s0 + $0x20] ss:$0 sps:$4 sm:$0xff]  }
  0x1c   :  { %936 = vmatprep.subr.bf16.mxu0 %v1069_v28 }
  0x1d   :  { %957 = vmatpush3.bf16.msra.mxu1 %v1068_v27 }
  0x1e   :  { %958 = vmatprep.subr.bf16.mxu1 %v1071_v30 }
  0x1f   :  { %937 = vmatpush3.bf16.msra.mxu0 %v1070_v29 }
  0x20   :  { %966 = vmatprep.subr.bf16.mxu0 %v1075_v35 }
  0x21   :  { %959 = vmatpush3.bf16.msra.mxu1 %v1074_v34 }
  0x22   :  { %668 = vmatmul.mubr.bf16.vlgmr.msra.gmra.mxu0 %v841_v32  ;;  %988 = vmatprep.subr.bf16.mxu1 %v1079_v40 }
  0x23   :  { %967 = vmatpush3.bf16.msra.mxu0 %v1078_v39  ;;  %747 = vmatprep.mubr.bf16.mxu0 %v846_v7  ;;  %v840_v39 = vld [vmem:[%s1383_s2] ss:$0 sm:$0xff] }
  0x24   :  { %708 = vmatmul.mubr.bf16.vlgmr.msra.gmra.mxu1 %v843_v37  ;;  %968 = vmatprep.subr.bf16.mxu0 %v1081_v42 }
  0x25   :  { %989 = vmatpush3.bf16.msra.mxu1 %v1080_v41  ;;  %787 = vmatprep.mubr.bf16.mxu1 %v848_v12 }
  0x26   :  { %990 = vmatprep.subr.bf16.mxu1 %v1083_v44 }
  0x27   :  { %969 = vmatpush3.bf16.msra.mxu0 %v1082_v43 }
  0x28   :  { %970 = vmatprep.subr.bf16.mxu0 %v1085_v46 }
  0x29   :  { %991 = vmatpush3.bf16.msra.mxu1 %v1084_v45 }
  0x2a   :  { %992 = vmatprep.subr.bf16.mxu1 %v1087_v48 }
  0x2b   :  { %971 = vmatpush3.bf16.msra.mxu0 %v1086_v47 }
  0x2c   :  { %972 = vmatprep.subr.bf16.mxu0 %v1089_v50 }
  0x2d   :  { %993 = vmatpush3.bf16.msra.mxu1 %v1088_v49 }
  0x2e   :  { %994 = vmatprep.subr.bf16.mxu1 %v1091_v52 }
  0x2f   :  { %973 = vmatpush3.bf16.msra.mxu0 %v1090_v51 }
  0x30   :  { %974 = vmatprep.subr.bf16.mxu0 %v1093_v54 }
  0x31   :  { %995 = vmatpush3.bf16.msra.mxu1 %v1092_v53 }
  0x32   :  { %996 = vmatprep.subr.bf16.mxu1 %v1095_v56 }
  0x33   :  { %975 = vmatpush3.bf16.msra.mxu0 %v1094_v55 }
  0x34   :  { %976 = vmatprep.subr.bf16.mxu0 %v1097_v58 }
  0x35   :  { %997 = vmatpush3.bf16.msra.mxu1 %v1096_v57 }
  0x36   :  { %998 = vmatprep.subr.bf16.mxu1 %v1099_v60 }
  0x37   :  { %977 = vmatpush3.bf16.msra.mxu0 %v1098_v59 }
  0x38   :  { %978 = vmatprep.subr.bf16.mxu0 %v1101_v62 }
  0x39   :  { %999 = vmatpush3.bf16.msra.mxu1 %v1100_v61 }
  0x3a   :  { %1000 = vmatprep.subr.bf16.mxu1 %v1103_v0 }
  0x3b   :  { %979 = vmatpush3.bf16.msra.mxu0 %v1102_v63 }
  0x3c   :  { %980 = vmatprep.subr.bf16.mxu0 %v1105_v2 }
  0x3d   :  { %1001 = vmatpush3.bf16.msra.mxu1 %v1104_v1 }
  0x3e   :  { %1002 = vmatprep.subr.bf16.mxu1 %v1107_v4 }
  0x3f   :  { %981 = vmatpush3.bf16.msra.mxu0 %v1106_v3 }
  0x40   :  { %1019 = vmatprep.subr.bf16.mxu0 %v1122_v9 }
  0x41   :  { %1003 = vmatpush3.bf16.msra.mxu1 %v1110_v8 }
  0x42   :  { %748 = vmatmul.mubr.bf16.vlgmr.msra.gmra.mxu0 %v845_v6 }
  0x43   :  { %1020 = vmatpush3.bf16.msra.mxu0 %v1113_v13  ;;  %1035 = vmatprep.mubr.msk.bf16.mxu0 %vm1123_vm0, %v1122_v9 }
  0x44   :  { %788 = vmatmul.mubr.bf16.vlgmr.msra.gmra.mxu1 %v847_v11  ;;  %1021 = vmatprep.subr.bf16.mxu0 %v1122_v9 }
  0x47   :  { %1022 = vmatpush3.bf16.msra.mxu0 %v1114_v14 }
  0x48   :  { %1023 = vmatprep.subr.bf16.mxu0 %v1122_v9 }
  0x4b   :  { %1024 = vmatpush3.bf16.msra.mxu0 %v1115_v15 }
  0x4c   :  { %1025 = vmatprep.subr.bf16.mxu0 %v1122_v9 }
  0x4f   :  { %1026 = vmatpush3.bf16.msra.mxu0 %v1116_v16 }
  0x50   :  { %1027 = vmatprep.subr.bf16.mxu0 %v1122_v9 }
  0x53   :  { %1028 = vmatpush3.bf16.msra.mxu0 %v1117_v17 }
  0x54   :  { %1029 = vmatprep.subr.bf16.mxu0 %v1122_v9 }
  0x57   :  { %1030 = vmatpush3.bf16.msra.mxu0 %v1118_v18 }
  0x58   :  { %1031 = vmatprep.subr.bf16.mxu0 %v1122_v9 }
  0x5b   :  { %1032 = vmatpush3.bf16.msra.mxu0 %v1119_v19 }
  0x5c   :  { %1033 = vmatprep.subr.bf16.mxu0 %v1122_v9 }
  0x5f   :  { %1034 = vmatpush3.bf16.msra.mxu0 %v1120_v20 }
  0x62   :  { %1036 = vmatmul.mubr.bf16.vlgmr.msra.gmra.mxu0 %v1121_v21 }
  0xe2   :  { %v938_v22 = vpop.f32.mrf.mxu0 }
  0xe4   :  { %v939_v23 = vpop.f32.mrf.mxu0  ;;  %v960_v24 = vpop.f32.mrf.mxu1 }
  0xe5   :  { %v940_v38 = vadd.f32 %v939_v23, %v938_v22 }
  0xe6   :  { %v941_v25 = vpop.f32.mrf.mxu0  ;;  %v961_v26 = vpop.f32.mrf.mxu1 }
  0xe7   :  { %v670_v40 = vadd.f32 %v940_v38, %v840_v39  ;;  %v962_v41 = vadd.f32 %v961_v26, %v960_v24 }
  0xe8   :  { %v942_v27 = vpop.f32.mrf.mxu0  ;;  %v963_v28 = vpop.f32.mrf.mxu1 }
  0xe9   :  { %v710_v43 = vadd.f32 %v962_v41, %v670_v40 }
  0xea   :  { %v964_v29 = vpop.f32.mrf.mxu1 }
 0x102   :  { %v982_v30 = vpop.f32.mrf.mxu0 }
 0x104   :  { %v983_v31 = vpop.f32.mrf.mxu0  ;;  %v1004_v32 = vpop.f32.mrf.mxu1 }
 0x105   :  { %v984_v42 = vadd.f32 %v983_v31, %v982_v30 }
 0x106   :  { %v985_v33 = vpop.f32.mrf.mxu0  ;;  %v1005_v34 = vpop.f32.mrf.mxu1 }
 0x107   :  { %v750_v44 = vadd.f32 %v984_v42, %v710_v43  ;;  %v1006_v45 = vadd.f32 %v1005_v34, %v1004_v32 }
 0x108   :  { %v986_v35 = vpop.f32.mrf.mxu0  ;;  %v1007_v36 = vpop.f32.mrf.mxu1 }
 0x109   :  { %v790_v46 = vadd.f32 %v1006_v45, %v750_v44 }
 0x10a   :  { %v1008_v37 = vpop.f32.mrf.mxu1 }
 0x122   :  { %v829_v47 = vpop.f32.mrf.mxu0 }
 0x123   :  { %v830_v48 = vadd.f32 %v829_v47, %v790_v46 }
 0x124   :  { %v1037_v49 = vpop.f32.mrf.mxu0 }
 0x125   :  { %835 = vst [vmem:[%s1384_s3] sm:$0xff] %v830_v48 }
 0x126   :  { %v832_v50 = vpop.f32.mrf.mxu0 }
 0x128   :  { %v1038_v51 = vpop.f32.mrf.mxu0 }

// kernel: basic_encoder.57
= control target key start
LH: loop header
LB: loop body
LE: loop exit
PB: predicated region body
PF: predicated region fallthrough
CT: control target
= control target key end

     0   :  { %v214_v1 = vmov 0.0   ;;  %vm215_vm0 = vmmov 0   ;;  %s270_s0 = inlined_call_operand.vmem [shape: bf16[8,128], index: 0, kind: input, shape index: {}]   ;;  %s271_s1 = inlined_call_operand.vmem [shape: bf16[128,128], index: 1, kind: input, shape index: {}]   ;;  %s272_s2 = inlined_call_operand.vmem [shape: f32[1,128], index: 2, kind: input, shape index: {}]   ;;  %s273_s3 = inlined_call_operand.hbm [shape: f32[8,128], index: 3, kind: output, shape index: {}]  }
   0x1   :  { %v184_v0 = vld [vmem:[%s271_s1 + $0x38] sm:$0xff]   ;;  %161 = vmatprep.subr.bf16.mxu0 %v214_v1  ;;  %v185_v2 = vld [vmem:[%s271_s1 + $0x30] sm:$0xff]   ;;  %177 = vmatprep.mubr.msk.bf16.mxu0 %vm215_vm0, %v214_v1  ;;  %v186_v3 = vld [vmem:[%s271_s1 + $0x28] sm:$0xff]  }
   0x2   :  { %162 = vmatpush3.bf16.msra.mxu0 %v184_v0 }
   0x3   :  { %163 = vmatprep.subr.bf16.mxu0 %v214_v1 }
   0x6   :  { %164 = vmatpush3.bf16.msra.mxu0 %v185_v2 }
   0x7   :  { %165 = vmatprep.subr.bf16.mxu0 %v214_v1 }
   0x8   :  { %8 = vsyncpa [#allocation3], 0  ;;  %v187_v4 = vld [vmem:[%s271_s1 + $0x20] sm:$0xff]   ;;  %v188_v5 = vld [vmem:[%s271_s1 + $0x18] sm:$0xff]   ;;  %s216_s5 = smov [#allocation2]  }
   0x9   :  { %v189_v6 = vld [vmem:[%s271_s1 + $0x10] sm:$0xff]   ;;  %v190_v7 = vld [vmem:[%s271_s1 + $0x8] sm:$0xff]   ;;  %v191_v8 = vld [vmem:[%s271_s1] sm:$0xff]   ;;  %s135_s6 = sshll.u32 %s216_s5, 4  ;;  %s136_s6 = int_to_ptr.vmem [resolvable:$true] %s135_s6 }
   0xa   :  { %166 = vmatpush3.bf16.msra.mxu0 %v186_v3  ;;  %v16_v9 = vld [vmem:[%s270_s0] sm:$0xf]  ;;  %s192_s1 = scalar_lea.vmem %s136_s6, 128  ;;  %p197_p1 = scmp.lt.s32.totalorder %s136_s6, %s136_s6 }
   0xb   :  { %167 = vmatprep.subr.bf16.mxu0 %v214_v1  ;;  %v143_v10 = vld [vmem:[%s272_s2] ss:$0 sm:$0xff]  ;;  %p193_p0 = scmp.ne.s32.totalorder %s136_s6, %s192_s1  ;;  %p198_p2 = scmp.lt.s32.totalorder %s192_s1, %s192_s1 }
   0xd   :  { %p199_p3 = por %p198_p2, %p197_p1 }
   0xe   :  { %168 = vmatpush3.bf16.msra.mxu0 %v187_v4 }
   0xf   :  { %169 = vmatprep.subr.bf16.mxu0 %v214_v1  ;;  %p200_p4 = pnand %p199_p3, %p193_p0 }
  0x12   :  { %170 = vmatpush3.bf16.msra.mxu0 %v188_v5 }
  0x13   :  { %171 = vmatprep.subr.bf16.mxu0 %v214_v1 }
  0x16   :  { %172 = vmatpush3.bf16.msra.mxu0 %v189_v6 }
  0x17   :  { %173 = vmatprep.subr.bf16.mxu0 %v214_v1 }
  0x1a   :  { %174 = vmatpush3.bf16.msra.mxu0 %v190_v7 }
  0x1b   :  { %175 = vmatprep.subr.bf16.mxu0 %v214_v1 }
  0x1e   :  { %176 = vmatpush3.bf16.msra.mxu0 %v191_v8 }
  0x21   :  { %178 = vmatmul.mubr.bf16.vlgmr.msra.gmra.mxu0 %v16_v9 }
  0xe1   :  { %v122_v11 = vpop.f32.mrf.mxu0 }
  0xe2   :  { %v123_v12 = vadd.f32 %v143_v10, %v122_v11 }
  0xe3   :  { %v179_v13 = vpop.f32.mrf.mxu0 }
  0xe4   :  { %128 = vst [vmem:[#allocation2] sm:$0xff] %v123_v12 }
  0xe5   :  { %v125_v14 = vpop.f32.mrf.mxu0 }
  0xe6   :  { %203 = shalt.err (!%p200_p4)
}
  0xe7   :  { %138 = dma.vmem_to_hbm [thread:$0]  %s136_s6, 128, %s273_s3, [#allocation3]   ;;  %v180_v15 = vpop.f32.mrf.mxu0 }
  0xe8   :  { %212 = dma.done.wait [#allocation3], 128  }
  0xe9   :  { %213 = vsyncadd [#allocation3], 4294967168 }
  0xea   :  { %142 = vsyncpa [#allocation3], 1 }

</bundles_post_ra>
